<compile_context>
chip_gen: v7x
topology: tpu7x:2x2x1
jax: 0.10.0
libtpu: 0.0.40
codegen_flags: <defaults>
</compile_context>

<pallas_src>
import functools

import jax
import jax.numpy as jnp
from jax.experimental import pallas as pl
from jax.experimental.pallas import tpu as pltpu

PAD = 128    # zero halo (lanes) on each side of the lane-batched window
B_MAX = 32   # images batched per grid step (sized against v7x's 64 MiB VMEM)


def _round_up(v, m):
    return (v + m - 1) // m * m


# ----------------------------- fused kernel ---------------------------------

def _net_kernel(hwp, wp, slot, pad,
                x_ref,
                w1_ref, b1_ref, w2_ref, b2_ref, w3_ref, b3_ref, w4_ref, b4_ref,
                o_ref,
                pad_ref):
    # x_ref   : (1, CIN_PAD, WIN)  row-padded, gap-separated batch of images
    # wN_ref  : (9, cout_pad, cin_pad)  per-tap weights (zero padded to x8)
    # bN_ref  : (cout_pad, 1)
    # o_ref   : (1, 1, WIN)        output channel 0, same lane layout
    # pad_ref : (C_MAX, PAD + WIN + PAD) activation buffer with zero halos
    win = x_ref.shape[2]
    c_max = pad_ref.shape[0]

    # Zero only the halo columns (never written elsewhere); everything inside
    # the window is fully re-established by the masked writes of each layer.
    zeros_halo = jnp.zeros((c_max, pad), jnp.float32)
    pad_ref[:, 0:pad] = zeros_halo
    pad_ref[:, pad + win:pad + win + pad] = zeros_halo

    # Validity mask: 1 for real pixels, 0 for the per-row zero-pad columns and
    # the inter-image gaps (keeps those columns zero across layers).
    q = jax.lax.broadcasted_iota(jnp.int32, (1, win), 1) % slot
    colp = q % wp
    valid = jnp.logical_and(q < hwp,
                            jnp.logical_and(colp >= 1, colp <= wp - 2))

    # Stage the (already padded / gapped) input chunk into the window.
    pad_ref[0:x_ref.shape[1], pad:pad + win] = x_ref[0]

    def conv3x3_relu(w_ref, b_ref, write_back):
        cout, cin = w_ref.shape[1], w_ref.shape[2]
        acc = jnp.zeros((cout, win), jnp.float32)
        for kh in range(3):
            for kw in range(3):
                off = (kh - 1) * wp + (kw - 1)
                rhs = pad_ref[0:cin, pad + off:pad + off + win]
                acc = acc + jnp.dot(w_ref[kh * 3 + kw], rhs,
                                    preferred_element_type=jnp.float32)
        act = jnp.maximum(acc + b_ref[...], 0.0)        # fused bias + ReLU
        if write_back:
            pad_ref[0:cout, pad:pad + win] = jnp.where(valid, act, 0.0)
        return act

    conv3x3_relu(w1_ref, b1_ref, True)           # ( 8 -> 16, real  2 -> 10)
    conv3x3_relu(w2_ref, b2_ref, True)           # (16 -> 24, real 10 -> 20)
    conv3x3_relu(w3_ref, b3_ref, True)           # (24 -> 16, real 20 -> 10)
    act = conv3x3_relu(w4_ref, b4_ref, False)    # (16 ->  8, real 10 ->  1)
    o_ref[0] = act[0:1, :]                       # lane-dense full-width store


# ------------------------------- wrapper -------------------------------------

@jax.jit
def net_forward(x_nchw, params):
    """x_nchw: (N, 2, H, W) f32 -> (N, 1, H, W) f32 (matches PyTorch layout)."""
    n, c, h, w = x_nchw.shape
    (w1, b1), (w2, b2), (w3, b3), (w4, b4) = params
    cin_pad = w1.shape[2]
    c_max = max(w1.shape[1], w2.shape[1], w3.shape[1], w4.shape[1])

    wp = w + 2                                # image row width + 2 zero columns
    hwp = h * wp
    slot = _round_up(hwp + wp + 1, 128)       # per-image columns (image + gap)
    b_imgs = min(n, B_MAX)                    # images batched on the lane axis
    chunks = -(-n // b_imgs)
    n_pad = chunks * b_imgs
    win = b_imgs * slot

    # Host-side one-time relayout of the tiny input: zero-pad channels to
    # cin_pad, add one zero column per row side, flatten, pad to SLOT (the
    # inter-image zero gap) and concatenate b_imgs images along the lane axis.
    x = jnp.pad(x_nchw, ((0, n_pad - n), (0, cin_pad - c), (0, 0), (1, 1)))
    x = x.reshape(n_pad, cin_pad, hwp)
    x = jnp.pad(x, ((0, 0), (0, 0), (0, slot - hwp)))
    x = x.reshape(chunks, b_imgs, cin_pad, slot)
    x = jnp.transpose(x, (0, 2, 1, 3)).reshape(chunks, cin_pad, win)

    # Only split across TensorCores (v7x) when each step carries real work.
    dims = ("parallel",) if (chunks >= 2 and b_imgs >= 32) else ("arbitrary",)

    out = pl.pallas_call(
        functools.partial(_net_kernel, hwp, wp, slot, PAD),
        out_shape=jax.ShapeDtypeStruct((chunks, 1, win), jnp.float32),
        grid=(chunks,),
        in_specs=[
            pl.BlockSpec((1, cin_pad, win), lambda i: (i, 0, 0)),
            pl.BlockSpec(w1.shape, lambda i: (0, 0, 0)),
            pl.BlockSpec(b1.shape, lambda i: (0, 0)),
            pl.BlockSpec(w2.shape, lambda i: (0, 0, 0)),
            pl.BlockSpec(b2.shape, lambda i: (0, 0)),
            pl.BlockSpec(w3.shape, lambda i: (0, 0, 0)),
            pl.BlockSpec(b3.shape, lambda i: (0, 0)),
            pl.BlockSpec(w4.shape, lambda i: (0, 0, 0)),
            pl.BlockSpec(b4.shape, lambda i: (0, 0)),
        ],
        out_specs=pl.BlockSpec((1, 1, win), lambda i: (i, 0, 0)),
        scratch_shapes=[pltpu.VMEM((c_max, PAD + win + PAD), jnp.float32)],
        compiler_params=pltpu.CompilerParams(dimension_semantics=dims),
    )(x, w1, b1, w2, b2, w3, b3, w4, b4)

    # Strip inter-image gaps and per-row zero-pad columns, restore NCHW.
    out = out.reshape(n_pad, slot)[:, :hwp]
    out = out.reshape(n_pad, h, wp)[:, :, 1:w + 1]
    return out[:n].reshape(n, 1, h, w)


# ----------------- parameter construction & one-time relayout ----------------

def _uniform(key, shape, bound):
    return jax.random.uniform(key, shape, jnp.float32, -bound, bound)


def init_params(key):
    """PyTorch-style uniform(-1/sqrt(fan_in), 1/sqrt(fan_in)) init."""
    ks = jax.random.split(key, 8)

    def conv_w(k, cout, cin):            # Conv2d weight, OIHW
        bound = 1.0 / (cin * 9) ** 0.5
        return _uniform(k, (cout, cin, 3, 3), bound), bound

    def deconv_w(k, cin, cout):          # ConvTranspose2d weight, (Cin,Cout,kH,kW)
        bound = 1.0 / (cout * 9) ** 0.5
        return _uniform(k, (cin, cout, 3, 3), bound), bound

    w1, b1b = conv_w(ks[0], 10, 2)
    b1 = _uniform(ks[1], (10,), b1b)
    w2, b2b = conv_w(ks[2], 20, 10)
    b2 = _uniform(ks[3], (20,), b2b)
    w3, b3b = deconv_w(ks[4], 20, 10)
    b3 = _uniform(ks[5], (10,), b3b)
    w4, b4b = deconv_w(ks[6], 10, 1)
    b4 = _uniform(ks[7], (1,), b4b)
    return (w1, b1), (w2, b2), (w3, b3), (w4, b4)


def _conv_oihw_to_taps(w_oihw, cout_pad, cin_pad):
    # (O, I, 3, 3) -> (9, cout_pad, cin_pad), tap index t = kh*3 + kw,
    # zero-padded so every in-kernel sublane access is full / unmasked.
    o, i = w_oihw.shape[0], w_oihw.shape[1]
    taps = jnp.transpose(w_oihw, (2, 3, 0, 1)).reshape(9, o, i)
    return jnp.pad(taps, ((0, 0), (0, cout_pad - o), (0, cin_pad - i)))


def _deconv_to_conv_oihw(w_t):
    # ConvTranspose2d (Cin, Cout, kH, kW) with stride=1/pad=1/k=3 equals a
    # regular conv with the spatially flipped, (in,out)-swapped weight.
    return jnp.transpose(jnp.flip(w_t, axis=(2, 3)), (1, 0, 2, 3))


def prepare_params(raw_params):
    """One-time relayout into padded (9, cout_pad, cin_pad) tap weights."""
    (w1, b1), (w2, b2), (w3, b3), (w4, b4) = raw_params
    rp = lambda v: _round_up(v, 8)

    def pb(b, cout_pad):
        return jnp.pad(b, (0, cout_pad - b.shape[0])).reshape(cout_pad, 1)

    return (
        (_conv_oihw_to_taps(w1, rp(10), rp(2)), pb(b1, rp(10))),
        (_conv_oihw_to_taps(w2, rp(20), rp(10)), pb(b2, rp(20))),
        (_conv_oihw_to_taps(_deconv_to_conv_oihw(w3), rp(10), rp(20)),
         pb(b3, rp(10))),
        (_conv_oihw_to_taps(_deconv_to_conv_oihw(w4), rp(1), rp(10)),
         pb(b4, rp(1))),
    )


# ------------------------------ reference ------------------------------------

def _reference_forward(x_nhwc, raw_params):
    """Pure-JAX reference (lax.conv) for a sanity check."""
    (w1, b1), (w2, b2), (w3, b3), (w4, b4) = raw_params
    dn = jax.lax.conv_dimension_numbers(x_nhwc.shape, (3, 3, 1, 1),
                                        ("NHWC", "HWIO", "NHWC"))

    def conv(x, w_hwio, b):
        y = jax.lax.conv_general_dilated(x, w_hwio, (1, 1), "SAME",
                                         dimension_numbers=dn)
        return jax.nn.relu(y + b[None, None, None, :])

    def oihw_to_hwio(w):
        return jnp.transpose(w, (2, 3, 1, 0))

    def deconv_to_hwio(w_t):
        return jnp.transpose(jnp.flip(w_t, axis=(2, 3)), (2, 3, 0, 1))

    h = conv(x_nhwc, oihw_to_hwio(w1), b1)
    h = conv(h, oihw_to_hwio(w2), b2)
    h = conv(h, deconv_to_hwio(w3), b3)
    h = conv(h, deconv_to_hwio(w4), b4)
    return h


if __name__ == "__main__":
    key = jax.random.PRNGKey(0)
    k_param, k_x = jax.random.split(key)

    raw_params = init_params(k_param)
    params = prepare_params(raw_params)

    # PyTorch-style NCHW input (2, 2, 16, 16).
    N, C, H, W = 2, 2, 16, 16
    x_nchw = jax.random.normal(k_x, (N, C, H, W), jnp.float32)

    out = net_forward(x_nchw, params)
    out = jax.block_until_ready(out)
    assert out.shape == (N, 1, H, W), out.shape

    ref = _reference_forward(jnp.transpose(x_nchw, (0, 2, 3, 1)), raw_params)
    ref_nchw = jnp.transpose(ref, (0, 3, 1, 2))
    assert jnp.allclose(out, ref_nchw, rtol=1e-4, atol=1e-4), (
        float(jnp.max(jnp.abs(out - ref_nchw))))

    print("KERNEL_OK")
</pallas_src>

<mosaic_0001>
module attributes {stable_mosaic.version = 11 : i64} {
  func.func @_net_kernel(%arg0: i32, %arg1: memref<1x8x768xf32, #tpu.memory_space<vmem>>, %arg2: memref<9x16x8xf32, #tpu.memory_space<vmem>>, %arg3: memref<16x1xf32, #tpu.memory_space<vmem>>, %arg4: memref<9x24x16xf32, #tpu.memory_space<vmem>>, %arg5: memref<24x1xf32, #tpu.memory_space<vmem>>, %arg6: memref<9x16x24xf32, #tpu.memory_space<vmem>>, %arg7: memref<16x1xf32, #tpu.memory_space<vmem>>, %arg8: memref<9x8x16xf32, #tpu.memory_space<vmem>>, %arg9: memref<8x1xf32, #tpu.memory_space<vmem>>, %arg10: memref<1x1x768xf32, #tpu.memory_space<vmem>>, %arg11: memref<24x1024xf32, #tpu.memory_space<vmem>>) attributes {dimension_semantics = [#tpu.dimension_semantics<arbitrary>], iteration_bounds = array<i64: 1>, scalar_prefetch = 0 : i64, scratch_operands = 1 : i64, tpu.core_type = #tpu.core_type<tc>, window_params = [{transform_indices = @transform_0, window_bounds = array<i64: 1, 8, 768>}, {pipeline_mode = #tpu.pipeline_mode<synchronous>, transform_indices = @transform_1, window_bounds = array<i64: 9, 16, 8>}, {pipeline_mode = #tpu.pipeline_mode<synchronous>, transform_indices = @transform_2, window_bounds = array<i64: 16, 1>}, {pipeline_mode = #tpu.pipeline_mode<synchronous>, transform_indices = @transform_3, window_bounds = array<i64: 9, 24, 16>}, {pipeline_mode = #tpu.pipeline_mode<synchronous>, transform_indices = @transform_4, window_bounds = array<i64: 24, 1>}, {pipeline_mode = #tpu.pipeline_mode<synchronous>, transform_indices = @transform_5, window_bounds = array<i64: 9, 16, 24>}, {pipeline_mode = #tpu.pipeline_mode<synchronous>, transform_indices = @transform_6, window_bounds = array<i64: 16, 1>}, {pipeline_mode = #tpu.pipeline_mode<synchronous>, transform_indices = @transform_7, window_bounds = array<i64: 9, 8, 16>}, {pipeline_mode = #tpu.pipeline_mode<synchronous>, transform_indices = @transform_8, window_bounds = array<i64: 8, 1>}, {transform_indices = @transform_9, window_bounds = array<i64: 1, 1, 768>}]} {
    %cst = arith.constant 0.000000e+00 : f32
    %0 = vector.broadcast %cst : f32 to vector<24x128xf32>
    %c0 = arith.constant 0 : index
    %c0_0 = arith.constant 0 : index
    %1 = vector.load %arg11[%c0, %c0_0] : memref<24x1024xf32, #tpu.memory_space<vmem>>, vector<24x128xf32>
    tpu.vector_store %arg11[%c0, %c0_0], %0 {strides = array<i32>} : memref<24x1024xf32, #tpu.memory_space<vmem>>, vector<24x128xf32>,
    %c0_1 = arith.constant 0 : index
    %c896 = arith.constant 896 : index
    %2 = vector.load %arg11[%c0_1, %c896] : memref<24x1024xf32, #tpu.memory_space<vmem>>, vector<24x128xf32>
    tpu.vector_store %arg11[%c0_1, %c896], %0 {strides = array<i32>} : memref<24x1024xf32, #tpu.memory_space<vmem>>, vector<24x128xf32>,
    %3 = tpu.iota {dimensions = array<i32: 1>} : vector<1x768xi32>
    %c384_i32 = arith.constant 384 : i32
    %c0_i32 = arith.constant 0 : i32
    %4 = arith.cmpi eq, %c384_i32, %c0_i32 : i32
    %c1_i32 = arith.constant 1 : i32
    %5 = arith.select %4, %c1_i32, %c384_i32 : i32
    %6 = vector.broadcast %5 : i32 to vector<1x768xi32>
    %7 = arith.remsi %3, %6 : vector<1x768xi32>
    %c0_i32_2 = arith.constant 0 : i32
    %8 = vector.broadcast %c0_i32_2 : i32 to vector<1x768xi32>
    %9 = arith.cmpi ne, %7, %8 : vector<1x768xi32>
    %c0_i32_3 = arith.constant 0 : i32
    %10 = vector.broadcast %c0_i32_3 : i32 to vector<1x768xi32>
    %11 = arith.cmpi slt, %7, %10 : vector<1x768xi32>
    %c0_i32_4 = arith.constant 0 : i32
    %12 = arith.cmpi slt, %5, %c0_i32_4 : i32
    %13 = vector.broadcast %12 : i1 to vector<1x768xi1>
    %14 = vector.broadcast %13 : vector<1x768xi1> to vector<1x768xi1>
    %15 = arith.xori %11, %14 : vector<1x768xi1>
    %16 = arith.andi %15, %9 : vector<1x768xi1>
    %17 = vector.broadcast %5 : i32 to vector<1x768xi32>
    %18 = arith.addi %7, %17 : vector<1x768xi32>
    %19 = arith.select %16, %18, %7 : vector<1x768xi1>, vector<1x768xi32>
    %c18_i32 = arith.constant 18 : i32
    %c0_i32_5 = arith.constant 0 : i32
    %20 = arith.cmpi eq, %c18_i32, %c0_i32_5 : i32
    %c1_i32_6 = arith.constant 1 : i32
    %21 = arith.select %20, %c1_i32_6, %c18_i32 : i32
    %22 = vector.broadcast %21 : i32 to vector<1x768xi32>
    %23 = arith.remsi %19, %22 : vector<1x768xi32>
    %c0_i32_7 = arith.constant 0 : i32
    %24 = vector.broadcast %c0_i32_7 : i32 to vector<1x768xi32>
    %25 = arith.cmpi ne, %23, %24 : vector<1x768xi32>
    %c0_i32_8 = arith.constant 0 : i32
    %26 = vector.broadcast %c0_i32_8 : i32 to vector<1x768xi32>
    %27 = arith.cmpi slt, %23, %26 : vector<1x768xi32>
    %c0_i32_9 = arith.constant 0 : i32
    %28 = arith.cmpi slt, %21, %c0_i32_9 : i32
    %29 = vector.broadcast %28 : i1 to vector<1x768xi1>
    %30 = vector.broadcast %29 : vector<1x768xi1> to vector<1x768xi1>
    %31 = arith.xori %27, %30 : vector<1x768xi1>
    %32 = arith.andi %31, %25 : vector<1x768xi1>
    %33 = vector.broadcast %21 : i32 to vector<1x768xi32>
    %34 = arith.addi %23, %33 : vector<1x768xi32>
    %35 = arith.select %32, %34, %23 : vector<1x768xi1>, vector<1x768xi32>
    %c288_i32 = arith.constant 288 : i32
    %36 = vector.broadcast %c288_i32 : i32 to vector<1x768xi32>
    %37 = arith.cmpi slt, %19, %36 : vector<1x768xi32>
    %c1_i32_10 = arith.constant 1 : i32
    %38 = vector.broadcast %c1_i32_10 : i32 to vector<1x768xi32>
    %39 = arith.cmpi sge, %35, %38 : vector<1x768xi32>
    %c16_i32 = arith.constant 16 : i32
    %40 = vector.broadcast %c16_i32 : i32 to vector<1x768xi32>
    %41 = arith.cmpi sle, %35, %40 : vector<1x768xi32>
    %42 = arith.andi %39, %41 : vector<1x768xi1>
    %43 = arith.andi %37, %42 : vector<1x768xi1>
    %c0_11 = arith.constant 0 : index
    %c0_12 = arith.constant 0 : index
    %c0_13 = arith.constant 0 : index
    %44 = vector.load %arg1[%c0_11, %c0_12, %c0_13] : memref<1x8x768xf32, #tpu.memory_space<vmem>>, vector<1x8x768xf32>
    %45 = vector.shape_cast %44 : vector<1x8x768xf32> to vector<8x768xf32>
    %c0_14 = arith.constant 0 : index
    %c128 = arith.constant 128 : index
    %46 = vector.load %arg11[%c0_14, %c128] : memref<24x1024xf32, #tpu.memory_space<vmem>>, vector<8x768xf32>
    tpu.vector_store %arg11[%c0_14, %c128], %45 {strides = array<i32>} : memref<24x1024xf32, #tpu.memory_space<vmem>>, vector<8x768xf32>,
    %cst_15 = arith.constant 0.000000e+00 : f32
    %47 = vector.broadcast %cst_15 : f32 to vector<16x768xf32>
    %c0_16 = arith.constant 0 : index
    %c109 = arith.constant 109 : index
    %48 = vector.load %arg11[%c0_16, %c109] : memref<24x1024xf32, #tpu.memory_space<vmem>>, vector<8x768xf32>
    %c0_17 = arith.constant 0 : index
    %c0_18 = arith.constant 0 : index
    %c0_19 = arith.constant 0 : index
    %49 = vector.load %arg2[%c0_17, %c0_18, %c0_19] : memref<9x16x8xf32, #tpu.memory_space<vmem>>, vector<1x16x8xf32>
    %50 = vector.shape_cast %49 : vector<1x16x8xf32> to vector<16x8xf32>
    %cst_20 = arith.constant dense<0.000000e+00> : vector<16x768xf32>
    %51 = tpu.matmul %50, %48, %cst_20 {dimension_numbers = #tpu.dot_dimension_numbers<[1], [0], [0], [1], [0, 0, 1, 1], [], []>} : vector<16x8xf32>, vector<8x768xf32>, vector<16x768xf32> -> vector<16x768xf32>
    %52 = arith.addf %47, %51 : vector<16x768xf32>
    %c0_21 = arith.constant 0 : index
    %c110 = arith.constant 110 : index
    %53 = vector.load %arg11[%c0_21, %c110] : memref<24x1024xf32, #tpu.memory_space<vmem>>, vector<8x768xf32>
    %c1 = arith.constant 1 : index
    %c0_22 = arith.constant 0 : index
    %c0_23 = arith.constant 0 : index
    %54 = vector.load %arg2[%c1, %c0_22, %c0_23] : memref<9x16x8xf32, #tpu.memory_space<vmem>>, vector<1x16x8xf32>
    %55 = vector.shape_cast %54 : vector<1x16x8xf32> to vector<16x8xf32>
    %cst_24 = arith.constant dense<0.000000e+00> : vector<16x768xf32>
    %56 = tpu.matmul %55, %53, %cst_24 {dimension_numbers = #tpu.dot_dimension_numbers<[1], [0], [0], [1], [0, 0, 1, 1], [], []>} : vector<16x8xf32>, vector<8x768xf32>, vector<16x768xf32> -> vector<16x768xf32>
    %57 = arith.addf %52, %56 : vector<16x768xf32>
    %c0_25 = arith.constant 0 : index
    %c111 = arith.constant 111 : index
    %58 = vector.load %arg11[%c0_25, %c111] : memref<24x1024xf32, #tpu.memory_space<vmem>>, vector<8x768xf32>
    %c2 = arith.constant 2 : index
    %c0_26 = arith.constant 0 : index
    %c0_27 = arith.constant 0 : index
    %59 = vector.load %arg2[%c2, %c0_26, %c0_27] : memref<9x16x8xf32, #tpu.memory_space<vmem>>, vector<1x16x8xf32>
    %60 = vector.shape_cast %59 : vector<1x16x8xf32> to vector<16x8xf32>
    %cst_28 = arith.constant dense<0.000000e+00> : vector<16x768xf32>
    %61 = tpu.matmul %60, %58, %cst_28 {dimension_numbers = #tpu.dot_dimension_numbers<[1], [0], [0], [1], [0, 0, 1, 1], [], []>} : vector<16x8xf32>, vector<8x768xf32>, vector<16x768xf32> -> vector<16x768xf32>
    %62 = arith.addf %57, %61 : vector<16x768xf32>
    %c0_29 = arith.constant 0 : index
    %c127 = arith.constant 127 : index
    %63 = vector.load %arg11[%c0_29, %c127] : memref<24x1024xf32, #tpu.memory_space<vmem>>, vector<8x768xf32>
    %c3 = arith.constant 3 : index
    %c0_30 = arith.constant 0 : index
    %c0_31 = arith.constant 0 : index
    %64 = vector.load %arg2[%c3, %c0_30, %c0_31] : memref<9x16x8xf32, #tpu.memory_space<vmem>>, vector<1x16x8xf32>
    %65 = vector.shape_cast %64 : vector<1x16x8xf32> to vector<16x8xf32>
    %cst_32 = arith.constant dense<0.000000e+00> : vector<16x768xf32>
    %66 = tpu.matmul %65, %63, %cst_32 {dimension_numbers = #tpu.dot_dimension_numbers<[1], [0], [0], [1], [0, 0, 1, 1], [], []>} : vector<16x8xf32>, vector<8x768xf32>, vector<16x768xf32> -> vector<16x768xf32>
    %67 = arith.addf %62, %66 : vector<16x768xf32>
    %c0_33 = arith.constant 0 : index
    %c128_34 = arith.constant 128 : index
    %68 = vector.load %arg11[%c0_33, %c128_34] : memref<24x1024xf32, #tpu.memory_space<vmem>>, vector<8x768xf32>
    %c4 = arith.constant 4 : index
    %c0_35 = arith.constant 0 : index
    %c0_36 = arith.constant 0 : index
    %69 = vector.load %arg2[%c4, %c0_35, %c0_36] : memref<9x16x8xf32, #tpu.memory_space<vmem>>, vector<1x16x8xf32>
    %70 = vector.shape_cast %69 : vector<1x16x8xf32> to vector<16x8xf32>
    %cst_37 = arith.constant dense<0.000000e+00> : vector<16x768xf32>
    %71 = tpu.matmul %70, %68, %cst_37 {dimension_numbers = #tpu.dot_dimension_numbers<[1], [0], [0], [1], [0, 0, 1, 1], [], []>} : vector<16x8xf32>, vector<8x768xf32>, vector<16x768xf32> -> vector<16x768xf32>
    %72 = arith.addf %67, %71 : vector<16x768xf32>
    %c0_38 = arith.constant 0 : index
    %c129 = arith.constant 129 : index
    %73 = vector.load %arg11[%c0_38, %c129] : memref<24x1024xf32, #tpu.memory_space<vmem>>, vector<8x768xf32>
    %c5 = arith.constant 5 : index
    %c0_39 = arith.constant 0 : index
    %c0_40 = arith.constant 0 : index
    %74 = vector.load %arg2[%c5, %c0_39, %c0_40] : memref<9x16x8xf32, #tpu.memory_space<vmem>>, vector<1x16x8xf32>
    %75 = vector.shape_cast %74 : vector<1x16x8xf32> to vector<16x8xf32>
    %cst_41 = arith.constant dense<0.000000e+00> : vector<16x768xf32>
    %76 = tpu.matmul %75, %73, %cst_41 {dimension_numbers = #tpu.dot_dimension_numbers<[1], [0], [0], [1], [0, 0, 1, 1], [], []>} : vector<16x8xf32>, vector<8x768xf32>, vector<16x768xf32> -> vector<16x768xf32>
    %77 = arith.addf %72, %76 : vector<16x768xf32>
    %c0_42 = arith.constant 0 : index
    %c145 = arith.constant 145 : index
    %78 = vector.load %arg11[%c0_42, %c145] : memref<24x1024xf32, #tpu.memory_space<vmem>>, vector<8x768xf32>
    %c6 = arith.constant 6 : index
    %c0_43 = arith.constant 0 : index
    %c0_44 = arith.constant 0 : index
    %79 = vector.load %arg2[%c6, %c0_43, %c0_44] : memref<9x16x8xf32, #tpu.memory_space<vmem>>, vector<1x16x8xf32>
    %80 = vector.shape_cast %79 : vector<1x16x8xf32> to vector<16x8xf32>
    %cst_45 = arith.constant dense<0.000000e+00> : vector<16x768xf32>
    %81 = tpu.matmul %80, %78, %cst_45 {dimension_numbers = #tpu.dot_dimension_numbers<[1], [0], [0], [1], [0, 0, 1, 1], [], []>} : vector<16x8xf32>, vector<8x768xf32>, vector<16x768xf32> -> vector<16x768xf32>
    %82 = arith.addf %77, %81 : vector<16x768xf32>
    %c0_46 = arith.constant 0 : index
    %c146 = arith.constant 146 : index
    %83 = vector.load %arg11[%c0_46, %c146] : memref<24x1024xf32, #tpu.memory_space<vmem>>, vector<8x768xf32>
    %c7 = arith.constant 7 : index
    %c0_47 = arith.constant 0 : index
    %c0_48 = arith.constant 0 : index
    %84 = vector.load %arg2[%c7, %c0_47, %c0_48] : memref<9x16x8xf32, #tpu.memory_space<vmem>>, vector<1x16x8xf32>
    %85 = vector.shape_cast %84 : vector<1x16x8xf32> to vector<16x8xf32>
    %cst_49 = arith.constant dense<0.000000e+00> : vector<16x768xf32>
    %86 = tpu.matmul %85, %83, %cst_49 {dimension_numbers = #tpu.dot_dimension_numbers<[1], [0], [0], [1], [0, 0, 1, 1], [], []>} : vector<16x8xf32>, vector<8x768xf32>, vector<16x768xf32> -> vector<16x768xf32>
    %87 = arith.addf %82, %86 : vector<16x768xf32>
    %c0_50 = arith.constant 0 : index
    %c147 = arith.constant 147 : index
    %88 = vector.load %arg11[%c0_50, %c147] : memref<24x1024xf32, #tpu.memory_space<vmem>>, vector<8x768xf32>
    %c8 = arith.constant 8 : index
    %c0_51 = arith.constant 0 : index
    %c0_52 = arith.constant 0 : index
    %89 = vector.load %arg2[%c8, %c0_51, %c0_52] : memref<9x16x8xf32, #tpu.memory_space<vmem>>, vector<1x16x8xf32>
    %90 = vector.shape_cast %89 : vector<1x16x8xf32> to vector<16x8xf32>
    %cst_53 = arith.constant dense<0.000000e+00> : vector<16x768xf32>
    %91 = tpu.matmul %90, %88, %cst_53 {dimension_numbers = #tpu.dot_dimension_numbers<[1], [0], [0], [1], [0, 0, 1, 1], [], []>} : vector<16x8xf32>, vector<8x768xf32>, vector<16x768xf32> -> vector<16x768xf32>
    %92 = arith.addf %87, %91 : vector<16x768xf32>
    %c0_54 = arith.constant 0 : index
    %c0_55 = arith.constant 0 : index
    %93 = vector.load %arg3[%c0_54, %c0_55] : memref<16x1xf32, #tpu.memory_space<vmem>>, vector<16x1xf32>
    %94 = vector.broadcast %93 : vector<16x1xf32> to vector<16x768xf32>
    %95 = arith.addf %92, %94 : vector<16x768xf32>
    %cst_56 = arith.constant 0.000000e+00 : f32
    %96 = vector.broadcast %cst_56 : f32 to vector<16x768xf32>
    %97 = arith.maximumf %95, %96 : vector<16x768xf32>
    %cst_57 = arith.constant 0.000000e+00 : f32
    %98 = vector.shape_cast %43 : vector<1x768xi1> to vector<1x768xi1>
    %99 = vector.broadcast %98 : vector<1x768xi1> to vector<16x768xi1>
    %100 = vector.broadcast %cst_57 : f32 to vector<16x768xf32>
    %101 = arith.select %99, %97, %100 : vector<16x768xi1>, vector<16x768xf32>
    %c0_58 = arith.constant 0 : index
    %c128_59 = arith.constant 128 : index
    %102 = vector.load %arg11[%c0_58, %c128_59] : memref<24x1024xf32, #tpu.memory_space<vmem>>, vector<16x768xf32>
    tpu.vector_store %arg11[%c0_58, %c128_59], %101 {strides = array<i32>} : memref<24x1024xf32, #tpu.memory_space<vmem>>, vector<16x768xf32>,
    %cst_60 = arith.constant 0.000000e+00 : f32
    %103 = vector.broadcast %cst_60 : f32 to vector<24x768xf32>
    %c0_61 = arith.constant 0 : index
    %c109_62 = arith.constant 109 : index
    %104 = vector.load %arg11[%c0_61, %c109_62] : memref<24x1024xf32, #tpu.memory_space<vmem>>, vector<16x768xf32>
    %c0_63 = arith.constant 0 : index
    %c0_64 = arith.constant 0 : index
    %c0_65 = arith.constant 0 : index
    %105 = vector.load %arg4[%c0_63, %c0_64, %c0_65] : memref<9x24x16xf32, #tpu.memory_space<vmem>>, vector<1x24x16xf32>
    %106 = vector.shape_cast %105 : vector<1x24x16xf32> to vector<24x16xf32>
    %cst_66 = arith.constant dense<0.000000e+00> : vector<24x768xf32>
    %107 = tpu.matmul %106, %104, %cst_66 {dimension_numbers = #tpu.dot_dimension_numbers<[1], [0], [0], [1], [0, 0, 1, 1], [], []>} : vector<24x16xf32>, vector<16x768xf32>, vector<24x768xf32> -> vector<24x768xf32>
    %108 = arith.addf %103, %107 : vector<24x768xf32>
    %c0_67 = arith.constant 0 : index
    %c110_68 = arith.constant 110 : index
    %109 = vector.load %arg11[%c0_67, %c110_68] : memref<24x1024xf32, #tpu.memory_space<vmem>>, vector<16x768xf32>
    %c1_69 = arith.constant 1 : index
    %c0_70 = arith.constant 0 : index
    %c0_71 = arith.constant 0 : index
    %110 = vector.load %arg4[%c1_69, %c0_70, %c0_71] : memref<9x24x16xf32, #tpu.memory_space<vmem>>, vector<1x24x16xf32>
    %111 = vector.shape_cast %110 : vector<1x24x16xf32> to vector<24x16xf32>
    %cst_72 = arith.constant dense<0.000000e+00> : vector<24x768xf32>
    %112 = tpu.matmul %111, %109, %cst_72 {dimension_numbers = #tpu.dot_dimension_numbers<[1], [0], [0], [1], [0, 0, 1, 1], [], []>} : vector<24x16xf32>, vector<16x768xf32>, vector<24x768xf32> -> vector<24x768xf32>
    %113 = arith.addf %108, %112 : vector<24x768xf32>
    %c0_73 = arith.constant 0 : index
    %c111_74 = arith.constant 111 : index
    %114 = vector.load %arg11[%c0_73, %c111_74] : memref<24x1024xf32, #tpu.memory_space<vmem>>, vector<16x768xf32>
    %c2_75 = arith.constant 2 : index
    %c0_76 = arith.constant 0 : index
    %c0_77 = arith.constant 0 : index
    %115 = vector.load %arg4[%c2_75, %c0_76, %c0_77] : memref<9x24x16xf32, #tpu.memory_space<vmem>>, vector<1x24x16xf32>
    %116 = vector.shape_cast %115 : vector<1x24x16xf32> to vector<24x16xf32>
    %cst_78 = arith.constant dense<0.000000e+00> : vector<24x768xf32>
    %117 = tpu.matmul %116, %114, %cst_78 {dimension_numbers = #tpu.dot_dimension_numbers<[1], [0], [0], [1], [0, 0, 1, 1], [], []>} : vector<24x16xf32>, vector<16x768xf32>, vector<24x768xf32> -> vector<24x768xf32>
    %118 = arith.addf %113, %117 : vector<24x768xf32>
    %c0_79 = arith.constant 0 : index
    %c127_80 = arith.constant 127 : index
    %119 = vector.load %arg11[%c0_79, %c127_80] : memref<24x1024xf32, #tpu.memory_space<vmem>>, vector<16x768xf32>
    %c3_81 = arith.constant 3 : index
    %c0_82 = arith.constant 0 : index
    %c0_83 = arith.constant 0 : index
    %120 = vector.load %arg4[%c3_81, %c0_82, %c0_83] : memref<9x24x16xf32, #tpu.memory_space<vmem>>, vector<1x24x16xf32>
    %121 = vector.shape_cast %120 : vector<1x24x16xf32> to vector<24x16xf32>
    %cst_84 = arith.constant dense<0.000000e+00> : vector<24x768xf32>
    %122 = tpu.matmul %121, %119, %cst_84 {dimension_numbers = #tpu.dot_dimension_numbers<[1], [0], [0], [1], [0, 0, 1, 1], [], []>} : vector<24x16xf32>, vector<16x768xf32>, vector<24x768xf32> -> vector<24x768xf32>
    %123 = arith.addf %118, %122 : vector<24x768xf32>
    %c0_85 = arith.constant 0 : index
    %c128_86 = arith.constant 128 : index
    %124 = vector.load %arg11[%c0_85, %c128_86] : memref<24x1024xf32, #tpu.memory_space<vmem>>, vector<16x768xf32>
    %c4_87 = arith.constant 4 : index
    %c0_88 = arith.constant 0 : index
    %c0_89 = arith.constant 0 : index
    %125 = vector.load %arg4[%c4_87, %c0_88, %c0_89] : memref<9x24x16xf32, #tpu.memory_space<vmem>>, vector<1x24x16xf32>
    %126 = vector.shape_cast %125 : vector<1x24x16xf32> to vector<24x16xf32>
    %cst_90 = arith.constant dense<0.000000e+00> : vector<24x768xf32>
    %127 = tpu.matmul %126, %124, %cst_90 {dimension_numbers = #tpu.dot_dimension_numbers<[1], [0], [0], [1], [0, 0, 1, 1], [], []>} : vector<24x16xf32>, vector<16x768xf32>, vector<24x768xf32> -> vector<24x768xf32>
    %128 = arith.addf %123, %127 : vector<24x768xf32>
    %c0_91 = arith.constant 0 : index
    %c129_92 = arith.constant 129 : index
    %129 = vector.load %arg11[%c0_91, %c129_92] : memref<24x1024xf32, #tpu.memory_space<vmem>>, vector<16x768xf32>
    %c5_93 = arith.constant 5 : index
    %c0_94 = arith.constant 0 : index
    %c0_95 = arith.constant 0 : index
    %130 = vector.load %arg4[%c5_93, %c0_94, %c0_95] : memref<9x24x16xf32, #tpu.memory_space<vmem>>, vector<1x24x16xf32>
    %131 = vector.shape_cast %130 : vector<1x24x16xf32> to vector<24x16xf32>
    %cst_96 = arith.constant dense<0.000000e+00> : vector<24x768xf32>
    %132 = tpu.matmul %131, %129, %cst_96 {dimension_numbers = #tpu.dot_dimension_numbers<[1], [0], [0], [1], [0, 0, 1, 1], [], []>} : vector<24x16xf32>, vector<16x768xf32>, vector<24x768xf32> -> vector<24x768xf32>
    %133 = arith.addf %128, %132 : vector<24x768xf32>
    %c0_97 = arith.constant 0 : index
    %c145_98 = arith.constant 145 : index
    %134 = vector.load %arg11[%c0_97, %c145_98] : memref<24x1024xf32, #tpu.memory_space<vmem>>, vector<16x768xf32>
    %c6_99 = arith.constant 6 : index
    %c0_100 = arith.constant 0 : index
    %c0_101 = arith.constant 0 : index
    %135 = vector.load %arg4[%c6_99, %c0_100, %c0_101] : memref<9x24x16xf32, #tpu.memory_space<vmem>>, vector<1x24x16xf32>
    %136 = vector.shape_cast %135 : vector<1x24x16xf32> to vector<24x16xf32>
    %cst_102 = arith.constant dense<0.000000e+00> : vector<24x768xf32>
    %137 = tpu.matmul %136, %134, %cst_102 {dimension_numbers = #tpu.dot_dimension_numbers<[1], [0], [0], [1], [0, 0, 1, 1], [], []>} : vector<24x16xf32>, vector<16x768xf32>, vector<24x768xf32> -> vector<24x768xf32>
    %138 = arith.addf %133, %137 : vector<24x768xf32>
    %c0_103 = arith.constant 0 : index
    %c146_104 = arith.constant 146 : index
    %139 = vector.load %arg11[%c0_103, %c146_104] : memref<24x1024xf32, #tpu.memory_space<vmem>>, vector<16x768xf32>
    %c7_105 = arith.constant 7 : index
    %c0_106 = arith.constant 0 : index
    %c0_107 = arith.constant 0 : index
    %140 = vector.load %arg4[%c7_105, %c0_106, %c0_107] : memref<9x24x16xf32, #tpu.memory_space<vmem>>, vector<1x24x16xf32>
    %141 = vector.shape_cast %140 : vector<1x24x16xf32> to vector<24x16xf32>
    %cst_108 = arith.constant dense<0.000000e+00> : vector<24x768xf32>
    %142 = tpu.matmul %141, %139, %cst_108 {dimension_numbers = #tpu.dot_dimension_numbers<[1], [0], [0], [1], [0, 0, 1, 1], [], []>} : vector<24x16xf32>, vector<16x768xf32>, vector<24x768xf32> -> vector<24x768xf32>
    %143 = arith.addf %138, %142 : vector<24x768xf32>
    %c0_109 = arith.constant 0 : index
    %c147_110 = arith.constant 147 : index
    %144 = vector.load %arg11[%c0_109, %c147_110] : memref<24x1024xf32, #tpu.memory_space<vmem>>, vector<16x768xf32>
    %c8_111 = arith.constant 8 : index
    %c0_112 = arith.constant 0 : index
    %c0_113 = arith.constant 0 : index
    %145 = vector.load %arg4[%c8_111, %c0_112, %c0_113] : memref<9x24x16xf32, #tpu.memory_space<vmem>>, vector<1x24x16xf32>
    %146 = vector.shape_cast %145 : vector<1x24x16xf32> to vector<24x16xf32>
    %cst_114 = arith.constant dense<0.000000e+00> : vector<24x768xf32>
    %147 = tpu.matmul %146, %144, %cst_114 {dimension_numbers = #tpu.dot_dimension_numbers<[1], [0], [0], [1], [0, 0, 1, 1], [], []>} : vector<24x16xf32>, vector<16x768xf32>, vector<24x768xf32> -> vector<24x768xf32>
    %148 = arith.addf %143, %147 : vector<24x768xf32>
    %c0_115 = arith.constant 0 : index
    %c0_116 = arith.constant 0 : index
    %149 = vector.load %arg5[%c0_115, %c0_116] : memref<24x1xf32, #tpu.memory_space<vmem>>, vector<24x1xf32>
    %150 = vector.broadcast %149 : vector<24x1xf32> to vector<24x768xf32>
    %151 = arith.addf %148, %150 : vector<24x768xf32>
    %cst_117 = arith.constant 0.000000e+00 : f32
    %152 = vector.broadcast %cst_117 : f32 to vector<24x768xf32>
    %153 = arith.maximumf %151, %152 : vector<24x768xf32>
    %cst_118 = arith.constant 0.000000e+00 : f32
    %154 = vector.shape_cast %43 : vector<1x768xi1> to vector<1x768xi1>
    %155 = vector.broadcast %154 : vector<1x768xi1> to vector<24x768xi1>
    %156 = vector.broadcast %cst_118 : f32 to vector<24x768xf32>
    %157 = arith.select %155, %153, %156 : vector<24x768xi1>, vector<24x768xf32>
    %c0_119 = arith.constant 0 : index
    %c128_120 = arith.constant 128 : index
    %158 = vector.load %arg11[%c0_119, %c128_120] : memref<24x1024xf32, #tpu.memory_space<vmem>>, vector<24x768xf32>
    tpu.vector_store %arg11[%c0_119, %c128_120], %157 {strides = array<i32>} : memref<24x1024xf32, #tpu.memory_space<vmem>>, vector<24x768xf32>,
    %cst_121 = arith.constant 0.000000e+00 : f32
    %159 = vector.broadcast %cst_121 : f32 to vector<16x768xf32>
    %c0_122 = arith.constant 0 : index
    %c109_123 = arith.constant 109 : index
    %160 = vector.load %arg11[%c0_122, %c109_123] : memref<24x1024xf32, #tpu.memory_space<vmem>>, vector<24x768xf32>
    %c0_124 = arith.constant 0 : index
    %c0_125 = arith.constant 0 : index
    %c0_126 = arith.constant 0 : index
    %161 = vector.load %arg6[%c0_124, %c0_125, %c0_126] : memref<9x16x24xf32, #tpu.memory_space<vmem>>, vector<1x16x24xf32>
    %162 = vector.shape_cast %161 : vector<1x16x24xf32> to vector<16x24xf32>
    %cst_127 = arith.constant dense<0.000000e+00> : vector<16x768xf32>
    %163 = tpu.matmul %162, %160, %cst_127 {dimension_numbers = #tpu.dot_dimension_numbers<[1], [0], [0], [1], [0, 0, 1, 1], [], []>} : vector<16x24xf32>, vector<24x768xf32>, vector<16x768xf32> -> vector<16x768xf32>
    %164 = arith.addf %159, %163 : vector<16x768xf32>
    %c0_128 = arith.constant 0 : index
    %c110_129 = arith.constant 110 : index
    %165 = vector.load %arg11[%c0_128, %c110_129] : memref<24x1024xf32, #tpu.memory_space<vmem>>, vector<24x768xf32>
    %c1_130 = arith.constant 1 : index
    %c0_131 = arith.constant 0 : index
    %c0_132 = arith.constant 0 : index
    %166 = vector.load %arg6[%c1_130, %c0_131, %c0_132] : memref<9x16x24xf32, #tpu.memory_space<vmem>>, vector<1x16x24xf32>
    %167 = vector.shape_cast %166 : vector<1x16x24xf32> to vector<16x24xf32>
    %cst_133 = arith.constant dense<0.000000e+00> : vector<16x768xf32>
    %168 = tpu.matmul %167, %165, %cst_133 {dimension_numbers = #tpu.dot_dimension_numbers<[1], [0], [0], [1], [0, 0, 1, 1], [], []>} : vector<16x24xf32>, vector<24x768xf32>, vector<16x768xf32> -> vector<16x768xf32>
    %169 = arith.addf %164, %168 : vector<16x768xf32>
    %c0_134 = arith.constant 0 : index
    %c111_135 = arith.constant 111 : index
    %170 = vector.load %arg11[%c0_134, %c111_135] : memref<24x1024xf32, #tpu.memory_space<vmem>>, vector<24x768xf32>
    %c2_136 = arith.constant 2 : index
    %c0_137 = arith.constant 0 : index
    %c0_138 = arith.constant 0 : index
    %171 = vector.load %arg6[%c2_136, %c0_137, %c0_138] : memref<9x16x24xf32, #tpu.memory_space<vmem>>, vector<1x16x24xf32>
    %172 = vector.shape_cast %171 : vector<1x16x24xf32> to vector<16x24xf32>
    %cst_139 = arith.constant dense<0.000000e+00> : vector<16x768xf32>
    %173 = tpu.matmul %172, %170, %cst_139 {dimension_numbers = #tpu.dot_dimension_numbers<[1], [0], [0], [1], [0, 0, 1, 1], [], []>} : vector<16x24xf32>, vector<24x768xf32>, vector<16x768xf32> -> vector<16x768xf32>
    %174 = arith.addf %169, %173 : vector<16x768xf32>
    %c0_140 = arith.constant 0 : index
    %c127_141 = arith.constant 127 : index
    %175 = vector.load %arg11[%c0_140, %c127_141] : memref<24x1024xf32, #tpu.memory_space<vmem>>, vector<24x768xf32>
    %c3_142 = arith.constant 3 : index
    %c0_143 = arith.constant 0 : index
    %c0_144 = arith.constant 0 : index
    %176 = vector.load %arg6[%c3_142, %c0_143, %c0_144] : memref<9x16x24xf32, #tpu.memory_space<vmem>>, vector<1x16x24xf32>
    %177 = vector.shape_cast %176 : vector<1x16x24xf32> to vector<16x24xf32>
    %cst_145 = arith.constant dense<0.000000e+00> : vector<16x768xf32>
    %178 = tpu.matmul %177, %175, %cst_145 {dimension_numbers = #tpu.dot_dimension_numbers<[1], [0], [0], [1], [0, 0, 1, 1], [], []>} : vector<16x24xf32>, vector<24x768xf32>, vector<16x768xf32> -> vector<16x768xf32>
    %179 = arith.addf %174, %178 : vector<16x768xf32>
    %c0_146 = arith.constant 0 : index
    %c128_147 = arith.constant 128 : index
    %180 = vector.load %arg11[%c0_146, %c128_147] : memref<24x1024xf32, #tpu.memory_space<vmem>>, vector<24x768xf32>
    %c4_148 = arith.constant 4 : index
    %c0_149 = arith.constant 0 : index
    %c0_150 = arith.constant 0 : index
    %181 = vector.load %arg6[%c4_148, %c0_149, %c0_150] : memref<9x16x24xf32, #tpu.memory_space<vmem>>, vector<1x16x24xf32>
    %182 = vector.shape_cast %181 : vector<1x16x24xf32> to vector<16x24xf32>
    %cst_151 = arith.constant dense<0.000000e+00> : vector<16x768xf32>
    %183 = tpu.matmul %182, %180, %cst_151 {dimension_numbers = #tpu.dot_dimension_numbers<[1], [0], [0], [1], [0, 0, 1, 1], [], []>} : vector<16x24xf32>, vector<24x768xf32>, vector<16x768xf32> -> vector<16x768xf32>
    %184 = arith.addf %179, %183 : vector<16x768xf32>
    %c0_152 = arith.constant 0 : index
    %c129_153 = arith.constant 129 : index
    %185 = vector.load %arg11[%c0_152, %c129_153] : memref<24x1024xf32, #tpu.memory_space<vmem>>, vector<24x768xf32>
    %c5_154 = arith.constant 5 : index
    %c0_155 = arith.constant 0 : index
    %c0_156 = arith.constant 0 : index
    %186 = vector.load %arg6[%c5_154, %c0_155, %c0_156] : memref<9x16x24xf32, #tpu.memory_space<vmem>>, vector<1x16x24xf32>
    %187 = vector.shape_cast %186 : vector<1x16x24xf32> to vector<16x24xf32>
    %cst_157 = arith.constant dense<0.000000e+00> : vector<16x768xf32>
    %188 = tpu.matmul %187, %185, %cst_157 {dimension_numbers = #tpu.dot_dimension_numbers<[1], [0], [0], [1], [0, 0, 1, 1], [], []>} : vector<16x24xf32>, vector<24x768xf32>, vector<16x768xf32> -> vector<16x768xf32>
    %189 = arith.addf %184, %188 : vector<16x768xf32>
    %c0_158 = arith.constant 0 : index
    %c145_159 = arith.constant 145 : index
    %190 = vector.load %arg11[%c0_158, %c145_159] : memref<24x1024xf32, #tpu.memory_space<vmem>>, vector<24x768xf32>
    %c6_160 = arith.constant 6 : index
    %c0_161 = arith.constant 0 : index
    %c0_162 = arith.constant 0 : index
    %191 = vector.load %arg6[%c6_160, %c0_161, %c0_162] : memref<9x16x24xf32, #tpu.memory_space<vmem>>, vector<1x16x24xf32>
    %192 = vector.shape_cast %191 : vector<1x16x24xf32> to vector<16x24xf32>
    %cst_163 = arith.constant dense<0.000000e+00> : vector<16x768xf32>
    %193 = tpu.matmul %192, %190, %cst_163 {dimension_numbers = #tpu.dot_dimension_numbers<[1], [0], [0], [1], [0, 0, 1, 1], [], []>} : vector<16x24xf32>, vector<24x768xf32>, vector<16x768xf32> -> vector<16x768xf32>
    %194 = arith.addf %189, %193 : vector<16x768xf32>
    %c0_164 = arith.constant 0 : index
    %c146_165 = arith.constant 146 : index
    %195 = vector.load %arg11[%c0_164, %c146_165] : memref<24x1024xf32, #tpu.memory_space<vmem>>, vector<24x768xf32>
    %c7_166 = arith.constant 7 : index
    %c0_167 = arith.constant 0 : index
    %c0_168 = arith.constant 0 : index
    %196 = vector.load %arg6[%c7_166, %c0_167, %c0_168] : memref<9x16x24xf32, #tpu.memory_space<vmem>>, vector<1x16x24xf32>
    %197 = vector.shape_cast %196 : vector<1x16x24xf32> to vector<16x24xf32>
    %cst_169 = arith.constant dense<0.000000e+00> : vector<16x768xf32>
    %198 = tpu.matmul %197, %195, %cst_169 {dimension_numbers = #tpu.dot_dimension_numbers<[1], [0], [0], [1], [0, 0, 1, 1], [], []>} : vector<16x24xf32>, vector<24x768xf32>, vector<16x768xf32> -> vector<16x768xf32>
    %199 = arith.addf %194, %198 : vector<16x768xf32>
    %c0_170 = arith.constant 0 : index
    %c147_171 = arith.constant 147 : index
    %200 = vector.load %arg11[%c0_170, %c147_171] : memref<24x1024xf32, #tpu.memory_space<vmem>>, vector<24x768xf32>
    %c8_172 = arith.constant 8 : index
    %c0_173 = arith.constant 0 : index
    %c0_174 = arith.constant 0 : index
    %201 = vector.load %arg6[%c8_172, %c0_173, %c0_174] : memref<9x16x24xf32, #tpu.memory_space<vmem>>, vector<1x16x24xf32>
    %202 = vector.shape_cast %201 : vector<1x16x24xf32> to vector<16x24xf32>
    %cst_175 = arith.constant dense<0.000000e+00> : vector<16x768xf32>
    %203 = tpu.matmul %202, %200, %cst_175 {dimension_numbers = #tpu.dot_dimension_numbers<[1], [0], [0], [1], [0, 0, 1, 1], [], []>} : vector<16x24xf32>, vector<24x768xf32>, vector<16x768xf32> -> vector<16x768xf32>
    %204 = arith.addf %199, %203 : vector<16x768xf32>
    %c0_176 = arith.constant 0 : index
    %c0_177 = arith.constant 0 : index
    %205 = vector.load %arg7[%c0_176, %c0_177] : memref<16x1xf32, #tpu.memory_space<vmem>>, vector<16x1xf32>
    %206 = vector.broadcast %205 : vector<16x1xf32> to vector<16x768xf32>
    %207 = arith.addf %204, %206 : vector<16x768xf32>
    %cst_178 = arith.constant 0.000000e+00 : f32
    %208 = vector.broadcast %cst_178 : f32 to vector<16x768xf32>
    %209 = arith.maximumf %207, %208 : vector<16x768xf32>
    %cst_179 = arith.constant 0.000000e+00 : f32
    %210 = vector.shape_cast %43 : vector<1x768xi1> to vector<1x768xi1>
    %211 = vector.broadcast %210 : vector<1x768xi1> to vector<16x768xi1>
    %212 = vector.broadcast %cst_179 : f32 to vector<16x768xf32>
    %213 = arith.select %211, %209, %212 : vector<16x768xi1>, vector<16x768xf32>
    %c0_180 = arith.constant 0 : index
    %c128_181 = arith.constant 128 : index
    %214 = vector.load %arg11[%c0_180, %c128_181] : memref<24x1024xf32, #tpu.memory_space<vmem>>, vector<16x768xf32>
    tpu.vector_store %arg11[%c0_180, %c128_181], %213 {strides = array<i32>} : memref<24x1024xf32, #tpu.memory_space<vmem>>, vector<16x768xf32>,
    %cst_182 = arith.constant 0.000000e+00 : f32
    %215 = vector.broadcast %cst_182 : f32 to vector<8x768xf32>
    %c0_183 = arith.constant 0 : index
    %c109_184 = arith.constant 109 : index
    %216 = vector.load %arg11[%c0_183, %c109_184] : memref<24x1024xf32, #tpu.memory_space<vmem>>, vector<16x768xf32>
    %c0_185 = arith.constant 0 : index
    %c0_186 = arith.constant 0 : index
    %c0_187 = arith.constant 0 : index
    %217 = vector.load %arg8[%c0_185, %c0_186, %c0_187] : memref<9x8x16xf32, #tpu.memory_space<vmem>>, vector<1x8x16xf32>
    %218 = vector.shape_cast %217 : vector<1x8x16xf32> to vector<8x16xf32>
    %cst_188 = arith.constant dense<0.000000e+00> : vector<8x768xf32>
    %219 = tpu.matmul %218, %216, %cst_188 {dimension_numbers = #tpu.dot_dimension_numbers<[1], [0], [0], [1], [0, 0, 1, 1], [], []>} : vector<8x16xf32>, vector<16x768xf32>, vector<8x768xf32> -> vector<8x768xf32>
    %220 = arith.addf %215, %219 : vector<8x768xf32>
    %c0_189 = arith.constant 0 : index
    %c110_190 = arith.constant 110 : index
    %221 = vector.load %arg11[%c0_189, %c110_190] : memref<24x1024xf32, #tpu.memory_space<vmem>>, vector<16x768xf32>
    %c1_191 = arith.constant 1 : index
    %c0_192 = arith.constant 0 : index
    %c0_193 = arith.constant 0 : index
    %222 = vector.load %arg8[%c1_191, %c0_192, %c0_193] : memref<9x8x16xf32, #tpu.memory_space<vmem>>, vector<1x8x16xf32>
    %223 = vector.shape_cast %222 : vector<1x8x16xf32> to vector<8x16xf32>
    %cst_194 = arith.constant dense<0.000000e+00> : vector<8x768xf32>
    %224 = tpu.matmul %223, %221, %cst_194 {dimension_numbers = #tpu.dot_dimension_numbers<[1], [0], [0], [1], [0, 0, 1, 1], [], []>} : vector<8x16xf32>, vector<16x768xf32>, vector<8x768xf32> -> vector<8x768xf32>
    %225 = arith.addf %220, %224 : vector<8x768xf32>
    %c0_195 = arith.constant 0 : index
    %c111_196 = arith.constant 111 : index
    %226 = vector.load %arg11[%c0_195, %c111_196] : memref<24x1024xf32, #tpu.memory_space<vmem>>, vector<16x768xf32>
    %c2_197 = arith.constant 2 : index
    %c0_198 = arith.constant 0 : index
    %c0_199 = arith.constant 0 : index
    %227 = vector.load %arg8[%c2_197, %c0_198, %c0_199] : memref<9x8x16xf32, #tpu.memory_space<vmem>>, vector<1x8x16xf32>
    %228 = vector.shape_cast %227 : vector<1x8x16xf32> to vector<8x16xf32>
    %cst_200 = arith.constant dense<0.000000e+00> : vector<8x768xf32>
    %229 = tpu.matmul %228, %226, %cst_200 {dimension_numbers = #tpu.dot_dimension_numbers<[1], [0], [0], [1], [0, 0, 1, 1], [], []>} : vector<8x16xf32>, vector<16x768xf32>, vector<8x768xf32> -> vector<8x768xf32>
    %230 = arith.addf %225, %229 : vector<8x768xf32>
    %c0_201 = arith.constant 0 : index
    %c127_202 = arith.constant 127 : index
    %231 = vector.load %arg11[%c0_201, %c127_202] : memref<24x1024xf32, #tpu.memory_space<vmem>>, vector<16x768xf32>
    %c3_203 = arith.constant 3 : index
    %c0_204 = arith.constant 0 : index
    %c0_205 = arith.constant 0 : index
    %232 = vector.load %arg8[%c3_203, %c0_204, %c0_205] : memref<9x8x16xf32, #tpu.memory_space<vmem>>, vector<1x8x16xf32>
    %233 = vector.shape_cast %232 : vector<1x8x16xf32> to vector<8x16xf32>
    %cst_206 = arith.constant dense<0.000000e+00> : vector<8x768xf32>
    %234 = tpu.matmul %233, %231, %cst_206 {dimension_numbers = #tpu.dot_dimension_numbers<[1], [0], [0], [1], [0, 0, 1, 1], [], []>} : vector<8x16xf32>, vector<16x768xf32>, vector<8x768xf32> -> vector<8x768xf32>
    %235 = arith.addf %230, %234 : vector<8x768xf32>
    %c0_207 = arith.constant 0 : index
    %c128_208 = arith.constant 128 : index
    %236 = vector.load %arg11[%c0_207, %c128_208] : memref<24x1024xf32, #tpu.memory_space<vmem>>, vector<16x768xf32>
    %c4_209 = arith.constant 4 : index
    %c0_210 = arith.constant 0 : index
    %c0_211 = arith.constant 0 : index
    %237 = vector.load %arg8[%c4_209, %c0_210, %c0_211] : memref<9x8x16xf32, #tpu.memory_space<vmem>>, vector<1x8x16xf32>
    %238 = vector.shape_cast %237 : vector<1x8x16xf32> to vector<8x16xf32>
    %cst_212 = arith.constant dense<0.000000e+00> : vector<8x768xf32>
    %239 = tpu.matmul %238, %236, %cst_212 {dimension_numbers = #tpu.dot_dimension_numbers<[1], [0], [0], [1], [0, 0, 1, 1], [], []>} : vector<8x16xf32>, vector<16x768xf32>, vector<8x768xf32> -> vector<8x768xf32>
    %240 = arith.addf %235, %239 : vector<8x768xf32>
    %c0_213 = arith.constant 0 : index
    %c129_214 = arith.constant 129 : index
    %241 = vector.load %arg11[%c0_213, %c129_214] : memref<24x1024xf32, #tpu.memory_space<vmem>>, vector<16x768xf32>
    %c5_215 = arith.constant 5 : index
    %c0_216 = arith.constant 0 : index
    %c0_217 = arith.constant 0 : index
    %242 = vector.load %arg8[%c5_215, %c0_216, %c0_217] : memref<9x8x16xf32, #tpu.memory_space<vmem>>, vector<1x8x16xf32>
    %243 = vector.shape_cast %242 : vector<1x8x16xf32> to vector<8x16xf32>
    %cst_218 = arith.constant dense<0.000000e+00> : vector<8x768xf32>
    %244 = tpu.matmul %243, %241, %cst_218 {dimension_numbers = #tpu.dot_dimension_numbers<[1], [0], [0], [1], [0, 0, 1, 1], [], []>} : vector<8x16xf32>, vector<16x768xf32>, vector<8x768xf32> -> vector<8x768xf32>
    %245 = arith.addf %240, %244 : vector<8x768xf32>
    %c0_219 = arith.constant 0 : index
    %c145_220 = arith.constant 145 : index
    %246 = vector.load %arg11[%c0_219, %c145_220] : memref<24x1024xf32, #tpu.memory_space<vmem>>, vector<16x768xf32>
    %c6_221 = arith.constant 6 : index
    %c0_222 = arith.constant 0 : index
    %c0_223 = arith.constant 0 : index
    %247 = vector.load %arg8[%c6_221, %c0_222, %c0_223] : memref<9x8x16xf32, #tpu.memory_space<vmem>>, vector<1x8x16xf32>
    %248 = vector.shape_cast %247 : vector<1x8x16xf32> to vector<8x16xf32>
    %cst_224 = arith.constant dense<0.000000e+00> : vector<8x768xf32>
    %249 = tpu.matmul %248, %246, %cst_224 {dimension_numbers = #tpu.dot_dimension_numbers<[1], [0], [0], [1], [0, 0, 1, 1], [], []>} : vector<8x16xf32>, vector<16x768xf32>, vector<8x768xf32> -> vector<8x768xf32>
    %250 = arith.addf %245, %249 : vector<8x768xf32>
    %c0_225 = arith.constant 0 : index
    %c146_226 = arith.constant 146 : index
    %251 = vector.load %arg11[%c0_225, %c146_226] : memref<24x1024xf32, #tpu.memory_space<vmem>>, vector<16x768xf32>
    %c7_227 = arith.constant 7 : index
    %c0_228 = arith.constant 0 : index
    %c0_229 = arith.constant 0 : index
    %252 = vector.load %arg8[%c7_227, %c0_228, %c0_229] : memref<9x8x16xf32, #tpu.memory_space<vmem>>, vector<1x8x16xf32>
    %253 = vector.shape_cast %252 : vector<1x8x16xf32> to vector<8x16xf32>
    %cst_230 = arith.constant dense<0.000000e+00> : vector<8x768xf32>
    %254 = tpu.matmul %253, %251, %cst_230 {dimension_numbers = #tpu.dot_dimension_numbers<[1], [0], [0], [1], [0, 0, 1, 1], [], []>} : vector<8x16xf32>, vector<16x768xf32>, vector<8x768xf32> -> vector<8x768xf32>
    %255 = arith.addf %250, %254 : vector<8x768xf32>
    %c0_231 = arith.constant 0 : index
    %c147_232 = arith.constant 147 : index
    %256 = vector.load %arg11[%c0_231, %c147_232] : memref<24x1024xf32, #tpu.memory_space<vmem>>, vector<16x768xf32>
    %c8_233 = arith.constant 8 : index
    %c0_234 = arith.constant 0 : index
    %c0_235 = arith.constant 0 : index
    %257 = vector.load %arg8[%c8_233, %c0_234, %c0_235] : memref<9x8x16xf32, #tpu.memory_space<vmem>>, vector<1x8x16xf32>
    %258 = vector.shape_cast %257 : vector<1x8x16xf32> to vector<8x16xf32>
    %cst_236 = arith.constant dense<0.000000e+00> : vector<8x768xf32>
    %259 = tpu.matmul %258, %256, %cst_236 {dimension_numbers = #tpu.dot_dimension_numbers<[1], [0], [0], [1], [0, 0, 1, 1], [], []>} : vector<8x16xf32>, vector<16x768xf32>, vector<8x768xf32> -> vector<8x768xf32>
    %260 = arith.addf %255, %259 : vector<8x768xf32>
    %c0_237 = arith.constant 0 : index
    %c0_238 = arith.constant 0 : index
    %261 = vector.load %arg9[%c0_237, %c0_238] : memref<8x1xf32, #tpu.memory_space<vmem>>, vector<8x1xf32>
    %262 = vector.broadcast %261 : vector<8x1xf32> to vector<8x768xf32>
    %263 = arith.addf %260, %262 : vector<8x768xf32>
    %cst_239 = arith.constant 0.000000e+00 : f32
    %264 = vector.broadcast %cst_239 : f32 to vector<8x768xf32>
    %265 = arith.maximumf %263, %264 : vector<8x768xf32>
    %266 = vector.extract_strided_slice %265 {offsets = [0, 0], sizes = [1, 768], strides = [1, 1]} : vector<8x768xf32> to vector<1x768xf32>
    %c0_240 = arith.constant 0 : index
    %c0_241 = arith.constant 0 : index
    %c0_242 = arith.constant 0 : index
    %267 = vector.load %arg10[%c0_240, %c0_241, %c0_242] : memref<1x1x768xf32, #tpu.memory_space<vmem>>, vector<1x1x768xf32>
    %268 = vector.shape_cast %267 : vector<1x1x768xf32> to vector<1x768xf32>
    %269 = vector.shape_cast %266 : vector<1x768xf32> to vector<1x1x768xf32>
    tpu.vector_store %arg10[%c0_240, %c0_241, %c0_242], %269 {strides = array<i32>} : memref<1x1x768xf32, #tpu.memory_space<vmem>>, vector<1x1x768xf32>,
    return
  }
  func.func @transform_0(%arg0: i32) -> (i32, i32, i32) {
    %c0_i32 = arith.constant 0 : i32
    %c0_i32_0 = arith.constant 0 : i32
    %c0_i32_1 = arith.constant 0 : i32
    return %arg0, %c0_i32, %c0_i32_0 : i32, i32, i32
  }
  func.func @transform_1(%arg0: i32) -> (i32, i32, i32) {
    %c0_i32 = arith.constant 0 : i32
    %c0_i32_0 = arith.constant 0 : i32
    %c0_i32_1 = arith.constant 0 : i32
    %c0_i32_2 = arith.constant 0 : i32
    return %c0_i32, %c0_i32_0, %c0_i32_1 : i32, i32, i32
  }
  func.func @transform_2(%arg0: i32) -> (i32, i32) {
    %c0_i32 = arith.constant 0 : i32
    %c0_i32_0 = arith.constant 0 : i32
    %c0_i32_1 = arith.constant 0 : i32
    return %c0_i32, %c0_i32_0 : i32, i32
  }
  func.func @transform_3(%arg0: i32) -> (i32, i32, i32) {
    %c0_i32 = arith.constant 0 : i32
    %c0_i32_0 = arith.constant 0 : i32
    %c0_i32_1 = arith.constant 0 : i32
    %c0_i32_2 = arith.constant 0 : i32
    return %c0_i32, %c0_i32_0, %c0_i32_1 : i32, i32, i32
  }
  func.func @transform_4(%arg0: i32) -> (i32, i32) {
    %c0_i32 = arith.constant 0 : i32
    %c0_i32_0 = arith.constant 0 : i32
    %c0_i32_1 = arith.constant 0 : i32
    return %c0_i32, %c0_i32_0 : i32, i32
  }
  func.func @transform_5(%arg0: i32) -> (i32, i32, i32) {
    %c0_i32 = arith.constant 0 : i32
    %c0_i32_0 = arith.constant 0 : i32
    %c0_i32_1 = arith.constant 0 : i32
    %c0_i32_2 = arith.constant 0 : i32
    return %c0_i32, %c0_i32_0, %c0_i32_1 : i32, i32, i32
  }
  func.func @transform_6(%arg0: i32) -> (i32, i32) {
    %c0_i32 = arith.constant 0 : i32
    %c0_i32_0 = arith.constant 0 : i32
    %c0_i32_1 = arith.constant 0 : i32
    return %c0_i32, %c0_i32_0 : i32, i32
  }
  func.func @transform_7(%arg0: i32) -> (i32, i32, i32) {
    %c0_i32 = arith.constant 0 : i32
    %c0_i32_0 = arith.constant 0 : i32
    %c0_i32_1 = arith.constant 0 : i32
    %c0_i32_2 = arith.constant 0 : i32
    return %c0_i32, %c0_i32_0, %c0_i32_1 : i32, i32, i32
  }
  func.func @transform_8(%arg0: i32) -> (i32, i32) {
    %c0_i32 = arith.constant 0 : i32
    %c0_i32_0 = arith.constant 0 : i32
    %c0_i32_1 = arith.constant 0 : i32
    return %c0_i32, %c0_i32_0 : i32, i32
  }
  func.func @transform_9(%arg0: i32) -> (i32, i32, i32) {
    %c0_i32 = arith.constant 0 : i32
    %c0_i32_0 = arith.constant 0 : i32
    %c0_i32_1 = arith.constant 0 : i32
    return %arg0, %c0_i32, %c0_i32_0 : i32, i32, i32
  }
}

</mosaic_0001>

<bundles_post_ra>
// kernel: net_forward.1
= control target key start
LH: loop header
LB: loop body
LE: loop exit
PB: predicated region body
PF: predicated region fallthrough
CT: control target
= control target key end

     0   :  { %v13379_v0 = vmov 0.0   ;;  %s13380_s30 = smov 17   ;;  %s13381_s20 = smov 18   ;;  %v13388_v9 = vmov 0   ;;  %vm16010_vm0 = vcmask 138240   ;;  %vm325_vm1 = vcmask 64512   ;;  %s15995_s0 = inlined_call_operand.vmem [shape: f32[1,8,768], index: 0, kind: input, shape index: {}]   ;;  %s15996_s2 = inlined_call_operand.vmem [shape: f32[16,1], index: 2, kind: input, shape index: {}]   ;;  %s15997_s1 = inlined_call_operand.vmem [shape: f32[9,16,8], index: 1, kind: input, shape index: {}]   ;;  %s15998_s4 = inlined_call_operand.vmem [shape: f32[24,1], index: 4, kind: input, shape index: {}]   ;;  %s15999_s3 = inlined_call_operand.vmem [shape: f32[9,24,16], index: 3, kind: input, shape index: {}]   ;;  %s16000_s5 = inlined_call_operand.vmem [shape: f32[9,16,24], index: 5, kind: input, shape index: {}]   ;;  %s16001_s6 = inlined_call_operand.vmem [shape: f32[16,1], index: 6, kind: input, shape index: {}]   ;;  %s16002_s8 = inlined_call_operand.vmem [shape: f32[8,1], index: 8, kind: input, shape index: {}]   ;;  %s16003_s7 = inlined_call_operand.vmem [shape: f32[9,8,16], index: 7, kind: input, shape index: {}]   ;;  %s16004_s9 = inlined_call_operand.vmem [shape: f32[1,1,768], index: 9, kind: output, shape index: {}]  }
   0x1   :  { %830 = vrot.lane.b32.xlu1 %v13379_v0, %s13380_s30  ;;  %v13445_v1 = vld [vmem:[%s15995_s0] sm:$0xff]  ;;  %927 = vmatprep.mubr.f32.mxu0 %v13379_v0  ;;  %v13459_v3 = vld [vmem:[%s15995_s0 + $0x8] sm:$0xff]  ;;  %v13468_v4 = vld [vmem:[%s15995_s0 + $0x18] sm:$0xff]  ;;  %s13382_s21 = smov 1   ;;  %s13384_s24 = smov 127   ;;  %vm16012_vm2 = vcmask 146432  }
   0x2   :  { %832 = vrot.lane.b32.xlu0 %v13445_v1, %s13380_s30  ;;  %v13453_v2 = vld [vmem:[%s15995_s0 + $0x20] sm:$0xff]  ;;  %396 = vmatprep.mubr.f32.mxu1 %v13379_v0  ;;  %v13473_v5 = vld [vmem:[%s15995_s0 + $0x28] sm:$0xff]  ;;  %v13494_v6 = vld [vmem:[%s15995_s0 + $0x10] sm:$0xff]  ;;  %s13383_s0 = smov 19   ;;  %s13385_s25 = smov 111   ;;  %vm16009_vm3 = vcmask 7168  }
   0x3   :  { %s13386_s26 = smov 110   ;;  %s13387_s27 = smov 109   ;;  %12537 = vset.pattern.permute.xlu0 %v13388_v9  ;;  %v2767_v10 = vld [vmem:[%s15996_s2] sm:$0xff]  ;;  %12538 = vset.pattern.permute.xlu1 %v13388_v9  ;;  %v2768_v11 = vld [vmem:[%s15996_s2 + $0x8] sm:$0xff]  ;;  %v11452_v27 = vld [vmem:[%s15997_s1 + $0x10] sm:$0xff]  ;;  %vm16011_vm4 = vcmask 154624  }
   0x4   :  { %v13599_v15 = vld [vmem:[%s15997_s1 + $0x20] sm:$0xff]  ;;  %v13621_v24 = vld [vmem:[%s15997_s1 + $0x28] sm:$0xff]  ;;  %v11453_v32 = vld [vmem:[%s15997_s1 + $0x18] sm:$0xff]  ;;  %vm16008_vm5 = vcmask 1039360   ;;  %vm16007_vm6 = vcmask 908288   ;;  %vm16006_vm7 = vcmask 900096  }
   0x5   :  { %840 = vrot.lane.b32.xlu1 %v13453_v2, %s13380_s30  ;;  %v13643_v34 = vld [vmem:[%s15997_s1 + $0x30] sm:$0xff]  ;;  %v13655_v39 = vld [vmem:[%s15997_s1 + $0x38] sm:$0xff]  ;;  %v13685_v53 = vld [vmem:[%s15997_s1 + $0x40] sm:$0xff]  ;;  %vm16005_vm8 = vcmask 891904  }
   0x6   :  { %834 = vrot.lane.b32.xlu0 %v13459_v3, %s13380_s30  ;;  %v13696_v57 = vld [vmem:[%s15997_s1 + $0x48] sm:$0xff]  ;;  %v286_v59 = vld [vmem:[%s15997_s1] sm:$0xff]  ;;  %v13730_v9 = vld [vmem:[%s15997_s1 + $0x50] sm:$0xff] }
   0x7   :  { %v287_v63 = vld [vmem:[%s15997_s1 + $0x8] sm:$0xff] }
   0x9   :  { %838 = vrot.lane.b32.xlu1 %v13468_v4, %s13380_s30 }
   0xa   :  { %842 = vrot.lane.b32.xlu0 %v13473_v5, %s13380_s30 }
   0xd   :  { %302 = vrot.lane.b32.xlu1 %v13459_v3, %s13381_s20 }
   0xe   :  { %300 = vrot.lane.b32.xlu0 %v13445_v1, %s13381_s20 }
  0x11   :  { %1111 = vrot.lane.b32.xlu1 %v13445_v1, %s13382_s21 }
  0x12   :  { %298 = vrot.lane.b32.xlu0 %v13379_v0, %s13381_s20 }
  0x15   :  { %1109 = vrot.lane.b32.xlu1 %v13379_v0, %s13382_s21 }
  0x16   :  { %1113 = vrot.lane.b32.xlu0 %v13459_v3, %s13382_s21 }
  0x19   :  { %306 = vrot.lane.b32.xlu1 %v13468_v4, %s13381_s20 }
  0x1a   :  { %304 = vrot.lane.b32.xlu0 %v13494_v6, %s13381_s20 }
  0x1d   :  { %1121 = vrot.lane.b32.xlu1 %v13473_v5, %s13382_s21 }
  0x1e   :  { %1119 = vrot.lane.b32.xlu0 %v13453_v2, %s13382_s21 }
  0x21   :  { %308 = vrot.lane.b32.xlu1 %v13453_v2, %s13381_s20 }
  0x22   :  { %1117 = vrot.lane.b32.xlu0 %v13468_v4, %s13382_s21 }
  0x25   :  { %565 = vrot.lane.b32.xlu1 %v13445_v1, %s13383_s0 }
  0x26   :  { %310 = vrot.lane.b32.xlu0 %v13473_v5, %s13381_s20 }
  0x29   :  { %563 = vrot.lane.b32.xlu1 %v13379_v0, %s13383_s0 }
  0x2a   :  { %567 = vrot.lane.b32.xlu0 %v13459_v3, %s13383_s0 }
  0x2d   :  { %571 = vrot.lane.b32.xlu1 %v13468_v4, %s13383_s0 }
  0x2e   :  { %569 = vrot.lane.b32.xlu0 %v13494_v6, %s13383_s0 }
  0x31   :  { %1658 = vrot.lane.b32.xlu1 %v13494_v6, %s13384_s24 }
  0x32   :  { %1656 = vrot.lane.b32.xlu0 %v13459_v3, %s13384_s24 }
  0x35   :  { %573 = vrot.lane.b32.xlu1 %v13453_v2, %s13383_s0 }
  0x36   :  { %1654 = vrot.lane.b32.xlu0 %v13445_v1, %s13384_s24 }
  0x39   :  { %1664 = vrot.lane.b32.xlu1 %v13473_v5, %s13384_s24 }
  0x3a   :  { %575 = vrot.lane.b32.xlu0 %v13473_v5, %s13383_s0 }
  0x3d   :  { %1662 = vrot.lane.b32.xlu1 %v13453_v2, %s13384_s24 }
  0x3e   :  { %1666 = vrot.lane.b32.xlu0 %v13379_v0, %s13384_s24 }
  0x41   :  { %1935 = vrot.lane.b32.xlu1 %v13459_v3, %s13385_s25 }
  0x42   :  { %836 = vrot.lane.b32.xlu0 %v13494_v6, %s13380_s30 }
  0x45   :  { %1933 = vrot.lane.b32.xlu1 %v13445_v1, %s13385_s25 }
  0x46   :  { %1937 = vrot.lane.b32.xlu0 %v13494_v6, %s13385_s25 }
  0x49   :  { %1943 = vrot.lane.b32.xlu1 %v13473_v5, %s13385_s25 }
  0x4a   :  { %1115 = vrot.lane.b32.xlu0 %v13494_v6, %s13382_s21 }
  0x4d   :  { %1941 = vrot.lane.b32.xlu1 %v13453_v2, %s13385_s25 }
  0x4e   :  { %1945 = vrot.lane.b32.xlu0 %v13379_v0, %s13385_s25 }
  0x51   :  { %2216 = vrot.lane.b32.xlu1 %v13494_v6, %s13386_s26 }
  0x52   :  { %2214 = vrot.lane.b32.xlu0 %v13459_v3, %s13386_s26 }
  0x55   :  { %1660 = vrot.lane.b32.xlu1 %v13468_v4, %s13384_s24 }
  0x56   :  { %2212 = vrot.lane.b32.xlu0 %v13445_v1, %s13386_s26 }
  0x59   :  { %2224 = vrot.lane.b32.xlu1 %v13379_v0, %s13386_s26 }
  0x5a   :  { %2222 = vrot.lane.b32.xlu0 %v13473_v5, %s13386_s26 }
  0x5d   :  { %1939 = vrot.lane.b32.xlu1 %v13468_v4, %s13385_s25 }
  0x5e   :  { %2220 = vrot.lane.b32.xlu0 %v13453_v2, %s13386_s26 }
  0x61   :  { %2495 = vrot.lane.b32.xlu1 %v13494_v6, %s13387_s27 }
  0x62   :  { %2493 = vrot.lane.b32.xlu0 %v13459_v3, %s13387_s27 }
  0x65   :  { %2218 = vrot.lane.b32.xlu1 %v13468_v4, %s13386_s26 }
  0x66   :  { %2491 = vrot.lane.b32.xlu0 %v13445_v1, %s13387_s27 }
  0x69   :  { %2499 = vrot.lane.b32.xlu1 %v13453_v2, %s13387_s27 }
  0x6a   :  { %2497 = vrot.lane.b32.xlu0 %v13468_v4, %s13387_s27 }
  0x6d   :  { %2503 = vrot.lane.b32.xlu1 %v13379_v0, %s13387_s27 }
  0x6e   :  { %2501 = vrot.lane.b32.xlu0 %v13473_v5, %s13387_s27 }
  0x71   :  { %2776 = vperm.xlu1 %12538, %v2768_v11  }
  0x72   :  { %2771 = vperm.xlu0 %12537, %v2767_v10  }
  0x73   :  { %v831_v7 = vpop.permute.xlu1 %830 }
  0x74   :  { %v833_v8 = vpop.permute.xlu0 %832 }
  0x75   :  { %v13603_v16 = vsel %vm16010_vm0, %v831_v7, %v833_v8 }
  0x77   :  { %v841_v12 = vpop.permute.xlu1 %840 }
  0x78   :  { %v13590_v13 = vpop.permute.xlu0 %834 }
  0x79   :  { %v13594_v14 = vsel %vm16010_vm0, %v833_v8, %v13590_v13 }
  0x7a   :  { %863 = vmatprep.subr.mxu0 %v13594_v14 }
  0x7b   :  { %v13605_v17 = vpop.permute.xlu1 %838  ;;  %864 = vmatpush1.msra.mxu0 %v13603_v16 }
  0x7c   :  { %v843_v18 = vpop.permute.xlu0 %842  ;;  %11468 = vmatmul.mubr.msk.f32.vlgmr.msra.gmra.mrb[0].mxu0 %vm325_vm1, %v13599_v15  ;;  %v849_v19 = vsel %vm16010_vm0, %v13605_v17, %v841_v12 }
  0x7d   :  { %v850_v20 = vsel %vm16010_vm0, %v841_v12, %v843_v18  ;;  %1081 = vmatprep.mubr.f32.mxu0 %v13379_v0 }
  0x7e   :  { %1017 = vmatprep.subr.mxu0 %v850_v20 }
  0x7f   :  { %v303_v21 = vpop.permute.xlu1 %302  ;;  %1018 = vmatpush1.msra.mxu0 %v849_v19  ;;  %v13744_v19 = vld [vmem:[%s15997_s1 + $0x58] sm:$0xff] }
  0x80   :  { %v301_v22 = vpop.permute.xlu0 %300  ;;  %11472 = vmatmul.mubr.msk.f32.vlgmr.msra.gmra.mrb[2].mxu0 %vm325_vm1, %v13599_v15 }
  0x81   :  { %v314_v23 = vsel %vm16012_vm2, %v301_v22, %v303_v21  ;;  %1087 = vmatprep.mubr.f32.mxu0 %v13379_v0 }
  0x82   :  { %332 = vmatprep.subr.mxu1 %v314_v23 }
  0x83   :  { %v1112_v25 = vpop.permute.xlu1 %1111 }
  0x84   :  { %v299_v26 = vpop.permute.xlu0 %298  ;;  %11473 = vmatmul.mubr.msk.f32.gmra.mrb[4].mxu0 %vm325_vm1, %v13621_v24 }
  0x85   :  { %v313_v28 = vsel %vm16012_vm2, %v299_v26, %v301_v22  ;;  %1206 = vmatprep.mubr.f32.mxu0 %v13379_v0 }
  0x86   :  { %333 = vmatpush1.msra.mxu1 %v313_v28 }
  0x87   :  { %v1110_v29 = vpop.permute.xlu1 %1109  ;;  %11454 = vmatmul.mubr.msk.f32.vlgmr.msra.gmra.mrb[0].mxu1 %vm325_vm1, %v11452_v27 }
  0x88   :  { %v1124_v30 = vsel %vm16009_vm3, %v1110_v29, %v1112_v25  ;;  %v13632_v31 = vpop.permute.xlu0 %1113  ;;  %402 = vmatprep.mubr.f32.mxu1 %v13379_v0 }
  0x89   :  { %v1125_v33 = vsel %vm16009_vm3, %v1112_v25, %v13632_v31 }
  0x8a   :  { %1142 = vmatprep.subr.mxu0 %v1125_v33 }
  0x8b   :  { %v307_v35 = vpop.permute.xlu1 %306  ;;  %1143 = vmatpush1.msra.mxu0 %v1124_v30  ;;  %11455 = vmatmul.mubr.msk.f32.gmra.mrb[2].mxu1 %vm325_vm1, %v11453_v32  ;;  %v13778_v30 = vld [vmem:[%s15997_s1 + $0x60] sm:$0xff] }
  0x8c   :  { %v305_v36 = vpop.permute.xlu0 %304  ;;  %11476 = vmatmul.mubr.msk.f32.vlgmr.msra.gmra.mrb[0].mxu0 %vm325_vm1, %v13643_v34  ;;  %473 = vmatprep.mubr.f32.mxu1 %v13379_v0 }
  0x8d   :  { %v316_v37 = vsel %vm16012_vm2, %v305_v36, %v307_v35  ;;  %v315_v38 = vsel %vm16012_vm2, %v303_v21, %v305_v36  ;;  %1212 = vmatprep.mubr.f32.mxu0 %v13379_v0 }
  0x8e   :  { %409 = vmatprep.subr.mxu1 %v316_v37 }
  0x8f   :  { %v1122_v40 = vpop.permute.xlu1 %1121  ;;  %410 = vmatpush1.msra.mxu1 %v315_v38 }
  0x90   :  { %v1120_v41 = vpop.permute.xlu0 %1119  ;;  %11477 = vmatmul.mubr.msk.f32.gmra.mrb[6].mxu0 %vm325_vm1, %v13655_v39  ;;  %11456 = vmatmul.mubr.msk.f32.vlgmr.msra.gmra.mrb[4].mxu1 %vm325_vm1, %v11452_v27 }
  0x91   :  { %v1129_v42 = vsel %vm16009_vm3, %v1120_v41, %v1122_v40  ;;  %1360 = vmatprep.mubr.f32.mxu0 %v13379_v0  ;;  %479 = vmatprep.mubr.f32.mxu1 %v13379_v0 }
  0x92   :  { %1296 = vmatprep.subr.mxu0 %v1129_v42 }
  0x93   :  { %v309_v43 = vpop.permute.xlu1 %308 }
  0x94   :  { %v13663_v44 = vpop.permute.xlu0 %1117  ;;  %11457 = vmatmul.mubr.msk.f32.gmra.mrb[6].mxu1 %vm325_vm1, %v11453_v32  ;;  %v317_v49 = vsel %vm16012_vm2, %v307_v35, %v309_v43  ;;  %v13794_v35 = vld [vmem:[%s15997_s1 + $0x68] sm:$0xff] }
  0x95   :  { %v1128_v45 = vsel %vm16009_vm3, %v13663_v44, %v1120_v41  ;;  %550 = vmatprep.mubr.f32.mxu1 %v13379_v0 }
  0x96   :  { %1297 = vmatpush1.msra.mxu0 %v1128_v45 }
  0x97   :  { %v566_v46 = vpop.permute.xlu1 %565  ;;  %11480 = vmatmul.mubr.msk.f32.vlgmr.msra.gmra.mrb[2].mxu0 %vm325_vm1, %v13643_v34  ;;  %1394 = vmatprep.subr.mxu0 %v13459_v3 }
  0x98   :  { %v311_v47 = vpop.permute.xlu0 %310  ;;  %1366 = vmatprep.mubr.f32.mxu0 %v13379_v0  ;;  %1395 = vmatpush1.msra.mxu0 %v13445_v1 }
  0x99   :  { %v318_v48 = vsel %vm16012_vm2, %v309_v43, %v311_v47  ;;  %1548 = vmatprep.subr.mxu0 %v13473_v5  ;;  %v11507_v47 = vld [vmem:[%s15997_s1 + $0x78] sm:$0xff] }
  0x9a   :  { %486 = vmatprep.subr.mxu1 %v318_v48 }
  0x9b   :  { %v564_v50 = vpop.permute.xlu1 %563  ;;  %487 = vmatpush1.msra.mxu1 %v317_v49  ;;  %11481 = vmatmul.mubr.msk.f32.gmra.mrb[4].mxu0 %vm325_vm1, %v13655_v39 }
  0x9c   :  { %v578_v51 = vsel %vm16011_vm4, %v564_v50, %v566_v46  ;;  %11458 = vmatmul.mubr.msk.f32.vlgmr.msra.gmra.mrb[8].mxu1 %vm325_vm1, %v11452_v27  ;;  %v568_v52 = vpop.permute.xlu0 %567  ;;  %1458 = vmatprep.mubr.f32.mxu0 %v13379_v0 }
  0x9d   :  { %v579_v54 = vsel %vm16011_vm4, %v566_v46, %v568_v52  ;;  %556 = vmatprep.mubr.f32.mxu1 %v13379_v0 }
  0x9e   :  { %596 = vmatprep.subr.mxu1 %v579_v54 }
  0x9f   :  { %v572_v55 = vpop.permute.xlu1 %571  ;;  %597 = vmatpush1.msra.mxu1 %v578_v51  ;;  %11484 = vmatmul.mubr.msk.f32.vlgmr.msra.gmra.mrb[0].mxu0 %vm325_vm1, %v13685_v53 }
  0xa0   :  { %11459 = vmatmul.mubr.msk.f32.gmra.mrb[10].mxu1 %vm325_vm1, %v11453_v32  ;;  %v570_v56 = vpop.permute.xlu0 %569  ;;  %1464 = vmatprep.mubr.f32.mxu0 %v13379_v0 }
  0xa1   :  { %660 = vmatprep.mubr.f32.mxu1 %v13379_v0  ;;  %v581_v58 = vsel %vm16011_vm4, %v570_v56, %v572_v55  ;;  %1549 = vmatpush1.msra.mxu0 %v13453_v2  ;;  %v580_v61 = vsel %vm16011_vm4, %v568_v52, %v570_v56 }
  0xa2   :  { %673 = vmatprep.subr.mxu1 %v581_v58 }
  0xa3   :  { %v13704_v60 = vpop.permute.xlu1 %1658  ;;  %11485 = vmatmul.mubr.msk.f32.gmra.mrb[6].mxu0 %vm325_vm1, %v13696_v57 }
  0xa4   :  { %11460 = vmatmul.mubr.msk.f32.vlgmr.msra.gmra.mrb[0].mxu1 %vm325_vm1, %v286_v59  ;;  %v1657_v62 = vpop.permute.xlu0 %1656  ;;  %1612 = vmatprep.mubr.f32.mxu0 %v13379_v0 }
  0xa5   :  { %674 = vmatpush1.msra.mxu1 %v580_v61  ;;  %666 = vmatprep.mubr.f32.mxu1 %v13379_v0  ;;  %v1670_v1 = vsel %vm16008_vm5, %v1657_v62, %v13704_v60 }
  0xa6   :  { %1687 = vmatprep.subr.mxu0 %v1670_v1  ;;  %v11515_v1 = vld [vmem:[%s15997_s1 + $0x88] sm:$0xff] }
  0xa7   :  { %v574_v2 = vpop.permute.xlu1 %573  ;;  %11488 = vmatmul.mubr.msk.f32.vlgmr.msra.gmra.mrb[2].mxu0 %vm325_vm1, %v13685_v53 }
  0xa8   :  { %11461 = vmatmul.mubr.msk.f32.gmra.mrb[2].mxu1 %vm325_vm1, %v287_v63  ;;  %v1655_v3 = vpop.permute.xlu0 %1654  ;;  %1618 = vmatprep.mubr.f32.mxu0 %v13379_v0  ;;  %v582_v11 = vsel %vm16011_vm4, %v572_v55, %v574_v2 }
  0xa9   :  { %v1669_v5 = vsel %vm16008_vm5, %v1655_v3, %v1657_v62  ;;  %737 = vmatprep.mubr.f32.mxu1 %v13379_v0 }
  0xaa   :  { %1688 = vmatpush1.msra.mxu0 %v1669_v5 }
  0xab   :  { %v1665_v7 = vpop.permute.xlu1 %1664  ;;  %11489 = vmatmul.mubr.msk.f32.gmra.mrb[4].mxu0 %vm325_vm1, %v13696_v57 }
  0xac   :  { %11462 = vmatmul.mubr.msk.f32.vlgmr.msra.gmra.mrb[4].mxu1 %vm325_vm1, %v286_v59  ;;  %v576_v8 = vpop.permute.xlu0 %575  ;;  %1751 = vmatprep.mubr.f32.mxu0 %v13379_v0 }
  0xad   :  { %v583_v10 = vsel %vm16011_vm4, %v574_v2, %v576_v8  ;;  %743 = vmatprep.mubr.f32.mxu1 %v13379_v0  ;;  %v16015_v8 = vlaneseq }
  0xae   :  { %750 = vmatprep.subr.mxu1 %v583_v10 }
  0xaf   :  { %v13735_v12 = vpop.permute.xlu1 %1662  ;;  %751 = vmatpush1.msra.mxu1 %v582_v11  ;;  %11492 = vmatmul.mubr.msk.f32.vlgmr.msra.gmra.mrb[0].mxu0 %vm325_vm1, %v13730_v9 }
  0xb0   :  { %11463 = vmatmul.mubr.msk.f32.gmra.mrb[6].mxu1 %vm325_vm1, %v287_v63  ;;  %12116 = vmatprep.subr.mxu1 %v13594_v14  ;;  %v1667_v18 = vpop.permute.xlu0 %1666  ;;  %v1673_v21 = vsel %vm16008_vm5, %v13735_v12, %v1665_v7 }
  0xb1   :  { %1757 = vmatprep.mubr.f32.mxu0 %v13379_v0  ;;  %814 = vmatprep.mubr.f32.mxu1 %v13379_v0  ;;  %v1674_v20 = vsel %vm16008_vm5, %v1665_v7, %v1667_v18 }
  0xb2   :  { %1841 = vmatprep.subr.mxu0 %v1674_v20 }
  0xb3   :  { %v1936_v22 = vpop.permute.xlu1 %1935  ;;  %11493 = vmatmul.mubr.msk.f32.gmra.mrb[6].mxu0 %vm325_vm1, %v13744_v19 }
  0xb4   :  { %11464 = vmatmul.mubr.msk.f32.vlgmr.msra.gmra.mrb[8].mxu1 %vm325_vm1, %v286_v59  ;;  %v837_v14 = vpop.permute.xlu0 %836  ;;  %1842 = vmatpush1.msra.mxu0 %v1673_v21  ;;  %v11514_v59 = vld [vmem:[%s15997_s1 + $0x80] sm:$0xff] }
  0xb5   :  { %12117 = vmatpush1.msra.mxu1 %v13603_v16  ;;  %v848_v23 = vsel %vm16010_vm0, %v837_v14, %v13605_v17  ;;  %1905 = vmatprep.mubr.f32.mxu0 %v13379_v0  ;;  %v847_v28 = vsel %vm16010_vm0, %v13590_v13, %v837_v14 }
  0xb6   :  { %940 = vmatprep.subr.mxu1 %v848_v23  ;;  %820 = vmatprep.mubr.f32.mxu1 %v13379_v0 }
  0xb7   :  { %v1934_v25 = vpop.permute.xlu1 %1933  ;;  %11496 = vmatmul.mubr.msk.f32.vlgmr.msra.gmra.mrb[2].mxu0 %vm325_vm1, %v13730_v9 }
  0xb8   :  { %11465 = vmatmul.mubr.msk.f32.gmra.mrb[10].mxu1 %vm325_vm1, %v287_v63  ;;  %v13762_v26 = vpop.permute.xlu0 %1937  ;;  %1911 = vmatprep.mubr.f32.mxu0 %v13379_v0  ;;  %v1948_v16 = vsel %vm16007_vm6, %v1934_v25, %v1936_v22 }
  0xb9   :  { %933 = vmatprep.mubr.f32.mxu1 %v13379_v0  ;;  %v1949_v17 = vsel %vm16007_vm6, %v1936_v22, %v13762_v26 }
  0xba   :  { %1966 = vmatprep.subr.mxu0 %v1949_v17 }
  0xbb   :  { %v1944_v27 = vpop.permute.xlu1 %1943  ;;  %11497 = vmatmul.mubr.msk.f32.gmra.mrb[4].mxu0 %vm325_vm1, %v13744_v19 }
  0xbc   :  { %11469 = vmatmul.mubr.msk.f32.vlgmr.msra.gmra.mrb[2].mxu1 %vm325_vm1, %v13621_v24  ;;  %v1116_v29 = vpop.permute.xlu0 %1115  ;;  %1967 = vmatpush1.msra.mxu0 %v1948_v16 }
  0xbd   :  { %941 = vmatpush1.msra.mxu1 %v847_v28  ;;  %v1127_v32 = vsel %vm16009_vm3, %v1116_v29, %v13663_v44  ;;  %2030 = vmatprep.mubr.f32.mxu0 %v13379_v0  ;;  %v1126_v13 = vsel %vm16009_vm3, %v13632_v31, %v1116_v29 }
  0xbe   :  { %1219 = vmatprep.subr.mxu1 %v1127_v32  ;;  %1004 = vmatprep.mubr.f32.mxu1 %v13379_v0 }
  0xbf   :  { %v1942_v33 = vpop.permute.xlu1 %1941  ;;  %11500 = vmatmul.mubr.msk.f32.vlgmr.msra.gmra.mrb[0].mxu0 %vm325_vm1, %v13778_v30 }
  0xc0   :  { %11470 = vmatmul.mubr.msk.f32.vlgmr.msra.gmra.mrb[4].mxu1 %vm325_vm1, %v13599_v15  ;;  %2036 = vmatprep.mubr.f32.mxu0 %v13379_v0  ;;  %v1946_v36 = vpop.permute.xlu0 %1945  ;;  %v1952_v38 = vsel %vm16007_vm6, %v1942_v33, %v1944_v27 }
  0xc1   :  { %1220 = vmatpush1.msra.mxu1 %v1126_v13  ;;  %1010 = vmatprep.mubr.f32.mxu1 %v13379_v0  ;;  %v1953_v37 = vsel %vm16007_vm6, %v1944_v27, %v1946_v36 }
  0xc2   :  { %2120 = vmatprep.subr.mxu0 %v1953_v37  ;;  %1471 = vmatprep.subr.mxu1 %v13468_v4 }
  0xc3   :  { %v13800_v15 = vpop.permute.xlu1 %2216  ;;  %11501 = vmatmul.mubr.msk.f32.gmra.mrb[6].mxu0 %vm325_vm1, %v13794_v35 }
  0xc4   :  { %11471 = vmatmul.mubr.msk.f32.gmra.mrb[6].mxu1 %vm325_vm1, %v13621_v24  ;;  %2121 = vmatpush1.msra.mxu0 %v1952_v38  ;;  %v2215_v31 = vpop.permute.xlu0 %2214 }
  0xc5   :  { %2184 = vmatprep.mubr.f32.mxu0 %v13379_v0  ;;  %1283 = vmatprep.mubr.f32.mxu1 %v13379_v0  ;;  %v2228_v40 = vsel %vm16006_vm7, %v2215_v31, %v13800_v15 }
  0xc6   :  { %2245 = vmatprep.subr.mxu0 %v2228_v40 }
  0xc7   :  { %v1661_v4 = vpop.permute.xlu1 %1660  ;;  %11504 = vmatmul.mubr.msk.f32.vlgmr.msra.gmra.mrb[2].mxu0 %vm325_vm1, %v13778_v30 }
  0xc8   :  { %11478 = vmatmul.mubr.msk.f32.vlgmr.msra.gmra.mrb[4].mxu1 %vm325_vm1, %v13643_v34  ;;  %v1672_v24 = vsel %vm16008_vm5, %v1661_v4, %v13735_v12  ;;  %2190 = vmatprep.mubr.f32.mxu0 %v13379_v0  ;;  %v2213_v41 = vpop.permute.xlu0 %2212  ;;  %v13828_v34 = vld [vmem:[%s15997_s1 + $0x70] sm:$0xff] }
  0xc9   :  { %1472 = vmatpush1.msra.mxu1 %v13494_v6  ;;  %1289 = vmatprep.mubr.f32.mxu1 %v13379_v0  ;;  %v2227_v42 = vsel %vm16006_vm7, %v2213_v41, %v2215_v31 }
  0xca   :  { %1764 = vmatprep.subr.mxu1 %v1672_v24  ;;  %2246 = vmatpush1.msra.mxu0 %v2227_v42 }
  0xcb   :  { %v2225_v43 = vpop.permute.xlu1 %2224  ;;  %11505 = vmatmul.mubr.msk.f32.gmra.mrb[4].mxu0 %vm325_vm1, %v13794_v35 }
  0xcc   :  { %11479 = vmatmul.mubr.msk.f32.gmra.mrb[6].mxu1 %vm325_vm1, %v13655_v39  ;;  %2309 = vmatprep.mubr.f32.mxu0 %v13379_v0  ;;  %v2223_v6 = vpop.permute.xlu0 %2222  ;;  %v1671_v39 = vsel %vm16008_vm5, %v13704_v60, %v1661_v4 }
  0xcd   :  { %1535 = vmatprep.mubr.f32.mxu1 %v13379_v0  ;;  %v2232_v44 = vsel %vm16006_vm7, %v2223_v6, %v2225_v43 }
  0xce   :  { %2399 = vmatprep.subr.mxu0 %v2232_v44 }
  0xcf   :  { %v1940_v45 = vpop.permute.xlu1 %1939  ;;  %11508 = vmatmul.mubr.msk.f32.vlgmr.msra.gmra.mrb[0].mxu0 %vm325_vm1, %v13828_v34 }
  0xd0   :  { %11486 = vmatmul.mubr.msk.f32.vlgmr.msra.gmra.mrb[4].mxu1 %vm325_vm1, %v13685_v53  ;;  %v1951_v46 = vsel %vm16007_vm6, %v1940_v45, %v1942_v33  ;;  %2315 = vmatprep.mubr.f32.mxu0 %v13379_v0  ;;  %v2221_v48 = vpop.permute.xlu0 %2220  ;;  %v1950_v54 = vsel %vm16007_vm6, %v13762_v26, %v1940_v45 }
  0xd1   :  { %1765 = vmatpush1.msra.mxu1 %v1671_v39  ;;  %1541 = vmatprep.mubr.f32.mxu1 %v13379_v0  ;;  %v2231_v49 = vsel %vm16006_vm7, %v2221_v48, %v2223_v6 }
  0xd2   :  { %2043 = vmatprep.subr.mxu1 %v1951_v46  ;;  %2400 = vmatpush1.msra.mxu0 %v2231_v49 }
  0xd3   :  { %v2496_v50 = vpop.permute.xlu1 %2495  ;;  %11509 = vmatmul.mubr.msk.f32.gmra.mrb[6].mxu0 %vm325_vm1, %v11507_v47 }
  0xd4   :  { %11487 = vmatmul.mubr.msk.f32.gmra.mrb[6].mxu1 %vm325_vm1, %v13696_v57  ;;  %2463 = vmatprep.mubr.f32.mxu0 %v13379_v0  ;;  %v2494_v51 = vpop.permute.xlu0 %2493 }
  0xd5   :  { %1828 = vmatprep.mubr.f32.mxu1 %v13379_v0  ;;  %v2507_v52 = vsel %vm16005_vm8, %v2494_v51, %v2496_v50 }
  0xd6   :  { %2524 = vmatprep.subr.mxu0 %v2507_v52 }
  0xd7   :  { %v2219_v53 = vpop.permute.xlu1 %2218  ;;  %11512 = vmatmul.mubr.msk.f32.vlgmr.msra.gmra.mrb[2].mxu0 %vm325_vm1, %v13828_v34 }
  0xd8   :  { %11494 = vmatmul.mubr.msk.f32.vlgmr.msra.gmra.mrb[4].mxu1 %vm325_vm1, %v13730_v9  ;;  %2469 = vmatprep.mubr.f32.mxu0 %v13379_v0  ;;  %v2230_v55 = vsel %vm16006_vm7, %v2219_v53, %v2221_v48  ;;  %v2492_v56 = vpop.permute.xlu0 %2491  ;;  %v2229_v63 = vsel %vm16006_vm7, %v13800_v15, %v2219_v53  ;;  %v39_v9 = vand.u32 127, %v16015_v8 }
  0xd9   :  { %2044 = vmatpush1.msra.mxu1 %v1950_v54  ;;  %1834 = vmatprep.mubr.f32.mxu1 %v13379_v0  ;;  %v2506_v57 = vsel %vm16005_vm8, %v2492_v56, %v2494_v51 }
  0xda   :  { %2322 = vmatprep.subr.mxu1 %v2230_v55  ;;  %2525 = vmatpush1.msra.mxu0 %v2506_v57  ;;  %v40_v10 = vadd.s32 128, %v39_v9  ;;  %v13902_v11 = vmul.u32.u64.low 2863311531, %v39_v9  ;;  %v13903_v12 = vmul.u32.u64.high 2863311531, %v39_v9, %v13902_v11  ;;  %v43_v20 = vadd.s32 512, %v39_v9 }
  0xdb   :  { %11513 = vmatmul.mubr.msk.f32.gmra.mrb[4].mxu0 %vm325_vm1, %v11507_v47  ;;  %v2500_v58 = vpop.permute.xlu1 %2499  ;;  %v44_v22 = vadd.s32 640, %v39_v9  ;;  %v41_v23 = vadd.s32 256, %v39_v9  ;;  %v42_v25 = vadd.s32 384, %v39_v9 }
  0xdc   :  { %11495 = vmatmul.mubr.msk.f32.gmra.mrb[6].mxu1 %vm325_vm1, %v13744_v19  ;;  %2588 = vmatprep.mubr.f32.mxu0 %v13379_v0  ;;  %v2498_v60 = vpop.permute.xlu0 %2497  ;;  %v13905_v18 = vmul.u32.u64.low 2863311531, %v40_v10  ;;  %v13906_v19 = vmul.u32.u64.high 2863311531, %v40_v10, %v13905_v18  ;;  %v51_v21 = vshrl.u32 %v13903_v12, 8 }
  0xdd   :  { %2107 = vmatprep.mubr.f32.mxu1 %v13379_v0  ;;  %v2509_v62 = vsel %vm16005_vm8, %v2498_v60, %v2500_v58  ;;  %v2508_v7 = vsel %vm16005_vm8, %v2496_v50, %v2498_v60  ;;  %v13910_v26 = vmul.u32.u64.low 2863311531, %v43_v20  ;;  %v13911_v16 = vmul.u32.u64.high 2863311531, %v43_v20, %v13910_v26 }
  0xde   :  { %v62_v14 = vshrl.u32 %v13906_v19, 8  ;;  %v52_v17 = vmul.u32 384, %v51_v21  ;;  %v13913_v27 = vmul.u32.u64.low 2863311531, %v44_v22  ;;  %v13914_v28 = vmul.u32.u64.high 2863311531, %v44_v22, %v13913_v27 }
  0xdf   :  { %11516 = vmatmul.mubr.msk.f32.vlgmr.msra.gmra.mrb[0].mxu0 %vm325_vm1, %v11514_v59  ;;  %v2504_v61 = vpop.permute.xlu1 %2503  ;;  %v13919_v33 = vmul.u32.u64.low 2863311531, %v42_v25  ;;  %v13920_v13 = vmul.u32.u64.high 2863311531, %v42_v25, %v13919_v33  ;;  %v95_v37 = vshrl.u32 %v13911_v16, 8 }
  0xe0   :  { %11502 = vmatmul.mubr.msk.f32.vlgmr.msra.gmra.mrb[4].mxu1 %vm325_vm1, %v13778_v30  ;;  %2594 = vmatprep.mubr.f32.mxu0 %v13379_v0  ;;  %v2502_v2 = vpop.permute.xlu0 %2501  ;;  %v63_v29 = vmul.u32 384, %v62_v14  ;;  %v13916_v30 = vmul.u32.u64.low 2863311531, %v41_v23  ;;  %v13917_v32 = vmul.u32.u64.high 2863311531, %v41_v23, %v13916_v30  ;;  %v106_v15 = vshrl.u32 %v13914_v28, 8 }
  0xe1   :  { %2323 = vmatpush1.msra.mxu1 %v2229_v63  ;;  %2113 = vmatprep.mubr.f32.mxu1 %v13379_v0  ;;  %v2511_v3 = vsel %vm16005_vm8, %v2502_v2, %v2504_v61  ;;  %v2510_v5 = vsel %vm16005_vm8, %v2500_v58, %v2502_v2  ;;  %v84_v24 = vshrl.u32 %v13920_v13, 8  ;;  %v96_v42 = vmul.u32 384, %v95_v37 }
  0xe2   :  { %2678 = vmatprep.subr.mxu0 %v2511_v3  ;;  %2601 = vmatprep.subr.mxu1 %v2509_v62  ;;  %v64_v36 = vsub.s32 %v40_v10, %v63_v29  ;;  %v73_v40 = vshrl.u32 %v13917_v32, 8  ;;  %v107_v43 = vmul.u32 384, %v106_v15 }
  0xe3   :  { %11517 = vmatmul.mubr.msk.f32.gmra.mrb[6].mxu0 %vm325_vm1, %v11515_v1  ;;  %v85_v44 = vmul.u32 384, %v84_v24  ;;  %v97_v39 = vsub.s32 %v43_v20, %v96_v42 }
  0xe4   :  { %11503 = vmatmul.mubr.msk.f32.gmra.mrb[6].mxu1 %vm325_vm1, %v13794_v35  ;;  %2679 = vmatpush1.msra.mxu0 %v2510_v5  ;;  %v53_v35 = vsub.s32 %v39_v9, %v52_v17  ;;  %vm112_vm11 = vcmp.ne.s32.totalorder %v64_v36, 0  ;;  %vm118_vm12 = vcmp.lt.s32.totalorder %v64_v36, 0  ;;  %v130_v41 = vadd.s32 384, %v64_v36 }
  0xe5   :  { %2742 = vmatprep.mubr.f32.mxu0 %v13379_v0  ;;  %2386 = vmatprep.mubr.f32.mxu1 %v13379_v0  ;;  %vm124_vm14 = vmand %vm118_vm12, %vm112_vm11  ;;  %v108_v46 = vsub.s32 %v44_v22, %v107_v43  ;;  %v86_v50 = vsub.s32 %v42_v25, %v85_v44  ;;  %vm115_vm15 = vcmp.ne.s32.totalorder %v97_v39, 0  ;;  %v133_v52 = vadd.s32 384, %v97_v39 }
  0xe6   :  { %vm111_vm9 = vcmp.ne.s32.totalorder %v53_v35, 0  ;;  %vm117_vm10 = vcmp.lt.s32.totalorder %v53_v35, 0  ;;  %v129_v4 = vadd.s32 384, %v53_v35  ;;  %v13932_v45 = vsel %vm124_vm14, %v130_v41, %v64_v36 }
  0xe7   :  { %11520 = vmatmul.mubr.msk.f32.vlgmr.msra.gmra.mrb[2].mxu0 %vm325_vm1, %v11514_v59  ;;  %vm123_vm13 = vmand %vm117_vm10, %vm111_vm9  ;;  %v153_v49 = vsub.s32 0, %v13932_v45  ;;  %vm116_vm9 = vcmp.ne.s32.totalorder %v108_v46, 0  ;;  %vm122_vm10 = vcmp.lt.s32.totalorder %v108_v46, 0  ;;  %v134_v54 = vadd.s32 384, %v108_v46 }
  0xe8   :  { %11510 = vmatmul.mubr.msk.f32.vlgmr.msra.gmra.mrb[4].mxu1 %vm325_vm1, %v13828_v34  ;;  %2748 = vmatprep.mubr.f32.mxu0 %v13379_v0  ;;  %v74_v34 = vmul.u32 384, %v73_v40  ;;  %v13930_v6 = vsel %vm123_vm13, %v129_v4, %v53_v35  ;;  %vm114_vm14 = vcmp.ne.s32.totalorder %v86_v50, 0  ;;  %vm120_vm8 = vcmp.lt.s32.totalorder %v86_v50, 0  ;;  %vm128_vm7 = vmand %vm122_vm10, %vm116_vm9 }
  0xe9   :  { %2602 = vmatpush1.msra.mxu1 %v2508_v7  ;;  %2392 = vmatprep.mubr.f32.mxu1 %v13379_v0  ;;  %v11447_v53 = vmin.u32 %v153_v49, %v13932_v45  ;;  %v132_v57 = vadd.s32 384, %v86_v50  ;;  %vm126_vm5 = vmand %vm120_vm8, %vm114_vm14 }
  0xea   :  { %v75_v48 = vsub.s32 %v41_v23, %v74_v34 }
  0xeb   :  { %11521 = vmatmul.mubr.msk.f32.gmra.mrb[4].mxu0 %vm325_vm1, %v11515_v1  ;;  %v13947_v62 = vmul.u32.u64.low 3817748708, %v11447_v53  ;;  %v13948_v63 = vmul.u32.u64.high 3817748708, %v11447_v53, %v13947_v62  ;;  %v13957_v7 = vsel %vm126_vm5, %v132_v57, %v86_v50  ;;  %vm141_vm5 = vcmp.lt.s32.totalorder %v13930_v6, 0 }
  0xec   :  { %11511 = vmatmul.mubr.msk.f32.gmra.mrb[6].mxu1 %vm325_vm1, %v11507_v47  ;;  %6081 = vmatprep.mubr.f32.mxu0 %v13379_v0  ;;  %v142_v47 = vsub.s32 0, %v13930_v6  ;;  %vm113_vm11 = vcmp.ne.s32.totalorder %v75_v48, 0  ;;  %vm119_vm12 = vcmp.lt.s32.totalorder %v75_v48, 0  ;;  %v131_v55 = vadd.s32 384, %v75_v48 }
  0xed   :  { %2665 = vmatprep.mubr.f32.mxu1 %v13379_v0  ;;  %vm125_vm6 = vmand %vm119_vm12, %vm113_vm11  ;;  %v175_v12 = vsub.s32 0, %v13957_v7  ;;  %v158_v14 = vshrl.u32 %v13948_v63, 4  ;;  %vm174_vm14 = vcmp.lt.s32.totalorder %v13957_v7, 0 }
  0xee   :  { %v11446_v51 = vmin.u32 %v142_v47, %v13930_v6  ;;  %v13952_v2 = vsel %vm125_vm6, %v131_v55, %v75_v48  ;;  %vm152_vm6 = vcmp.lt.s32.totalorder %v13932_v45, 0 }
  0xef   :  { %v164_v11 = vsub.s32 0, %v13952_v2  ;;  %v11449_v25 = vmin.u32 %v175_v12, %v13957_v7  ;;  %v159_v29 = vmul.u32 18, %v158_v14 }
  0xf0   :  { %11518 = vmatmul.mubr.msk.f32.vlgmr.msra.gmra.mrb[4].mxu1 %vm325_vm1, %v11514_v59  ;;  %v13942_v59 = vmul.u32.u64.low 3817748708, %v11446_v51  ;;  %v13943_v60 = vmul.u32.u64.high 3817748708, %v11446_v51, %v13942_v59 }
  0xf1   :  { %2671 = vmatprep.mubr.f32.mxu1 %v13379_v0  ;;  %v11448_v23 = vmin.u32 %v164_v11, %v13952_v2  ;;  %v13983_v33 = vmul.u32.u64.low 3817748708, %v11449_v25  ;;  %v13984_v13 = vmul.u32.u64.high 3817748708, %v11449_v25, %v13983_v33  ;;  %v160_v36 = vsub.s32 %v11447_v53, %v159_v29  ;;  %v14004_v14 = vpop.permute.xlu0 %2771 }
  0xf2   :  { %v147_v21 = vshrl.u32 %v13943_v60, 4 }
  0xf3   :  { %v13980_v30 = vmul.u32.u64.low 3817748708, %v11448_v23  ;;  %v13981_v32 = vmul.u32.u64.high 3817748708, %v11448_v23, %v13980_v30  ;;  %v161_v4 = vsub.s32 0, %v160_v36  ;;  %v180_v41 = vshrl.u32 %v13984_v13, 4 }
  0xf4   :  { %11519 = vmatmul.mubr.msk.f32.gmra.mrb[6].mxu1 %vm325_vm1, %v11515_v1  ;;  %vm121_vm1 = vcmp.lt.s32.totalorder %v97_v39, 0  ;;  %v13950_v1 = vsel %vm128_vm7, %v134_v54, %v108_v46  ;;  %v148_v17 = vmul.u32 18, %v147_v21 }
  0xf5   :  { %3000 = vmatprep.mubr.f32.mxu1 %v13379_v0  ;;  %vm127_vm13 = vmand %vm121_vm1, %vm115_vm15  ;;  %v197_v10 = vsub.s32 0, %v13950_v1  ;;  %v169_v24 = vshrl.u32 %v13981_v32, 4  ;;  %v162_v44 = vsel %vm152_vm6, %v161_v4, %v160_v36  ;;  %v181_v46 = vmul.u32 18, %v180_v41  ;;  %v14019_v32 = vpop.permute.xlu1 %2776 }
  0xf6   :  { %v13945_v61 = vsel %vm127_vm13, %v133_v52, %v97_v39  ;;  %v149_v35 = vsub.s32 %v11446_v51, %v148_v17  ;;  %vm208_vm15 = vcmp.ne.s32.totalorder %v162_v44, 0  ;;  %vm214_vm1 = vcmp.lt.s32.totalorder %v162_v44, 0 }
  0xf7   :  { %v186_v5 = vsub.s32 0, %v13945_v61  ;;  %v11451_v22 = vmin.u32 %v197_v10, %v13950_v1  ;;  %v170_v39 = vmul.u32 18, %v169_v24  ;;  %v226_v51 = vadd.s32 18, %v162_v44  ;;  %vm220_vm10 = vmand %vm214_vm1, %vm208_vm15 }
  0xf8   :  { %v150_v15 = vsub.s32 0, %v149_v35  ;;  %v182_v52 = vsub.s32 %v11449_v25, %v181_v46  ;;  %vm185_vm11 = vcmp.lt.s32.totalorder %v13945_v61, 0  ;;  %vm196_vm12 = vcmp.lt.s32.totalorder %v13950_v1, 0 }
  0xf9   :  { %v11450_v19 = vmin.u32 %v186_v5, %v13945_v61  ;;  %v13977_v27 = vmul.u32.u64.low 3817748708, %v11451_v22  ;;  %v13978_v28 = vmul.u32.u64.high 3817748708, %v11451_v22, %v13977_v27  ;;  %v171_v50 = vsub.s32 %v11448_v23, %v170_v39 }
  0xfa   :  { %v151_v43 = vsel %vm141_vm5, %v150_v15, %v149_v35  ;;  %v232_v59 = vsel %vm220_vm10, %v226_v51, %v162_v44  ;;  %vm163_vm13 = vcmp.lt.s32.totalorder %v13952_v2, 0  ;;  %v183_v60 = vsub.s32 0, %v182_v52 }
  0xfb   :  { %v13974_v26 = vmul.u32.u64.low 3817748708, %v11450_v19  ;;  %v13975_v16 = vmul.u32.u64.high 3817748708, %v11450_v19, %v13974_v26  ;;  %v202_v40 = vshrl.u32 %v13978_v28, 4  ;;  %vm207_vm7 = vcmp.ne.s32.totalorder %v151_v43, 0 }
  0xfc   :  { %vm213_vm8 = vcmp.lt.s32.totalorder %v151_v43, 0  ;;  %v225_v49 = vadd.s32 18, %v151_v43  ;;  %v172_v57 = vsub.s32 0, %v171_v50  ;;  %v184_v10 = vsel %vm174_vm14, %v183_v60, %v182_v52 }
  0xfd   :  { %v191_v37 = vshrl.u32 %v13975_v16, 4  ;;  %v203_v34 = vmul.u32 18, %v202_v40  ;;  %vm219_vm9 = vmand %vm213_vm8, %vm207_vm7  ;;  %vm244_vm7 = vcmp.ge.s32.totalorder %v232_v59, 1  ;;  %vm250_vm8 = vcmp.le.s32.totalorder %v232_v59, 16 }
  0xfe   :  { %v231_v55 = vsel %vm219_vm9, %v225_v49, %v151_v43  ;;  %v173_v5 = vsel %vm163_vm13, %v172_v57, %v171_v50  ;;  %vm14000_vm0 = vmand %vm244_vm7, %vm250_vm8  ;;  %vm210_vm2 = vcmp.ne.s32.totalorder %v184_v10, 0  ;;  %vm216_vm13 = vcmp.lt.s32.totalorder %v184_v10, 0 }
  0xff   :  { %v192_v42 = vmul.u32 18, %v191_v37  ;;  %v204_v48 = vsub.s32 %v11451_v22, %v203_v34  ;;  %vm243_vm5 = vcmp.ge.s32.totalorder %v231_v55, 1  ;;  %vm249_vm6 = vcmp.le.s32.totalorder %v231_v55, 16  ;;  %vm222_vm8 = vmand %vm216_vm13, %vm210_vm2 }
 0x100   :  { %vm13996_vm9 = vmand %vm243_vm5, %vm249_vm6  ;;  %vm215_vm4 = vcmp.lt.s32.totalorder %v173_v5, 0  ;;  %v227_v23 = vadd.s32 18, %v173_v5  ;;  %vm237_vm5 = vcmp.lt.s32.totalorder %v13930_v6, 288  ;;  %v228_v16 = vadd.s32 18, %v184_v10 }
 0x101   :  { %v193_v47 = vsub.s32 %v11450_v19, %v192_v42  ;;  %v205_v54 = vsub.s32 0, %v204_v48  ;;  %vm238_vm7 = vcmp.lt.s32.totalorder %v13932_v45, 288  ;;  %v16040_v49 = vmov 0 }
 0x102   :  { %vm14024_vm2 = vmand %vm238_vm7, %vm14000_vm0  ;;  %v234_v36 = vsel %vm222_vm8, %v228_v16, %v184_v10 }
 0x103   :  { %v194_v53 = vsub.s32 0, %v193_v47  ;;  %v206_v63 = vsel %vm196_vm12, %v205_v54, %v204_v48  ;;  %vm252_vm7 = vcmp.le.s32.totalorder %v234_v36, 16 }
 0x104   :  { %vm212_vm10 = vcmp.ne.s32.totalorder %v206_v63, 0  ;;  %vm218_vm3 = vcmp.lt.s32.totalorder %v206_v63, 0  ;;  %v230_v21 = vadd.s32 18, %v206_v63 }
 0x105   :  { %v195_v62 = vsel %vm185_vm11, %v194_v53, %v193_v47  ;;  %vm209_vm11 = vcmp.ne.s32.totalorder %v173_v5, 0  ;;  %vm224_vm14 = vmand %vm218_vm3, %vm212_vm10 }
 0x106   :  { %vm211_vm15 = vcmp.ne.s32.totalorder %v195_v62, 0  ;;  %vm217_vm1 = vcmp.lt.s32.totalorder %v195_v62, 0  ;;  %v229_v19 = vadd.s32 18, %v195_v62  ;;  %vm221_vm6 = vmand %vm215_vm4, %vm209_vm11  ;;  %v236_v29 = vsel %vm224_vm14, %v230_v21, %v206_v63 }
 0x107   :  { %vm223_vm12 = vmand %vm217_vm1, %vm211_vm15  ;;  %vm241_vm15 = vcmp.lt.s32.totalorder %v13945_v61, 288  ;;  %vm242_vm4 = vcmp.lt.s32.totalorder %v13950_v1, 288  ;;  %vm248_vm10 = vcmp.ge.s32.totalorder %v236_v29, 1  ;;  %vm254_vm0 = vcmp.le.s32.totalorder %v236_v29, 16 }
 0x108   :  { %v235_v27 = vsel %vm223_vm12, %v229_v19, %v195_v62  ;;  %vm14014_vm3 = vmand %vm237_vm5, %vm13996_vm9  ;;  %vm239_vm12 = vcmp.lt.s32.totalorder %v13952_v2, 288  ;;  %vm246_vm14 = vcmp.ge.s32.totalorder %v234_v36, 1 }
 0x109   :  { %vm247_vm1 = vcmp.ge.s32.totalorder %v235_v27, 1  ;;  %vm253_vm9 = vcmp.le.s32.totalorder %v235_v27, 16 }
 0x10a   :  { %vm259_vm5 = vmand %vm247_vm1, %vm253_vm9 }
 0x10b   :  { %vm14057_vm8 = vmand %vm241_vm15, %vm259_vm5  ;;  %vm16020_vm5 = vcmask 130048  }
 0x10c   :  { %v16041_v49 = vsel %vm14057_vm8, 4294967295, %v16040_v49  ;;  %vm258_vm9 = vmand %vm246_vm14, %vm252_vm7 }
 0x10d   :  { %16042 = vst [vmem:[#allocation3_spill] sm:$0xff] %v16041_v49 }
 0x177   :  { %v13923_v38 = vpop.f32.mrb[0].mxu1 }
 0x178   :  { %v13926_v31 = vpop.f32.mrb[1].mxu1 }
 0x187   :  { %v13938_v56 = vpop.f32.mrb[8].mxu1 }
 0x188   :  { %v13940_v58 = vpop.f32.mrb[9].mxu1 }
 0x18b   :  { %v13954_v3 = vpop.f32.mrb[10].mxu1 }
 0x18c   :  { %v13959_v9 = vpop.f32.mrb[11].mxu1 }
 0x18f   :  { %v13964_v18 = vpop.f32.mrb[2].mxu1 }
 0x190   :  { %v13967_v20 = vpop.f32.mrb[3].mxu1 }
 0x1b2   :  { %v2590_v22 = vpop.f32.mrb[0].mxu0 }
 0x1b3   :  { %v12118_v25 = vadd.f32 %v2590_v22, %v13923_v38  ;;  %v2592_v26 = vpop.f32.mrb[1].mxu0 }
 0x1b4   :  { %v12119_v17 = vadd.f32 %v2592_v26, %v13926_v31  ;;  %v233_v31 = vsel %vm221_vm6, %v227_v23, %v173_v5  ;;  %vm260_vm6 = vmand %vm248_vm10, %vm254_vm0 }
 0x1b5   :  { %v2779_v28 = vadd.f32 %v12118_v25, %v14004_v14  ;;  %vm245_vm11 = vcmp.ge.s32.totalorder %v233_v31, 1  ;;  %vm251_vm13 = vcmp.le.s32.totalorder %v233_v31, 16  ;;  %vm14066_vm1 = vmand %vm242_vm4, %vm260_vm6  ;;  %vm240_vm4 = vcmp.lt.s32.totalorder %v13957_v7, 288 }
 0x1b6   :  { %v2780_v6 = vadd.f32 %v12119_v17, %v14004_v14  ;;  %v2596_v30 = vpop.f32.mrb[6].mxu0  ;;  %vm257_vm15 = vmand %vm245_vm11, %vm251_vm13  ;;  %vm16049_vm11 = vcmask 146432  }
 0x1b7   :  { %v2791_v33 = vmax.f32 %v2779_v28, 0.0  ;;  %v12120_v13 = vadd.f32 %v2596_v30, %v13964_v18  ;;  %v2598_v35 = vpop.f32.mrb[7].mxu0  ;;  %vm14101_vm10 = vmand %vm239_vm12, %vm257_vm15 }
 0x1b8   :  { %v2792_v37 = vmax.f32 %v2780_v6, 0.0  ;;  %v12121_v15 = vadd.f32 %v2598_v35, %v13967_v20  ;;  %vm14112_vm0 = vmand %vm240_vm4, %vm258_vm9 }
 0x1b9   :  { %v2815_v40 = vsel %vm14014_vm3, %v2791_v33, 0.0  ;;  %v2785_v4 = vadd.f32 %v12120_v13, %v14019_v32  ;;  %vm16050_vm12 = vmmov %vm16049_vm11 }
 0x1ba   :  { %v14035_v24 = vsel %vm14024_vm2, %v2792_v37, 0.0  ;;  %v2786_v18 = vadd.f32 %v12121_v15, %v14019_v32  ;;  %v2744_v41 = vpop.f32.mrb[2].mxu0  ;;  %vm16051_vm13 = vmmov %vm16049_vm11 }
 0x1bb   :  { %v2797_v20 = vmax.f32 %v2785_v4, 0.0  ;;  %v12122_v42 = vadd.f32 %v2744_v41, %v13938_v56  ;;  %v2746_v43 = vpop.f32.mrb[3].mxu0  ;;  %v14042_v34 = vpack.i.bf16 %v14035_v24, %v2815_v40  ;;  %vm16052_vm14 = vmmov %vm16049_vm11 }
 0x1bc   :  { %v2798_v44 = vmax.f32 %v2786_v18, 0.0  ;;  %v12123_v39 = vadd.f32 %v2746_v43, %v13940_v58  ;;  %vm16053_vm6 = vmmov %vm16049_vm11 }
 0x1bd   :  { %v2821_v46 = vsel %vm14014_vm3, %v2797_v20, 0.0  ;;  %v2783_v47 = vadd.f32 %v12122_v42, %v14004_v14  ;;  %12540 = vrot.lane.b32.xlu1 %v14042_v34, %s13381_s20  ;;  %v14051_v48 = vpack.c.bf16 %v2797_v20, %v2791_v33  ;;  %vm16054_vm7 = vmmov %vm16053_vm6 }
 0x1be   :  { %v2822_v56 = vsel %vm14024_vm2, %v2798_v44, 0.0  ;;  %v2784_v58 = vadd.f32 %v12123_v39, %v14004_v14  ;;  %v2750_v50 = vpop.f32.mrb[4].mxu0  ;;  %v14062_v51 = vpack.i.bf16 %v2821_v46, %v2815_v40  ;;  %vm16055_vm15 = vmmov %vm16053_vm6 }
 0x1bf   :  { %v2795_v52 = vmax.f32 %v2783_v47, 0.0  ;;  %v12124_v54 = vadd.f32 %v2750_v50, %v13954_v3  ;;  %v2752_v55 = vpop.f32.mrb[5].mxu0  ;;  %v14071_v61 = vpack.i.bf16 %v2822_v56, %v2821_v46  ;;  %vm16056_vm4 = vmmov %vm16053_vm6 }
 0x1c0   :  { %v2796_v57 = vmax.f32 %v2784_v58, 0.0  ;;  %v12125_v59 = vadd.f32 %v2752_v55, %v13959_v9  ;;  %v14089_v9 = vpack.c.bf16 %v2798_v44, %v2792_v37  ;;  %vm16057_vm9 = vmmov %vm16056_vm4 }
 0x1c1   :  { %v2819_v60 = vsel %vm14057_vm8, %v2795_v52, 0.0  ;;  %v2789_v62 = vadd.f32 %v12124_v54, %v14019_v32  ;;  %12545 = vrot.lane.b32.xlu0 %v14071_v61, %s13381_s20  ;;  %12550 = vrot.lane.b32.xlu1 %v13379_v0, %s13381_s20 }
 0x1c2   :  { %v14083_v1 = vsel %vm14066_vm1, %v2796_v57, 0.0  ;;  %v2790_v3 = vadd.f32 %v12125_v59, %v14019_v32 }
 0x1c3   :  { %v2801_v63 = vmax.f32 %v2789_v62, 0.0  ;;  %v2667_v5 = vpop.f32.mrb[4].mxu1  ;;  %v12564_v10 = vpack.i.bf16 %v14083_v1, %v2819_v60  ;;  %v5797_v62 = vld [vmem:[%s15998_s4 + $0x10] sm:$0xff] }
 0x1c4   :  { %v2802_v11 = vmax.f32 %v2790_v3, 0.0  ;;  %v2781_v12 = vadd.f32 %v14004_v14, %v2667_v5  ;;  %v2669_v19 = vpop.f32.mrb[5].mxu1 }
 0x1c5   :  { %v2825_v21 = vsel %vm14057_vm8, %v2801_v63, 0.0  ;;  %v14097_v22 = vpack.c.bf16 %v2801_v63, %v2795_v52  ;;  %v2782_v25 = vadd.f32 %v14004_v14, %v2669_v19  ;;  %v5796_v52 = vld [vmem:[%s15998_s4 + $0x8] sm:$0xff]  ;;  %v14224_v63 = vld [vmem:[%s15999_s3 + $0x20] sm:$0xff] }
 0x1c6   :  { %v2826_v26 = vsel %vm14066_vm1, %v2802_v11, 0.0  ;;  %v14108_v16 = vpack.c.bf16 %v2802_v11, %v2796_v57  ;;  %v2793_v17 = vmax.f32 %v2781_v12, 0.0  ;;  %v14232_v19 = vld [vmem:[%s15999_s3 + $0x28] sm:$0xff] }
 0x1c7   :  { %v2794_v28 = vmax.f32 %v2782_v25, 0.0  ;;  %v2673_v2 = vpop.f32.mrb[6].mxu1  ;;  %v12569_v29 = vpack.i.bf16 %v2826_v26, %v2825_v21  ;;  %v12709_v42 = vpack.i.bf16 %v13379_v0, %v2826_v26 }
 0x1c8   :  { %v2817_v6 = vsel %vm14101_vm10, %v2793_v17, 0.0  ;;  %v2787_v14 = vadd.f32 %v14019_v32, %v2673_v2  ;;  %v2675_v30 = vpop.f32.mrb[7].mxu1 }
 0x1c9   :  { %v2818_v31 = vsel %vm14112_vm0, %v2794_v28, 0.0  ;;  %v2788_v33 = vadd.f32 %v14019_v32, %v2675_v30  ;;  %v12679_v7 = vpack.i.bf16 %v2817_v6, %v14035_v24  ;;  %v12704_v24 = vpack.i.bf16 %v13379_v0, %v14083_v1  ;;  %v14216_v1 = vld [vmem:[%s15999_s3 + $0x18] sm:$0xff] }
 0x1ca   :  { %v2799_v13 = vmax.f32 %v2787_v14, 0.0  ;;  %v12554_v35 = vpack.i.bf16 %v2818_v31, %v2817_v6  ;;  %v12694_v37 = vpack.i.bf16 %v2819_v60, %v2818_v31 }
 0x1cb   :  { %v2800_v36 = vmax.f32 %v2788_v33, 0.0 }
 0x1cc   :  { %v2823_v15 = vsel %vm14101_vm10, %v2799_v13, 0.0  ;;  %v14125_v40 = vpack.c.bf16 %v2799_v13, %v2793_v17  ;;  %12555 = vrot.lane.b32.xlu0 %v12554_v35, %s13381_s20 }
 0x1cd   :  { %v2824_v4 = vsel %vm14112_vm0, %v2800_v36, 0.0  ;;  %v14130_v18 = vpack.c.bf16 %v2800_v36, %v2794_v28  ;;  %v12684_v41 = vpack.i.bf16 %v2823_v15, %v2822_v56 }
 0x1ce   :  { %v12559_v32 = vpack.i.bf16 %v2824_v4, %v2823_v15  ;;  %v12699_v20 = vpack.i.bf16 %v2825_v21, %v2824_v4 }
 0x1d0   :  { %12560 = vrot.lane.b32.xlu1 %v12559_v32, %s13381_s20  ;;  %12565 = vrot.lane.b32.xlu0 %v12564_v10, %s13381_s20 }
 0x1d4   :  { %12570 = vrot.lane.b32.xlu1 %v12569_v29, %s13381_s20  ;;  %12575 = vrot.lane.b32.xlu0 %v14042_v34, %s13383_s0 }
 0x1d8   :  { %12580 = vrot.lane.b32.xlu1 %v14071_v61, %s13383_s0  ;;  %12585 = vrot.lane.b32.xlu0 %v13379_v0, %s13383_s0 }
 0x1dc   :  { %12590 = vrot.lane.b32.xlu1 %v12554_v35, %s13383_s0  ;;  %12595 = vrot.lane.b32.xlu0 %v12559_v32, %s13383_s0 }
 0x1e0   :  { %12600 = vrot.lane.b32.xlu1 %v12564_v10, %s13383_s0  ;;  %12605 = vrot.lane.b32.xlu0 %v12569_v29, %s13383_s0 }
 0x1e4   :  { %12610 = vrot.lane.b32.xlu1 %v14042_v34, %s13380_s30  ;;  %12615 = vrot.lane.b32.xlu0 %v14071_v61, %s13380_s30 }
 0x1e8   :  { %12620 = vrot.lane.b32.xlu1 %v13379_v0, %s13380_s30  ;;  %12625 = vrot.lane.b32.xlu0 %v12554_v35, %s13380_s30 }
 0x1ec   :  { %12630 = vrot.lane.b32.xlu1 %v12559_v32, %s13380_s30  ;;  %12635 = vrot.lane.b32.xlu0 %v12564_v10, %s13380_s30 }
 0x1f0   :  { %12640 = vrot.lane.b32.xlu1 %v12569_v29, %s13380_s30  ;;  %12645 = vrot.lane.b32.xlu0 %v14042_v34, %s13382_s21 }
 0x1f4   :  { %12650 = vrot.lane.b32.xlu1 %v14071_v61, %s13382_s21  ;;  %12655 = vrot.lane.b32.xlu0 %v13379_v0, %s13382_s21 }
 0x1f8   :  { %12660 = vrot.lane.b32.xlu1 %v12554_v35, %s13382_s21  ;;  %12665 = vrot.lane.b32.xlu0 %v12559_v32, %s13382_s21 }
 0x1fc   :  { %12670 = vrot.lane.b32.xlu1 %v12564_v10, %s13382_s21  ;;  %12675 = vrot.lane.b32.xlu0 %v12569_v29, %s13382_s21 }
 0x200   :  { %12680 = vrot.lane.b32.xlu1 %v12679_v7, %s13384_s24  ;;  %12685 = vrot.lane.b32.xlu0 %v12684_v41, %s13384_s24 }
 0x204   :  { %12690 = vrot.lane.b32.xlu1 %v14062_v51, %s13384_s24  ;;  %12695 = vrot.lane.b32.xlu0 %v12694_v37, %s13384_s24 }
 0x208   :  { %12700 = vrot.lane.b32.xlu1 %v12699_v20, %s13384_s24  ;;  %12705 = vrot.lane.b32.xlu0 %v12704_v24, %s13384_s24 }
 0x20c   :  { %12710 = vrot.lane.b32.xlu1 %v12709_v42, %s13384_s24  ;;  %12715 = vrot.lane.b32.xlu0 %v12679_v7, %s13385_s25 }
 0x210   :  { %12720 = vrot.lane.b32.xlu1 %v12684_v41, %s13385_s25  ;;  %12725 = vrot.lane.b32.xlu0 %v14062_v51, %s13385_s25 }
 0x214   :  { %12730 = vrot.lane.b32.xlu1 %v12694_v37, %s13385_s25  ;;  %12735 = vrot.lane.b32.xlu0 %v12699_v20, %s13385_s25 }
 0x218   :  { %12740 = vrot.lane.b32.xlu1 %v12704_v24, %s13385_s25  ;;  %12745 = vrot.lane.b32.xlu0 %v12709_v42, %s13385_s25 }
 0x21c   :  { %12750 = vrot.lane.b32.xlu1 %v12679_v7, %s13386_s26  ;;  %12755 = vrot.lane.b32.xlu0 %v12684_v41, %s13386_s26 }
 0x220   :  { %12760 = vrot.lane.b32.xlu1 %v14062_v51, %s13386_s26  ;;  %12765 = vrot.lane.b32.xlu0 %v12694_v37, %s13386_s26 }
 0x224   :  { %12770 = vrot.lane.b32.xlu1 %v12699_v20, %s13386_s26  ;;  %12775 = vrot.lane.b32.xlu0 %v12704_v24, %s13386_s26 }
 0x228   :  { %12780 = vrot.lane.b32.xlu1 %v12709_v42, %s13386_s26  ;;  %12785 = vrot.lane.b32.xlu0 %v12679_v7, %s13387_s27 }
 0x22c   :  { %12790 = vrot.lane.b32.xlu1 %v12684_v41, %s13387_s27  ;;  %12795 = vrot.lane.b32.xlu0 %v14062_v51, %s13387_s27  ;;  %v5795_v51 = vld [vmem:[%s15998_s4] sm:$0xff] }
 0x22f   :  { %v12541_v43 = vpop.permute.xlu1 %12540 }
 0x230   :  { %12800 = vrot.lane.b32.xlu1 %v12694_v37, %s13387_s27  ;;  %12805 = vrot.lane.b32.xlu0 %v12699_v20, %s13387_s27  ;;  %v12543_v34 = vunpack.i.h.bf16 %v12541_v43  ;;  %v12542_v44 = vunpack.i.l.bf16 %v12541_v43 }
 0x232   :  { %v2903_v61 = vsel %vm16051_vm13, %v12542_v44, %v12543_v34  ;;  %vm16060_vm13 = vmmov %vm16056_vm4 }
 0x233   :  { %v12551_v39 = vpop.permute.xlu1 %12550  ;;  %v12546_v46 = vpop.permute.xlu0 %12545 }
 0x234   :  { %v12553_v47 = vunpack.i.h.bf16 %v12551_v39  ;;  %v12552_v56 = vunpack.i.l.bf16 %v12551_v39  ;;  %v12548_v58 = vunpack.i.h.bf16 %v12546_v46  ;;  %v12547_v50 = vunpack.i.l.bf16 %v12546_v46  ;;  %12810 = vrot.lane.b32.xlu1 %v12704_v24, %s13387_s27  ;;  %12815 = vrot.lane.b32.xlu0 %v12709_v42, %s13387_s27 }
 0x236   :  { %v2902_v54 = vsel %vm16049_vm11, %v12552_v56, %v12542_v44  ;;  %v2908_v55 = vsel %vm16050_vm12, %v12553_v47, %v12547_v50  ;;  %v2909_v57 = vsel %vm16052_vm14, %v12547_v50, %v12548_v58  ;;  %vm16058_vm11 = vmmov %vm16056_vm4  ;;  %vm16061_vm14 = vcmask 154624  }
 0x237   :  { %v11774_v59 = vpack.c.bf16 %v2909_v57, %v2903_v61  ;;  %v11776_v60 = vpack.c.bf16 %v2908_v55, %v2902_v54  ;;  %vm16059_vm12 = vmmov %vm16056_vm4 }
 0x238   :  { %5800 = vperm.xlu1 %12538, %v5795_v51   ;;  %5805 = vperm.xlu0 %12537, %v5796_v52  }
 0x239   :  { %11775 = vmatprep.subr.bf16.mxu1 %v11774_v59 }
 0x23a   :  { %11777 = vmatpush1.bf16.msra.mxu1 %v11776_v60 }
 0x23c   :  { %5810 = vperm.xlu1 %12538, %v5797_v62   ;;  %12820 = vrot.lane.b32.xlu0 %v13379_v0, %s13381_s20 }
 0x23d   :  { %11525 = vmatmul.mubr.msk.f32.vlgmr.msra.gmra.mrb[12].mxu1 %vm16020_vm5, %v14216_v1 }
 0x23e   :  { %v12556_v3 = vpop.permute.xlu0 %12555  ;;  %3006 = vmatprep.mubr.f32.mxu1 %v13379_v0 }
 0x23f   :  { %v12558_v5 = vunpack.i.h.bf16 %v12556_v3  ;;  %v12557_v10 = vunpack.i.l.bf16 %v12556_v3 }
 0x240   :  { %12825 = vrot.lane.b32.xlu0 %v13379_v0, %s13383_s0 }
 0x241   :  { %11526 = vmatmul.mubr.msk.f32.gmra.mrb[14].mxu1 %vm16020_vm5, %v14224_v63  ;;  %v2904_v28 = vsel %vm16053_vm6, %v12543_v34, %v12557_v10  ;;  %v2905_v29 = vsel %vm16055_vm15, %v12557_v10, %v12558_v5  ;;  %vm16062_vm6 = vmmov %vm16061_vm14 }
 0x242   :  { %v12561_v11 = vpop.permute.xlu1 %12560  ;;  %v12566_v12 = vpop.permute.xlu0 %12565  ;;  %3012 = vmatprep.mubr.f32.mxu1 %v13379_v0  ;;  %vm16064_vm15 = vmmov %vm16062_vm6 }
 0x243   :  { %v12563_v21 = vunpack.i.h.bf16 %v12561_v11  ;;  %v12562_v25 = vunpack.i.l.bf16 %v12561_v11  ;;  %v12568_v26 = vunpack.i.h.bf16 %v12566_v12  ;;  %v12567_v17 = vunpack.i.l.bf16 %v12566_v12 }
 0x245   :  { %v2910_v2 = vsel %vm16054_vm7, %v12548_v58, %v12562_v25  ;;  %11527 = vmatmul.mubr.msk.f32.gmra.mrb[16].mxu1 %vm16020_vm5, %v14232_v19  ;;  %v2911_v6 = vsel %vm16056_vm4, %v12562_v25, %v12563_v21  ;;  %v2906_v35 = vsel %vm16057_vm9, %v12558_v5, %v12567_v17  ;;  %v2907_v36 = vsel %vm16058_vm11, %v12567_v17, %v12568_v26  ;;  %vm16063_vm7 = vmmov %vm16062_vm6  ;;  %v2853_v17 = vld [vmem:[%s15999_s3] sm:$0xff] }
 0x246   :  { %v12571_v14 = vpop.permute.xlu1 %12570  ;;  %v12576_v30 = vpop.permute.xlu0 %12575  ;;  %v11778_v31 = vpack.c.bf16 %v2911_v6, %v2905_v29  ;;  %v11780_v33 = vpack.c.bf16 %v2910_v2, %v2904_v28  ;;  %3083 = vmatprep.mubr.f32.mxu1 %v13379_v0  ;;  %vm16065_vm4 = vmmov %vm16062_vm6 }
 0x247   :  { %v12573_v7 = vunpack.i.h.bf16 %v12571_v14  ;;  %v12572_v13 = vunpack.i.l.bf16 %v12571_v14  ;;  %v12578_v15 = vunpack.i.h.bf16 %v12576_v30  ;;  %v12577_v4 = vunpack.i.l.bf16 %v12576_v30  ;;  %vm16066_vm9 = vmmov %vm16065_vm4 }
 0x248   :  { %11779 = vmatprep.subr.bf16.mxu1 %v11778_v31  ;;  %vm16067_vm11 = vmmov %vm16065_vm4 }
 0x249   :  { %v2912_v37 = vsel %vm16059_vm12, %v12563_v21, %v12572_v13  ;;  %11781 = vmatpush1.bf16.msra.mxu1 %v11780_v33  ;;  %v2913_v41 = vsel %vm16060_vm13, %v12572_v13, %v12573_v7  ;;  %v3214_v44 = vsel %vm16061_vm14, %v12577_v4, %v12578_v15  ;;  %vm16068_vm12 = vmmov %vm16065_vm4  ;;  %v2855_v13 = vld [vmem:[%s15999_s3 + $0x10] sm:$0xff] }
 0x24a   :  { %v12581_v32 = vpop.permute.xlu1 %12580  ;;  %v12586_v20 = vpop.permute.xlu0 %12585  ;;  %v11782_v24 = vpack.c.bf16 %v2913_v41, %v2907_v36  ;;  %v11784_v42 = vpack.c.bf16 %v2912_v37, %v2906_v35  ;;  %vm16069_vm13 = vmmov %vm16065_vm4 }
 0x24b   :  { %v12583_v43 = vunpack.i.h.bf16 %v12581_v32  ;;  %v12582_v34 = vunpack.i.l.bf16 %v12581_v32  ;;  %v12588_v58 = vunpack.i.h.bf16 %v12586_v20  ;;  %v12587_v50 = vunpack.i.l.bf16 %v12586_v20  ;;  %vm16070_vm14 = vmmov %vm16065_vm4 }
 0x24c   :  { %11528 = vmatmul.mubr.msk.f32.vlgmr.msra.gmra.mrb[18].mxu1 %vm16020_vm5, %v14216_v1  ;;  %11783 = vmatprep.subr.bf16.mxu1 %v11782_v24 }
 0x24d   :  { %11785 = vmatpush1.bf16.msra.mxu1 %v11784_v42  ;;  %3089 = vmatprep.mubr.f32.mxu1 %v13379_v0  ;;  %v3220_v39 = vsel %vm16062_vm6, %v12582_v34, %v12583_v43  ;;  %v3219_v61 = vsel %vm16063_vm7, %v12588_v58, %v12582_v34  ;;  %v3213_v57 = vsel %vm16064_vm15, %v12587_v50, %v12577_v4  ;;  %vm16071_vm6 = vmmov %vm16065_vm4  ;;  %vm16073_vm15 = vcmask 138240  }
 0x24e   :  { %v12591_v46 = vpop.permute.xlu1 %12590  ;;  %v12596_v47 = vpop.permute.xlu0 %12595  ;;  %v11786_v56 = vpack.c.bf16 %v3220_v39, %v3214_v44  ;;  %v11788_v62 = vpack.c.bf16 %v3219_v61, %v3213_v57  ;;  %vm16072_vm7 = vmmov %vm16065_vm4 }
 0x24f   :  { %v12593_v51 = vunpack.i.h.bf16 %v12591_v46  ;;  %v12592_v52 = vunpack.i.l.bf16 %v12591_v46  ;;  %v12598_v54 = vunpack.i.h.bf16 %v12596_v47  ;;  %v12597_v55 = vunpack.i.l.bf16 %v12596_v47 }
 0x250   :  { %11529 = vmatmul.mubr.msk.f32.gmra.mrb[20].mxu1 %vm16020_vm5, %v14224_v63  ;;  %11787 = vmatprep.subr.bf16.mxu1 %v11786_v56 }
 0x251   :  { %3095 = vmatprep.mubr.f32.mxu1 %v13379_v0  ;;  %v3216_v59 = vsel %vm16065_vm4, %v12592_v52, %v12593_v51  ;;  %v3222_v60 = vsel %vm16066_vm9, %v12597_v55, %v12598_v54  ;;  %v3215_v26 = vsel %vm16067_vm11, %v12578_v15, %v12592_v52  ;;  %vm16074_vm4 = vmmov %vm16073_vm15 }
 0x252   :  { %v11790_v3 = vpack.c.bf16 %v3222_v60, %v3216_v59  ;;  %v12601_v5 = vpop.permute.xlu1 %12600  ;;  %v12606_v10 = vpop.permute.xlu0 %12605  ;;  %vm16075_vm9 = vmmov %vm16074_vm4 }
 0x253   :  { %v12603_v11 = vunpack.i.h.bf16 %v12601_v5  ;;  %v12602_v12 = vunpack.i.l.bf16 %v12601_v5  ;;  %v12608_v21 = vunpack.i.h.bf16 %v12606_v10  ;;  %v12607_v25 = vunpack.i.l.bf16 %v12606_v10  ;;  %vm16076_vm11 = vmmov %vm16074_vm4 }
 0x254   :  { %11530 = vmatmul.mubr.msk.f32.gmra.mrb[22].mxu1 %vm16020_vm5, %v14232_v19 }
 0x255   :  { %3166 = vmatprep.mubr.f32.mxu1 %v13379_v0  ;;  %v3224_v28 = vsel %vm16070_vm14, %v12607_v25, %v12608_v21  ;;  %v3217_v35 = vsel %vm16071_vm6, %v12593_v51, %v12602_v12  ;;  %v3223_v36 = vsel %vm16072_vm7, %v12598_v54, %v12607_v25  ;;  %vm16079_vm14 = vmmov %vm16074_vm4  ;;  %v11544_v25 = vld [vmem:[%s15999_s3 + $0x38] sm:$0xff] }
 0x256   :  { %v12611_v6 = vpop.permute.xlu1 %12610  ;;  %v12616_v14 = vpop.permute.xlu0 %12615  ;;  %v11796_v41 = vpack.c.bf16 %v3223_v36, %v3217_v35  ;;  %vm16080_vm6 = vmmov %vm16074_vm4 }
 0x257   :  { %v12613_v30 = vunpack.i.h.bf16 %v12611_v6  ;;  %v12612_v31 = vunpack.i.l.bf16 %v12611_v6  ;;  %v12618_v33 = vunpack.i.h.bf16 %v12616_v14  ;;  %v12617_v7 = vunpack.i.l.bf16 %v12616_v14  ;;  %vm16081_vm7 = vmmov %vm16074_vm4 }
 0x258   :  { %11531 = vmatmul.mubr.msk.f32.vlgmr.msra.gmra.mrb[24].mxu1 %vm16020_vm5, %v14216_v1  ;;  %v3221_v1 = vsel %vm16068_vm12, %v12583_v43, %v12597_v55  ;;  %vm16077_vm12 = vmmov %vm16074_vm4 }
 0x259   :  { %11789 = vmatpush1.bf16.msra.mxu1 %v11788_v62  ;;  %3172 = vmatprep.mubr.f32.mxu1 %v13379_v0  ;;  %v11792_v2 = vpack.c.bf16 %v3221_v1, %v3215_v26  ;;  %v3528_v15 = vsel %vm16073_vm15, %v12612_v31, %v12613_v30  ;;  %v3534_v4 = vsel %vm16074_vm4, %v12617_v7, %v12618_v33  ;;  %vm16082_vm15 = vmmov %vm16074_vm4 }
 0x25a   :  { %11791 = vmatprep.subr.bf16.mxu1 %v11790_v3  ;;  %v12621_v37 = vpop.permute.xlu1 %12620  ;;  %v11798_v32 = vpack.c.bf16 %v3534_v4, %v3528_v15  ;;  %v12626_v43 = vpop.permute.xlu0 %12625  ;;  %v11543_v3 = vld [vmem:[%s15999_s3 + $0x30] sm:$0xff] }
 0x25b   :  { %v12623_v24 = vunpack.i.h.bf16 %v12621_v37  ;;  %v12622_v42 = vunpack.i.l.bf16 %v12621_v37  ;;  %v12628_v39 = vunpack.i.h.bf16 %v12626_v43  ;;  %v12627_v46 = vunpack.i.l.bf16 %v12626_v43 }
 0x25c   :  { %11532 = vmatmul.mubr.msk.f32.gmra.mrb[26].mxu1 %vm16020_vm5, %v14224_v63  ;;  %v3218_v63 = vsel %vm16069_vm13, %v12602_v12, %v12603_v11  ;;  %vm16078_vm13 = vmmov %vm16074_vm4 }
 0x25d   :  { %3178 = vmatprep.mubr.f32.mxu1 %v13379_v0  ;;  %v11794_v29 = vpack.c.bf16 %v3224_v28, %v3218_v63  ;;  %v3527_v47 = vsel %vm16075_vm9, %v12622_v42, %v12612_v31  ;;  %v3533_v56 = vsel %vm16076_vm11, %v12623_v24, %v12617_v7  ;;  %v3530_v51 = vsel %vm16078_vm13, %v12627_v46, %v12628_v39  ;;  %v11545_v28 = vld [vmem:[%s15999_s3 + $0x40] sm:$0xff]  ;;  %vm16084_vm11 = vmmov %vm16074_vm4 }
 0x25e   :  { %v12631_v20 = vpop.permute.xlu1 %12630  ;;  %v11800_v50 = vpack.c.bf16 %v3533_v56, %v3527_v47  ;;  %v12636_v55 = vpop.permute.xlu0 %12635  ;;  %v3529_v10 = vsel %vm16081_vm7, %v12613_v30, %v12627_v46  ;;  %vm16083_vm9 = vcmask 7168  }
 0x25f   :  { %v12633_v34 = vunpack.i.h.bf16 %v12631_v20  ;;  %v12632_v44 = vunpack.i.l.bf16 %v12631_v20  ;;  %v12638_v59 = vunpack.i.h.bf16 %v12636_v55  ;;  %v12637_v60 = vunpack.i.l.bf16 %v12636_v55  ;;  %vm16086_vm13 = vmmov %vm16083_vm9 }
 0x260   :  { %11533 = vmatmul.mubr.msk.f32.gmra.mrb[28].mxu1 %vm16020_vm5, %v14232_v19  ;;  %v2854_v19 = vld [vmem:[%s15999_s3 + $0x8] sm:$0xff] }
 0x261   :  { %3310 = vmatprep.mubr.f32.mxu1 %v13379_v0  ;;  %v3536_v58 = vsel %vm16077_vm12, %v12632_v44, %v12633_v34  ;;  %v3535_v62 = vsel %vm16079_vm14, %v12618_v33, %v12632_v44  ;;  %v3532_v12 = vsel %vm16082_vm15, %v12637_v60, %v12638_v59  ;;  %v3531_v30 = vsel %vm16084_vm11, %v12628_v39, %v12637_v60  ;;  %vm16085_vm12 = vmmov %vm16083_vm9  ;;  %v11556_v60 = vld [vmem:[%s15999_s3 + $0x50] sm:$0xff] }
 0x262   :  { %v11802_v52 = vpack.c.bf16 %v3536_v58, %v3530_v51  ;;  %v12641_v54 = vpop.permute.xlu1 %12640  ;;  %v11804_v11 = vpack.c.bf16 %v3535_v62, %v3529_v10  ;;  %v12646_v26 = vpop.permute.xlu0 %12645  ;;  %vm16087_vm14 = vmmov %vm16083_vm9  ;;  %v11557_v62 = vld [vmem:[%s15999_s3 + $0x58] sm:$0xff] }
 0x263   :  { %v12643_v61 = vunpack.i.h.bf16 %v12641_v54  ;;  %v12642_v57 = vunpack.i.l.bf16 %v12641_v54  ;;  %v11555_v54 = vld [vmem:[%s15999_s3 + $0x48] sm:$0xff] }
 0x264   :  { %11534 = vmatmul.mubr.msk.f32.vlgmr.msra.gmra.mrb[12].mxu1 %vm16020_vm5, %v2853_v17 }
 0x265   :  { %11793 = vmatpush1.bf16.msra.mxu1 %v11792_v2  ;;  %3316 = vmatprep.mubr.f32.mxu1 %v13379_v0  ;;  %v3538_v5 = vsel %vm16080_vm6, %v12642_v57, %v12643_v61  ;;  %v12648_v2 = vunpack.i.h.bf16 %v12646_v26  ;;  %vm16088_vm6 = vmmov %vm16083_vm9 }
 0x266   :  { %11795 = vmatprep.subr.bf16.mxu1 %v11794_v29  ;;  %v11806_v21 = vpack.c.bf16 %v3538_v5, %v3532_v12  ;;  %v12651_v1 = vpop.permute.xlu1 %12650  ;;  %v12647_v29 = vunpack.i.l.bf16 %v12646_v26  ;;  %v12656_v6 = vpop.permute.xlu0 %12655  ;;  %vm16089_vm7 = vmmov %vm16088_vm6 }
 0x267   :  { %v12652_v63 = vunpack.i.l.bf16 %v12651_v1  ;;  %v12658_v36 = vunpack.i.h.bf16 %v12656_v6  ;;  %v12657_v37 = vunpack.i.l.bf16 %v12656_v6  ;;  %vm16090_vm15 = vmmov %vm16088_vm6  ;;  %v16108_v6 = vmov 0 }
 0x268   :  { %11535 = vmatmul.mubr.msk.f32.gmra.mrb[14].mxu1 %vm16020_vm5, %v2854_v19  ;;  %v3860_v33 = vsel %vm16085_vm12, %v12647_v29, %v12648_v2 }
 0x269   :  { %3322 = vmatprep.mubr.f32.mxu1 %v13379_v0  ;;  %v3865_v20 = vsel %vm16086_vm13, %v12658_v36, %v12652_v63  ;;  %v3859_v24 = vsel %vm16087_vm14, %v12657_v37, %v12647_v29  ;;  %vm14371_vm14 = vmpackc.low %vm14024_vm2, %vm14024_vm2 }
 0x26a   :  { %v12666_v35 = vpop.permute.xlu0 %12665 }
 0x26c   :  { %11536 = vmatmul.mubr.msk.f32.gmra.mrb[16].mxu1 %vm16020_vm5, %v2855_v13 }
 0x26d   :  { %3393 = vmatprep.mubr.f32.mxu1 %v13379_v0 }
 0x26e   :  { %v12676_v46 = vpop.permute.xlu0 %12675 }
 0x26f   :  { %v12678_v58 = vunpack.i.h.bf16 %v12676_v46 }
 0x270   :  { %11537 = vmatmul.mubr.msk.f32.vlgmr.msra.gmra.mrb[18].mxu1 %vm16020_vm5, %v2853_v17 }
 0x271   :  { %11797 = vmatpush1.bf16.msra.mxu1 %v11796_v41  ;;  %3399 = vmatprep.mubr.f32.mxu1 %v13379_v0  ;;  %v12668_v41 = vunpack.i.h.bf16 %v12666_v35 }
 0x272   :  { %11799 = vmatprep.subr.bf16.mxu1 %v11798_v32  ;;  %v12667_v32 = vunpack.i.l.bf16 %v12666_v35 }
 0x274   :  { %11538 = vmatmul.mubr.msk.f32.gmra.mrb[20].mxu1 %vm16020_vm5, %v2854_v19  ;;  %v3868_v43 = vsel %vm16089_vm7, %v12667_v32, %v12668_v41  ;;  %vm14394_vm7 = vmpackc.low %vm14112_vm0, %vm14112_vm0 }
 0x275   :  { %3405 = vmatprep.mubr.f32.mxu1 %v13379_v0 }
 0x278   :  { %11539 = vmatmul.mubr.msk.f32.gmra.mrb[22].mxu1 %vm16020_vm5, %v2855_v13 }
 0x279   :  { %3476 = vmatprep.mubr.f32.mxu1 %v13379_v0 }
 0x27c   :  { %11540 = vmatmul.mubr.msk.f32.vlgmr.msra.gmra.mrb[24].mxu1 %vm16020_vm5, %v2853_v17  ;;  %v12653_v17 = vunpack.i.h.bf16 %v12651_v1  ;;  %v12686_v1 = vpop.permute.xlu0 %12685 }
 0x27d   :  { %11801 = vmatpush1.bf16.msra.mxu1 %v11800_v50  ;;  %3482 = vmatprep.mubr.f32.mxu1 %v13379_v0  ;;  %v12677_v50 = vunpack.i.l.bf16 %v12676_v46 }
 0x27e   :  { %11803 = vmatprep.subr.bf16.mxu1 %v11802_v52  ;;  %v3866_v14 = vsel %vm16083_vm9, %v12652_v63, %v12653_v17 }
 0x27f   :  { %v11810_v7 = vpack.c.bf16 %v3866_v14, %v3860_v33 }
 0x280   :  { %11541 = vmatmul.mubr.msk.f32.gmra.mrb[26].mxu1 %vm16020_vm5, %v2854_v19  ;;  %v3537_v19 = vsel %vm16074_vm4, %v12633_v34, %v12642_v57  ;;  %v11812_v34 = vpack.c.bf16 %v3865_v20, %v3859_v24  ;;  %vm16091_vm4 = vmmov %vm16088_vm6 }
 0x281   :  { %3488 = vmatprep.mubr.f32.mxu1 %v13379_v0  ;;  %v11808_v31 = vpack.c.bf16 %v3537_v19, %v3531_v30  ;;  %v3867_v52 = vsel %vm16091_vm4, %v12653_v17, %v12667_v32  ;;  %vm16092_vm9 = vmmov %vm16091_vm4 }
 0x282   :  { %vm16093_vm11 = vmmov %vm16091_vm4 }
 0x283   :  { %v3870_v61 = vsel %vm16093_vm11, %v12677_v50, %v12678_v58  ;;  %vm16094_vm12 = vmmov %vm16091_vm4 }
 0x284   :  { %11542 = vmatmul.mubr.msk.f32.gmra.mrb[28].mxu1 %vm16020_vm5, %v2855_v13  ;;  %v12661_v13 = vpop.permute.xlu1 %12660  ;;  %vm16095_vm13 = vmmov %vm16091_vm4 }
 0x285   :  { %3624 = vmatprep.mubr.f32.mxu1 %v13379_v0  ;;  %v12663_v15 = vunpack.i.h.bf16 %v12661_v13  ;;  %v12662_v4 = vunpack.i.l.bf16 %v12661_v13  ;;  %v3869_v5 = vsel %vm16095_vm13, %v12668_v41, %v12677_v50  ;;  %vm14423_vm4 = vmpackc.low %vm14066_vm1, %vm14066_vm1 }
 0x287   :  { %v3862_v42 = vsel %vm16088_vm6, %v12662_v4, %v12663_v15  ;;  %v3861_v51 = vsel %vm16090_vm15, %v12648_v2, %v12662_v4  ;;  %vm14387_vm6 = vmpackc.low %vm14014_vm3, %vm14014_vm3  ;;  %v12687_v2 = vunpack.i.l.bf16 %v12686_v1 }
 0x288   :  { %11546 = vmatmul.mubr.msk.f32.vlgmr.msra.gmra.mrb[12].mxu1 %vm16020_vm5, %v11543_v3  ;;  %v11814_v44 = vpack.c.bf16 %v3868_v43, %v3862_v42  ;;  %v12671_v39 = vpop.permute.xlu1 %12670  ;;  %v11816_v57 = vpack.c.bf16 %v3867_v52, %v3861_v51  ;;  %vm14416_vm15 = vmpackc.low %vm14101_vm10, %vm14101_vm10 }
 0x289   :  { %11805 = vmatpush1.bf16.msra.mxu1 %v11804_v11  ;;  %3630 = vmatprep.mubr.f32.mxu1 %v13379_v0  ;;  %v12673_v47 = vunpack.i.h.bf16 %v12671_v39  ;;  %v12672_v56 = vunpack.i.l.bf16 %v12671_v39 }
 0x28a   :  { %11807 = vmatprep.subr.bf16.mxu1 %v11806_v21  ;;  %v11567_v21 = vld [vmem:[%s15999_s3 + $0x60] sm:$0xff] }
 0x28b   :  { %v3864_v55 = vsel %vm16092_vm9, %v12672_v56, %v12673_v47  ;;  %vm16106_vm9 = vcmask 1039360   ;;  %v11579_v47 = vld [vmem:[%s15999_s3 + $0x78] sm:$0xff] }
 0x28c   :  { %11547 = vmatmul.mubr.msk.f32.gmra.mrb[14].mxu1 %vm16020_vm5, %v11544_v25  ;;  %v11818_v59 = vpack.c.bf16 %v3870_v61, %v3864_v55  ;;  %v12681_v26 = vpop.permute.xlu1 %12680  ;;  %vm16107_vm11 = vmmov %vm16106_vm9 }
 0x28d   :  { %3636 = vmatprep.mubr.f32.mxu1 %v13379_v0  ;;  %v12683_v17 = vunpack.i.h.bf16 %v12681_v26  ;;  %v12682_v63 = vunpack.i.l.bf16 %v12681_v26  ;;  %vm16110_vm13 = vmmov %vm16106_vm9 }
 0x28f   :  { %v4500_v19 = vsel %vm16106_vm9, %v12682_v63, %v12683_v17 }
 0x290   :  { %11548 = vmatmul.mubr.msk.f32.gmra.mrb[16].mxu1 %vm16020_vm5, %v11545_v28  ;;  %v12691_v29 = vpop.permute.xlu1 %12690 }
 0x291   :  { %3707 = vmatprep.mubr.f32.mxu1 %v13379_v0  ;;  %v12692_v33 = vunpack.i.l.bf16 %v12691_v29 }
 0x294   :  { %11549 = vmatmul.mubr.msk.f32.vlgmr.msra.gmra.mrb[18].mxu1 %vm16020_vm5, %v11543_v3  ;;  %v12701_v30 = vpop.permute.xlu1 %12700 }
 0x295   :  { %11809 = vmatpush1.bf16.msra.mxu1 %v11808_v31  ;;  %3713 = vmatprep.mubr.f32.mxu1 %v13379_v0  ;;  %v12693_v31 = vunpack.i.h.bf16 %v12691_v29  ;;  %v12703_v13 = vunpack.i.h.bf16 %v12701_v30  ;;  %v12702_v35 = vunpack.i.l.bf16 %v12701_v30 }
 0x296   :  { %11811 = vmatprep.subr.bf16.mxu1 %v11810_v7  ;;  %v12696_v7 = vpop.permute.xlu0 %12695 }
 0x297   :  { %v12698_v36 = vunpack.i.h.bf16 %v12696_v7  ;;  %v12697_v37 = vunpack.i.l.bf16 %v12696_v7  ;;  %v4505_v4 = vsel %vm16106_vm9, %v12693_v31, %v12687_v2 }
 0x298   :  { %11550 = vmatmul.mubr.msk.f32.gmra.mrb[20].mxu1 %vm16020_vm5, %v11544_v25  ;;  %v12711_v24 = vpop.permute.xlu1 %12710 }
 0x299   :  { %3719 = vmatprep.mubr.f32.mxu1 %v13379_v0  ;;  %v12713_v43 = vunpack.i.h.bf16 %v12711_v24  ;;  %v4501_v58 = vsel %vm16106_vm9, %v12683_v17, %v12697_v37 }
 0x29a   :  { %v12706_v42 = vpop.permute.xlu0 %12705 }
 0x29b   :  { %v12707_v39 = vunpack.i.l.bf16 %v12706_v42 }
 0x29c   :  { %11551 = vmatmul.mubr.msk.f32.gmra.mrb[22].mxu1 %vm16020_vm5, %v11545_v28  ;;  %v12721_v61 = vpop.permute.xlu1 %12720 }
 0x29d   :  { %3790 = vmatprep.mubr.f32.mxu1 %v13379_v0 }
 0x29e   :  { %v12716_v55 = vpop.permute.xlu0 %12715 }
 0x2a0   :  { %11552 = vmatmul.mubr.msk.f32.vlgmr.msra.gmra.mrb[24].mxu1 %vm16020_vm5, %v11543_v3  ;;  %v3863_v3 = vsel %vm16094_vm12, %v12663_v15, %v12672_v56  ;;  %vm14450_vm12 = vmpackc.low %vm14057_vm8, %vm14057_vm8  ;;  %v4499_v15 = vsel %vm16110_vm13, %v12692_v33, %v12682_v63  ;;  %v12731_v63 = vpop.permute.xlu1 %12730 }
 0x2a1   :  { %11813 = vmatpush1.bf16.msra.mxu1 %v11812_v34  ;;  %3796 = vmatprep.mubr.f32.mxu1 %v13379_v0  ;;  %v11820_v10 = vpack.c.bf16 %v3869_v5, %v3863_v3  ;;  %v16109_v6 = vsel %vm14450_vm12, 4294967295, %v16108_v6  ;;  %v11842_v41 = vpack.c.bf16 %v4505_v4, %v4499_v15  ;;  %v12712_v34 = vunpack.i.l.bf16 %v12711_v24  ;;  %vm16113_vm13 = vmmov %vm16106_vm9  ;;  %v11591_v24 = vld [vmem:[%s15999_s3 + $0x90] sm:$0xff] }
 0x2a2   :  { %11815 = vmatprep.subr.bf16.mxu1 %v11814_v44  ;;  %v12708_v44 = vunpack.i.h.bf16 %v12706_v42  ;;  %v12717_v3 = vunpack.i.l.bf16 %v12716_v55  ;;  %v12733_v29 = vunpack.i.h.bf16 %v12731_v63 }
 0x2a4   :  { %11553 = vmatmul.mubr.msk.f32.gmra.mrb[26].mxu1 %vm16020_vm5, %v11544_v25  ;;  %v11568_v25 = vld [vmem:[%s15999_s3 + $0x68] sm:$0xff] }
 0x2a5   :  { %3802 = vmatprep.mubr.f32.mxu1 %v13379_v0 }
 0x2a8   :  { %11554 = vmatmul.mubr.msk.f32.gmra.mrb[28].mxu1 %vm16020_vm5, %v11545_v28  ;;  %v12688_v28 = vunpack.i.h.bf16 %v12686_v1 }
 0x2a9   :  { %3956 = vmatprep.mubr.f32.mxu1 %v13379_v0 }
 0x2aa   :  { %v4507_v46 = vsel %vm16113_vm13, %v12688_v28, %v12702_v35  ;;  %vm16116_vm13 = vmmov %vm16106_vm9 }
 0x2ab   :  { %v11846_v50 = vpack.c.bf16 %v4507_v46, %v4501_v58  ;;  %v4509_v5 = vsel %vm16116_vm13, %v12703_v13, %v12712_v34 }
 0x2ac   :  { %11558 = vmatmul.mubr.msk.f32.vlgmr.msra.gmra.mrb[12].mxu1 %vm16020_vm5, %v11555_v54 }
 0x2ad   :  { %11817 = vmatpush1.bf16.msra.mxu1 %v11816_v57  ;;  %3962 = vmatprep.mubr.f32.mxu1 %v13379_v0  ;;  %v12723_v57 = vunpack.i.h.bf16 %v12721_v61 }
 0x2ae   :  { %11819 = vmatprep.subr.bf16.mxu1 %v11818_v59  ;;  %v12722_v59 = vunpack.i.l.bf16 %v12721_v61 }
 0x2b0   :  { %11559 = vmatmul.mubr.msk.f32.gmra.mrb[14].mxu1 %vm16020_vm5, %v11556_v60 }
 0x2b1   :  { %3968 = vmatprep.mubr.f32.mxu1 %v13379_v0 }
 0x2b4   :  { %11560 = vmatmul.mubr.msk.f32.gmra.mrb[16].mxu1 %vm16020_vm5, %v11557_v62 }
 0x2b5   :  { %4039 = vmatprep.mubr.f32.mxu1 %v13379_v0 }
 0x2b8   :  { %11561 = vmatmul.mubr.msk.f32.vlgmr.msra.gmra.mrb[18].mxu1 %vm16020_vm5, %v11555_v54 }
 0x2b9   :  { %11821 = vmatpush1.bf16.msra.mxu1 %v11820_v10  ;;  %4045 = vmatprep.mubr.f32.mxu1 %v13379_v0  ;;  %v12726_v10 = vpop.permute.xlu0 %12725 }
 0x2ba   :  { %11824 = vmatprep.subr.msk.bf16.mxu1 %vm14371_vm14, %v14089_v9 }
 0x2bc   :  { %11562 = vmatmul.mubr.msk.f32.gmra.mrb[20].mxu1 %vm16020_vm5, %v11556_v60 }
 0x2bd   :  { %4051 = vmatprep.mubr.f32.mxu1 %v13379_v0 }
 0x2c0   :  { %11563 = vmatmul.mubr.msk.f32.gmra.mrb[22].mxu1 %vm16020_vm5, %v11557_v62 }
 0x2c1   :  { %4122 = vmatprep.mubr.f32.mxu1 %v13379_v0 }
 0x2c4   :  { %11564 = vmatmul.mubr.msk.f32.vlgmr.msra.gmra.mrb[24].mxu1 %vm16020_vm5, %v11555_v54  ;;  %v11580_v54 = vld [vmem:[%s15999_s3 + $0x80] sm:$0xff] }
 0x2c5   :  { %11827 = vmatpush1.bf16.msk.msra.mxu1 %vm14387_vm6, %v14051_v48  ;;  %4128 = vmatprep.mubr.f32.mxu1 %v13379_v0  ;;  %v16102_v48 = vmov 0 }
 0x2c6   :  { %11830 = vmatprep.subr.msk.bf16.mxu1 %vm14394_vm7, %v14130_v18  ;;  %v16103_v48 = vsel %vm14416_vm15, 4294967295, %v16102_v48  ;;  %v16104_v18 = vmov 0 }
 0x2c7   :  { %v16105_v18 = vsel %vm14423_vm4, 4294967295, %v16104_v18 }
 0x2c8   :  { %11565 = vmatmul.mubr.msk.f32.gmra.mrb[26].mxu1 %vm16020_vm5, %v11556_v60  ;;  %v11581_v60 = vld [vmem:[%s15999_s3 + $0x88] sm:$0xff] }
 0x2c9   :  { %4134 = vmatprep.mubr.f32.mxu1 %v13379_v0 }
 0x2cc   :  { %11566 = vmatmul.mubr.msk.f32.gmra.mrb[28].mxu1 %vm16020_vm5, %v11557_v62  ;;  %v12718_v62 = vunpack.i.h.bf16 %v12716_v55 }
 0x2cd   :  { %4236 = vmatprep.mubr.f32.mxu1 %v13379_v0 }
 0x2d0   :  { %11570 = vmatmul.mubr.msk.f32.vlgmr.msra.gmra.mrb[12].mxu1 %vm16020_vm5, %v11567_v21 }
 0x2d1   :  { %11833 = vmatpush1.bf16.msk.msra.mxu1 %vm14416_vm15, %v14125_v40  ;;  %4242 = vmatprep.mubr.f32.mxu1 %v13379_v0  ;;  %v11569_v40 = vld [vmem:[%s15999_s3 + $0x70] sm:$0xff] }
 0x2d2   :  { %11836 = vmatprep.subr.msk.bf16.mxu1 %vm14423_vm4, %v14108_v16  ;;  %v4506_v16 = vsel %vm16107_vm11, %v12687_v2, %v12688_v28  ;;  %vm16111_vm11 = vmmov %vm16106_vm9  ;;  %v12736_v28 = vpop.permute.xlu0 %12735  ;;  %v12728_v2 = vunpack.i.h.bf16 %v12726_v10 }
 0x2d3   :  { %v11840_v14 = vpack.c.bf16 %v4506_v16, %v4500_v19  ;;  %v12732_v19 = vunpack.i.l.bf16 %v12731_v63  ;;  %v12738_v16 = vunpack.i.h.bf16 %v12736_v28 }
 0x2d4   :  { %11571 = vmatmul.mubr.msk.f32.gmra.mrb[14].mxu1 %vm16020_vm5, %v11568_v25 }
 0x2d5   :  { %4248 = vmatprep.mubr.f32.mxu1 %v13379_v0 }
 0x2d8   :  { %11572 = vmatmul.mubr.msk.f32.gmra.mrb[16].mxu1 %vm16020_vm5, %v11569_v40 }
 0x2d9   :  { %4319 = vmatprep.mubr.f32.mxu1 %v13379_v0 }
 0x2dc   :  { %11573 = vmatmul.mubr.msk.f32.vlgmr.msra.gmra.mrb[18].mxu1 %vm16020_vm5, %v11567_v21 }
 0x2dd   :  { %11839 = vmatpush1.bf16.msk.msra.mxu1 %vm14450_vm12, %v14097_v22  ;;  %4325 = vmatprep.mubr.f32.mxu1 %v13379_v0  ;;  %v4508_v22 = vsel %vm16111_vm11, %v12702_v35, %v12703_v13  ;;  %vm16112_vm12 = vmmov %vm16106_vm9 }
 0x2de   :  { %11841 = vmatprep.subr.bf16.mxu1 %v11840_v14  ;;  %v4502_v32 = vsel %vm16112_vm12, %v12697_v37, %v12698_v36  ;;  %vm16114_vm12 = vmmov %vm16106_vm9  ;;  %v12737_v14 = vunpack.i.l.bf16 %v12736_v28  ;;  %v12746_v37 = vpop.permute.xlu0 %12745 }
 0x2df   :  { %v11844_v20 = vpack.c.bf16 %v4508_v22, %v4502_v32  ;;  %v4510_v56 = vsel %vm16114_vm12, %v12712_v34, %v12713_v43  ;;  %vm16115_vm11 = vmmov %vm16106_vm9  ;;  %vm16117_vm12 = vcmask 908288   ;;  %v12748_v22 = vunpack.i.h.bf16 %v12746_v37 }
 0x2e0   :  { %11574 = vmatmul.mubr.msk.f32.gmra.mrb[20].mxu1 %vm16020_vm5, %v11568_v25  ;;  %v4504_v51 = vsel %vm16115_vm11, %v12707_v39, %v12708_v44  ;;  %vm16118_vm11 = vmmov %vm16117_vm12 }
 0x2e1   :  { %4331 = vmatprep.mubr.f32.mxu1 %v13379_v0  ;;  %v11848_v52 = vpack.c.bf16 %v4510_v56, %v4504_v51  ;;  %v4832_v1 = vsel %vm16118_vm11, %v12717_v3, %v12718_v62  ;;  %vm16119_vm13 = vmmov %vm16118_vm11 }
 0x2e2   :  { %v4837_v30 = vsel %vm16119_vm13, %v12728_v2, %v12722_v59 }
 0x2e4   :  { %11575 = vmatmul.mubr.msk.f32.gmra.mrb[22].mxu1 %vm16020_vm5, %v11569_v40 }
 0x2e5   :  { %4402 = vmatprep.mubr.f32.mxu1 %v13379_v0 }
 0x2e8   :  { %11576 = vmatmul.mubr.msk.f32.vlgmr.msra.gmra.mrb[24].mxu1 %vm16020_vm5, %v11567_v21  ;;  %v4838_v21 = vsel %vm16117_vm12, %v12722_v59, %v12723_v57  ;;  %vm16120_vm12 = vmmov %vm16118_vm11 }
 0x2e9   :  { %11843 = vmatpush1.bf16.msra.mxu1 %v11842_v41  ;;  %4408 = vmatprep.mubr.f32.mxu1 %v13379_v0  ;;  %v11852_v17 = vpack.c.bf16 %v4838_v21, %v4832_v1  ;;  %v12747_v41 = vunpack.i.l.bf16 %v12746_v37 }
 0x2ea   :  { %11845 = vmatprep.subr.bf16.mxu1 %v11844_v20 }
 0x2ec   :  { %11577 = vmatmul.mubr.msk.f32.gmra.mrb[26].mxu1 %vm16020_vm5, %v11568_v25  ;;  %v4503_v25 = vsel %vm16106_vm9, %v12698_v36, %v12707_v39  ;;  %vm16121_vm9 = vmmov %vm16118_vm11  ;;  %v12741_v36 = vpop.permute.xlu1 %12740  ;;  %v11592_v39 = vld [vmem:[%s15999_s3 + $0x98] sm:$0xff] }
 0x2ed   :  { %4414 = vmatprep.mubr.f32.mxu1 %v13379_v0  ;;  %v11850_v26 = vpack.c.bf16 %v4509_v5, %v4503_v25  ;;  %v4834_v33 = vsel %vm16121_vm9, %v12732_v19, %v12733_v29  ;;  %vm16122_vm11 = vmmov %vm16121_vm9  ;;  %v12743_v15 = vunpack.i.h.bf16 %v12741_v36  ;;  %v12742_v4 = vunpack.i.l.bf16 %v12741_v36 }
 0x2ee   :  { %v4840_v7 = vsel %vm16122_vm11, %v12737_v14, %v12738_v16  ;;  %vm16123_vm13 = vmmov %vm16121_vm9 }
 0x2ef   :  { %v11856_v35 = vpack.c.bf16 %v4840_v7, %v4834_v33  ;;  %v4833_v32 = vsel %vm16123_vm13, %v12718_v62, %v12732_v19  ;;  %v4836_v42 = vsel %vm16121_vm9, %v12742_v4, %v12743_v15  ;;  %vm16125_vm11 = vmmov %vm16121_vm9 }
 0x2f0   :  { %11578 = vmatmul.mubr.msk.f32.gmra.mrb[28].mxu1 %vm16020_vm5, %v11569_v40  ;;  %v12727_v40 = vunpack.i.l.bf16 %v12726_v10  ;;  %v4842_v43 = vsel %vm16125_vm11, %v12747_v41, %v12748_v22  ;;  %v12751_v46 = vpop.permute.xlu1 %12750  ;;  %vm16126_vm13 = vmmov %vm16121_vm9 }
 0x2f1   :  { %4596 = vmatprep.mubr.f32.mxu1 %v13379_v0  ;;  %v11860_v44 = vpack.c.bf16 %v4842_v43, %v4836_v42  ;;  %v12753_v56 = vunpack.i.h.bf16 %v12751_v46  ;;  %v12752_v58 = vunpack.i.l.bf16 %v12751_v46  ;;  %v11605_v43 = vld [vmem:[%s15999_s3 + $0xb8] sm:$0xff] }
 0x2f2   :  { %v4831_v31 = vsel %vm16120_vm12, %v12727_v40, %v12717_v3  ;;  %vm16124_vm12 = vmmov %vm16121_vm9 }
 0x2f3   :  { %v11854_v13 = vpack.c.bf16 %v4837_v30, %v4831_v31  ;;  %v4839_v20 = vsel %vm16124_vm12, %v12723_v57, %v12737_v14  ;;  %vm16127_vm12 = vmmov %vm16121_vm9  ;;  %vm16128_vm9 = vcmask 900096  }
 0x2f4   :  { %11582 = vmatmul.mubr.msk.f32.vlgmr.msra.gmra.mrb[12].mxu1 %vm16020_vm5, %v11579_v47  ;;  %v11858_v34 = vpack.c.bf16 %v4839_v20, %v4833_v32  ;;  %v4841_v55 = vsel %vm16127_vm12, %v12738_v16, %v12747_v41  ;;  %v12761_v61 = vpop.permute.xlu1 %12760  ;;  %v5164_v57 = vsel %vm16128_vm9, %v12752_v58, %v12753_v56  ;;  %vm16129_vm11 = vmmov %vm16128_vm9  ;;  %v11604_v41 = vld [vmem:[%s15999_s3 + $0xb0] sm:$0xff] }
 0x2f5   :  { %11847 = vmatpush1.bf16.msra.mxu1 %v11846_v50  ;;  %4602 = vmatprep.mubr.f32.mxu1 %v13379_v0  ;;  %v12763_v5 = vunpack.i.h.bf16 %v12761_v61  ;;  %v12762_v10 = vunpack.i.l.bf16 %v12761_v61  ;;  %vm16131_vm12 = vmmov %vm16128_vm9 }
 0x2f6   :  { %11849 = vmatprep.subr.bf16.mxu1 %v11848_v52  ;;  %v11593_v52 = vld [vmem:[%s15999_s3 + $0xa0] sm:$0xff] }
 0x2f8   :  { %11583 = vmatmul.mubr.msk.f32.gmra.mrb[14].mxu1 %vm16020_vm5, %v11580_v54  ;;  %v12771_v3 = vpop.permute.xlu1 %12770 }
 0x2f9   :  { %4608 = vmatprep.mubr.f32.mxu1 %v13379_v0  ;;  %v12773_v25 = vunpack.i.h.bf16 %v12771_v3 }
 0x2fc   :  { %11584 = vmatmul.mubr.msk.f32.gmra.mrb[16].mxu1 %vm16020_vm5, %v11581_v60  ;;  %v12781_v16 = vpop.permute.xlu1 %12780 }
 0x2fd   :  { %4679 = vmatprep.mubr.f32.mxu1 %v13379_v0  ;;  %v12783_v30 = vunpack.i.h.bf16 %v12781_v16  ;;  %v12782_v31 = vunpack.i.l.bf16 %v12781_v16  ;;  %v11615_v16 = vld [vmem:[%s15999_s3 + $0xc0] sm:$0xff] }
 0x300   :  { %11585 = vmatmul.mubr.msk.f32.vlgmr.msra.gmra.mrb[18].mxu1 %vm16020_vm5, %v11579_v47  ;;  %v12791_v20 = vpop.permute.xlu1 %12790 }
 0x301   :  { %11851 = vmatpush1.bf16.msra.mxu1 %v11850_v26  ;;  %4685 = vmatprep.mubr.f32.mxu1 %v13379_v0  ;;  %v12772_v26 = vunpack.i.l.bf16 %v12771_v3  ;;  %v12792_v42 = vunpack.i.l.bf16 %v12791_v20 }
 0x302   :  { %11853 = vmatprep.subr.bf16.mxu1 %v11852_v17 }
 0x303   :  { %v5172_v2 = vsel %vm16128_vm9, %v12772_v26, %v12773_v25 }
 0x304   :  { %11586 = vmatmul.mubr.msk.f32.gmra.mrb[20].mxu1 %vm16020_vm5, %v11580_v54 }
 0x305   :  { %4691 = vmatprep.mubr.f32.mxu1 %v13379_v0 }
 0x308   :  { %11587 = vmatmul.mubr.msk.f32.gmra.mrb[22].mxu1 %vm16020_vm5, %v11581_v60 }
 0x309   :  { %4762 = vmatprep.mubr.f32.mxu1 %v13379_v0 }
 0x30c   :  { %11588 = vmatmul.mubr.msk.f32.vlgmr.msra.gmra.mrb[24].mxu1 %vm16020_vm5, %v11579_v47  ;;  %v12756_v47 = vpop.permute.xlu0 %12755 }
 0x30d   :  { %11855 = vmatpush1.bf16.msra.mxu1 %v11854_v13  ;;  %4768 = vmatprep.mubr.f32.mxu1 %v13379_v0  ;;  %v12758_v50 = vunpack.i.h.bf16 %v12756_v47  ;;  %v12757_v51 = vunpack.i.l.bf16 %v12756_v47 }
 0x30e   :  { %11857 = vmatprep.subr.bf16.mxu1 %v11856_v35  ;;  %v11603_v35 = vld [vmem:[%s15999_s3 + $0xa8] sm:$0xff] }
 0x30f   :  { %v5170_v59 = vsel %vm16129_vm11, %v12757_v51, %v12758_v50  ;;  %v5169_v28 = vsel %vm16131_vm12, %v12763_v5, %v12757_v51  ;;  %vm16132_vm11 = vmmov %vm16128_vm9 }
 0x310   :  { %11589 = vmatmul.mubr.msk.f32.gmra.mrb[26].mxu1 %vm16020_vm5, %v11580_v54  ;;  %v4835_v54 = vsel %vm16126_vm13, %v12733_v29, %v12742_v4  ;;  %v11864_v62 = vpack.c.bf16 %v5170_v59, %v5164_v57  ;;  %v12766_v21 = vpop.permute.xlu0 %12765  ;;  %vm16130_vm13 = vmmov %vm16128_vm9 }
 0x311   :  { %4774 = vmatprep.mubr.f32.mxu1 %v13379_v0  ;;  %v12768_v1 = vunpack.i.h.bf16 %v12766_v21  ;;  %v12767_v17 = vunpack.i.l.bf16 %v12766_v21  ;;  %v5163_v63 = vsel %vm16130_vm13, %v12762_v10, %v12752_v58  ;;  %vm16133_vm13 = vmmov %vm16128_vm9 }
 0x312   :  { %v11866_v40 = vpack.c.bf16 %v5169_v28, %v5163_v63  ;;  %v5171_v13 = vsel %vm16133_vm13, %v12758_v50, %v12772_v26  ;;  %vm16134_vm12 = vmmov %vm16128_vm9 }
 0x313   :  { %v5166_v29 = vsel %vm16132_vm11, %v12767_v17, %v12768_v1  ;;  %v5174_v36 = vsel %vm16134_vm12, %v12782_v31, %v12783_v30  ;;  %v5165_v37 = vsel %vm16128_vm9, %v12753_v56, %v12767_v17  ;;  %vm16135_vm11 = vmmov %vm16128_vm9  ;;  %vm16137_vm12 = vcmask 891904  }
 0x314   :  { %11590 = vmatmul.mubr.msk.f32.gmra.mrb[28].mxu1 %vm16020_vm5, %v11581_v60  ;;  %v11862_v60 = vpack.c.bf16 %v4841_v55, %v4835_v54  ;;  %v11868_v19 = vpack.c.bf16 %v5172_v2, %v5166_v29  ;;  %v12776_v14 = vpop.permute.xlu0 %12775  ;;  %v11870_v15 = vpack.c.bf16 %v5171_v13, %v5165_v37  ;;  %vm16136_vm13 = vmmov %vm16128_vm9  ;;  %v11617_v13 = vld [vmem:[%s15999_s3 + $0xd0] sm:$0xff] }
 0x315   :  { %4928 = vmatprep.mubr.f32.mxu1 %v13379_v0  ;;  %v12778_v33 = vunpack.i.h.bf16 %v12776_v14  ;;  %v12777_v7 = vunpack.i.l.bf16 %v12776_v14 }
 0x317   :  { %v5168_v4 = vsel %vm16135_vm11, %v12777_v7, %v12778_v33  ;;  %v5167_v56 = vsel %vm16128_vm9, %v12768_v1, %v12777_v7  ;;  %vm16138_vm11 = vmmov %vm16137_vm12  ;;  %v11616_v7 = vld [vmem:[%s15999_s3 + $0xc8] sm:$0xff] }
 0x318   :  { %11594 = vmatmul.mubr.msk.f32.vlgmr.msra.gmra.mrb[12].mxu1 %vm16020_vm5, %v11591_v24  ;;  %v11872_v22 = vpack.c.bf16 %v5174_v36, %v5168_v4  ;;  %v12786_v32 = vpop.permute.xlu0 %12785  ;;  %vm16141_vm9 = vmmov %vm16138_vm11 }
 0x319   :  { %11859 = vmatpush1.bf16.msra.mxu1 %v11858_v34  ;;  %4934 = vmatprep.mubr.f32.mxu1 %v13379_v0  ;;  %v12788_v34 = vunpack.i.h.bf16 %v12786_v32 }
 0x31a   :  { %11861 = vmatprep.subr.bf16.mxu1 %v11860_v44  ;;  %v12787_v44 = vunpack.i.l.bf16 %v12786_v32 }
 0x31c   :  { %11595 = vmatmul.mubr.msk.f32.gmra.mrb[14].mxu1 %vm16020_vm5, %v11592_v39  ;;  %v12796_v46 = vpop.permute.xlu0 %12795  ;;  %v5496_v50 = vsel %vm16138_vm11, %v12787_v44, %v12788_v34 }
 0x31d   :  { %4940 = vmatprep.mubr.f32.mxu1 %v13379_v0  ;;  %v12798_v55 = vunpack.i.h.bf16 %v12796_v46  ;;  %v12797_v61 = vunpack.i.l.bf16 %v12796_v46 }
 0x320   :  { %11596 = vmatmul.mubr.msk.f32.gmra.mrb[16].mxu1 %vm16020_vm5, %v11593_v52  ;;  %v12806_v54 = vpop.permute.xlu0 %12805 }
 0x321   :  { %5011 = vmatprep.mubr.f32.mxu1 %v13379_v0 }
 0x324   :  { %11597 = vmatmul.mubr.msk.f32.vlgmr.msra.gmra.mrb[18].mxu1 %vm16020_vm5, %v11591_v24  ;;  %v12816_v17 = vpop.permute.xlu0 %12815 }
 0x325   :  { %11863 = vmatpush1.bf16.msra.mxu1 %v11862_v60  ;;  %5017 = vmatprep.mubr.f32.mxu1 %v13379_v0  ;;  %v12808_v60 = vunpack.i.h.bf16 %v12806_v54  ;;  %v12818_v2 = vunpack.i.h.bf16 %v12816_v17 }
 0x326   :  { %11865 = vmatprep.subr.bf16.mxu1 %v11864_v62  ;;  %v12807_v62 = vunpack.i.l.bf16 %v12806_v54 }
 0x328   :  { %11598 = vmatmul.mubr.msk.f32.gmra.mrb[20].mxu1 %vm16020_vm5, %v11592_v39 }
 0x329   :  { %5023 = vmatprep.mubr.f32.mxu1 %v13379_v0 }
 0x32c   :  { %11599 = vmatmul.mubr.msk.f32.gmra.mrb[22].mxu1 %vm16020_vm5, %v11593_v52 }
 0x32d   :  { %5094 = vmatprep.mubr.f32.mxu1 %v13379_v0 }
 0x330   :  { %11600 = vmatmul.mubr.msk.f32.vlgmr.msra.gmra.mrb[24].mxu1 %vm16020_vm5, %v11591_v24  ;;  %v12793_v24 = vunpack.i.h.bf16 %v12791_v20 }
 0x331   :  { %11867 = vmatpush1.bf16.msra.mxu1 %v11866_v40  ;;  %5100 = vmatprep.mubr.f32.mxu1 %v13379_v0  ;;  %v12817_v40 = vunpack.i.l.bf16 %v12816_v17 }
 0x332   :  { %11869 = vmatprep.subr.bf16.mxu1 %v11868_v19  ;;  %v5502_v47 = vsel %vm16137_vm12, %v12792_v42, %v12793_v24  ;;  %vm16140_vm12 = vmmov %vm16138_vm11 }
 0x333   :  { %v11876_v51 = vpack.c.bf16 %v5502_v47, %v5496_v50  ;;  %v5495_v5 = vsel %vm16140_vm12, %v12797_v61, %v12787_v44  ;;  %vm16144_vm12 = vmmov %vm16141_vm9 }
 0x334   :  { %11601 = vmatmul.mubr.msk.f32.gmra.mrb[26].mxu1 %vm16020_vm5, %v11592_v39  ;;  %v5173_v39 = vsel %vm16136_vm13, %v12773_v25, %v12782_v31  ;;  %vm16139_vm13 = vmmov %vm16138_vm11  ;;  %v5503_v19 = vsel %vm16144_vm12, %v12793_v24, %v12807_v62  ;;  %v14630_v24 = vpop.permute.xlu0 %5805 }
 0x335   :  { %5106 = vmatprep.mubr.f32.mxu1 %v13379_v0  ;;  %v11874_v58 = vpack.c.bf16 %v5173_v39, %v5167_v56  ;;  %v5501_v3 = vsel %vm16139_vm13, %v12798_v55, %v12792_v42  ;;  %vm16142_vm11 = vmmov %vm16141_vm9 }
 0x336   :  { %v5504_v21 = vsel %vm16142_vm11, %v12807_v62, %v12808_v60  ;;  %v11878_v25 = vpack.c.bf16 %v5501_v3, %v5495_v5  ;;  %vm16143_vm13 = vmmov %vm16141_vm9 }
 0x337   :  { %vm16145_vm11 = vmmov %vm16141_vm9 }
 0x338   :  { %11602 = vmatmul.mubr.msk.f32.gmra.mrb[28].mxu1 %vm16020_vm5, %v11593_v52  ;;  %v12801_v52 = vpop.permute.xlu1 %12800  ;;  %v5506_v30 = vsel %vm16145_vm11, %v12817_v40, %v12818_v2  ;;  %vm16147_vm12 = vmmov %vm16141_vm9 }
 0x339   :  { %5260 = vmatprep.mubr.f32.mxu1 %v13379_v0  ;;  %v12803_v57 = vunpack.i.h.bf16 %v12801_v52  ;;  %v12802_v59 = vunpack.i.l.bf16 %v12801_v52  ;;  %v5505_v36 = vsel %vm16147_vm12, %v12808_v60, %v12817_v40 }
 0x33b   :  { %v5498_v10 = vsel %vm16141_vm9, %v12802_v59, %v12803_v57  ;;  %v5497_v29 = vsel %vm16143_vm13, %v12788_v34, %v12802_v59  ;;  %vm16146_vm13 = vmmov %vm16141_vm9 }
 0x33c   :  { %11606 = vmatmul.mubr.msk.f32.vlgmr.msra.gmra.mrb[12].mxu1 %vm16020_vm5, %v11603_v35  ;;  %v11880_v26 = vpack.c.bf16 %v5504_v21, %v5498_v10  ;;  %v12811_v1 = vpop.permute.xlu1 %12810  ;;  %v11882_v31 = vpack.c.bf16 %v5503_v19, %v5497_v29 }
 0x33d   :  { %11871 = vmatpush1.bf16.msra.mxu1 %v11870_v15  ;;  %5266 = vmatprep.mubr.f32.mxu1 %v13379_v0  ;;  %v12813_v63 = vunpack.i.h.bf16 %v12811_v1  ;;  %v12812_v28 = vunpack.i.l.bf16 %v12811_v1 }
 0x33e   :  { %11873 = vmatprep.subr.bf16.mxu1 %v11872_v22 }
 0x33f   :  { %v5500_v14 = vsel %vm16141_vm9, %v12812_v28, %v12813_v63  ;;  %vm16149_vm9 = vcmask 146432  }
 0x340   :  { %11607 = vmatmul.mubr.msk.f32.gmra.mrb[14].mxu1 %vm16020_vm5, %v11604_v41  ;;  %v11884_v33 = vpack.c.bf16 %v5506_v30, %v5500_v14  ;;  %v14626_v15 = vpop.permute.xlu1 %5800  ;;  %vm16150_vm11 = vmmov %vm16149_vm9 }
 0x341   :  { %5272 = vmatprep.mubr.f32.mxu1 %v13379_v0  ;;  %vm16152_vm12 = vmmov %vm16149_vm9 }
 0x344   :  { %11608 = vmatmul.mubr.msk.f32.gmra.mrb[16].mxu1 %vm16020_vm5, %v11605_v43  ;;  %v14640_v52 = vpop.permute.xlu1 %5810 }
 0x345   :  { %5343 = vmatprep.mubr.f32.mxu1 %v13379_v0 }
 0x348   :  { %11609 = vmatmul.mubr.msk.f32.vlgmr.msra.gmra.mrb[18].mxu1 %vm16020_vm5, %v11603_v35 }
 0x349   :  { %11875 = vmatpush1.bf16.msra.mxu1 %v11874_v58  ;;  %5349 = vmatprep.mubr.f32.mxu1 %v13379_v0 }
 0x34a   :  { %11877 = vmatprep.subr.bf16.mxu1 %v11876_v51 }
 0x34c   :  { %11610 = vmatmul.mubr.msk.f32.gmra.mrb[20].mxu1 %vm16020_vm5, %v11604_v41 }
 0x34d   :  { %5355 = vmatprep.mubr.f32.mxu1 %v13379_v0 }
 0x350   :  { %11611 = vmatmul.mubr.msk.f32.gmra.mrb[22].mxu1 %vm16020_vm5, %v11605_v43 }
 0x351   :  { %5426 = vmatprep.mubr.f32.mxu1 %v13379_v0 }
 0x354   :  { %11612 = vmatmul.mubr.msk.f32.vlgmr.msra.gmra.mrb[24].mxu1 %vm16020_vm5, %v11603_v35  ;;  %v5499_v35 = vsel %vm16146_vm13, %v12803_v57, %v12812_v28  ;;  %vm16151_vm13 = vmmov %vm16149_vm9 }
 0x355   :  { %11879 = vmatpush1.bf16.msra.mxu1 %v11878_v25  ;;  %5432 = vmatprep.mubr.f32.mxu1 %v13379_v0  ;;  %v11886_v37 = vpack.c.bf16 %v5505_v36, %v5499_v35 }
 0x356   :  { %11881 = vmatprep.subr.bf16.mxu1 %v11880_v26 }
 0x358   :  { %11613 = vmatmul.mubr.msk.f32.gmra.mrb[26].mxu1 %vm16020_vm5, %v11604_v41 }
 0x359   :  { %5438 = vmatprep.mubr.f32.mxu1 %v13379_v0 }
 0x35c   :  { %11614 = vmatmul.mubr.msk.f32.gmra.mrb[28].mxu1 %vm16020_vm5, %v11605_v43 }
 0x35d   :  { %5592 = vmatprep.mubr.f32.mxu1 %v13379_v0 }
 0x360   :  { %11618 = vmatmul.mubr.msk.f32.vlgmr.msra.gmra.mrb[12].mxu1 %vm16020_vm5, %v11615_v16 }
 0x361   :  { %11883 = vmatpush1.bf16.msra.mxu1 %v11882_v31  ;;  %5598 = vmatprep.mubr.f32.mxu1 %v13379_v0 }
 0x362   :  { %11885 = vmatprep.subr.bf16.mxu1 %v11884_v33 }
 0x364   :  { %11619 = vmatmul.mubr.msk.f32.gmra.mrb[14].mxu1 %vm16020_vm5, %v11616_v7 }
 0x365   :  { %5604 = vmatprep.mubr.f32.mxu1 %v13379_v0 }
 0x368   :  { %11620 = vmatmul.mubr.msk.f32.gmra.mrb[16].mxu1 %vm16020_vm5, %v11617_v13 }
 0x369   :  { %5675 = vmatprep.mubr.f32.mxu1 %v13379_v0 }
 0x36c   :  { %11621 = vmatmul.mubr.msk.f32.vlgmr.msra.gmra.mrb[18].mxu1 %vm16020_vm5, %v11615_v16 }
 0x36d   :  { %11887 = vmatpush1.bf16.msra.mxu1 %v11886_v37  ;;  %5681 = vmatprep.mubr.f32.mxu1 %v13379_v0 }
 0x370   :  { %11622 = vmatmul.mubr.msk.f32.gmra.mrb[20].mxu1 %vm16020_vm5, %v11616_v7 }
 0x371   :  { %5687 = vmatprep.mubr.f32.mxu1 %v13379_v0 }
 0x374   :  { %11623 = vmatmul.mubr.msk.f32.gmra.mrb[22].mxu1 %vm16020_vm5, %v11617_v13 }
 0x375   :  { %5758 = vmatprep.mubr.f32.mxu1 %v13379_v0 }
 0x378   :  { %11624 = vmatmul.mubr.msk.f32.vlgmr.msra.gmra.mrb[24].mxu1 %vm16020_vm5, %v11615_v16 }
 0x379   :  { %5764 = vmatprep.mubr.f32.mxu1 %v13379_v0 }
 0x37c   :  { %11625 = vmatmul.mubr.msk.f32.gmra.mrb[26].mxu1 %vm16020_vm5, %v11616_v7 }
 0x37d   :  { %5770 = vmatprep.mubr.f32.mxu1 %v13379_v0 }
 0x380   :  { %11626 = vmatmul.mubr.msk.f32.gmra.mrb[28].mxu1 %vm16020_vm5, %v11617_v13  ;;  %vm16156_vm5 = vmmov %vm16149_vm9 }
 0x433   :  { %v5594_v4 = vpop.f32.mrb[12].mxu1 }
 0x434   :  { %v5813_v22 = vadd.f32 %v14626_v15, %v5594_v4  ;;  %v5596_v41 = vpop.f32.mrb[13].mxu1 }
 0x435   :  { %v5814_v32 = vadd.f32 %v14626_v15, %v5596_v41 }
 0x436   :  { %v5831_v20 = vmax.f32 %v5813_v22, 0.0 }
 0x437   :  { %v5832_v42 = vmax.f32 %v5814_v32, 0.0  ;;  %v5600_v43 = vpop.f32.mrb[14].mxu1 }
 0x438   :  { %v5849_v34 = vsel %vm14014_vm3, %v5831_v20, 0.0  ;;  %v5819_v44 = vadd.f32 %v14630_v24, %v5600_v43  ;;  %v5602_v39 = vpop.f32.mrb[15].mxu1 }
 0x439   :  { %v5850_v46 = vsel %vm14024_vm2, %v5832_v42, 0.0  ;;  %v5820_v47 = vadd.f32 %v14630_v24, %v5602_v39 }
 0x43a   :  { %v5837_v56 = vmax.f32 %v5819_v44, 0.0  ;;  %v14638_v58 = vpack.i.bf16 %v5850_v46, %v5849_v34 }
 0x43b   :  { %v5838_v50 = vmax.f32 %v5820_v47, 0.0  ;;  %v5606_v51 = vpop.f32.mrb[16].mxu1 }
 0x43c   :  { %v5855_v54 = vsel %vm14014_vm3, %v5837_v56, 0.0  ;;  %v14644_v55 = vpack.c.bf16 %v5837_v56, %v5831_v20  ;;  %12830 = vrot.lane.b32.xlu0 %v14638_v58, %s13381_s20  ;;  %v5608_v61 = vpop.f32.mrb[17].mxu1  ;;  %v14658_v3 = vadd.f32 %v14640_v52, %v5606_v51 }
 0x43d   :  { %v5856_v57 = vsel %vm14024_vm2, %v5838_v50, 0.0  ;;  %v14650_v59 = vpack.c.bf16 %v5838_v50, %v5832_v42  ;;  %v14653_v60 = vadd.f32 %v14640_v52, %v5608_v61  ;;  %v14655_v62 = vpack.i.bf16 %v5855_v54, %v5849_v34 }
 0x43e   :  { %v14660_v5 = vpack.i.bf16 %v5856_v57, %v5855_v54  ;;  %v16022_v17 = vmax.f32 %v14658_v3, 0.0 }
 0x43f   :  { %v16023_v10 = vmax.f32 %v14653_v60, 0.0  ;;  %v5677_v21 = vpop.f32.mrb[18].mxu1 }
 0x440   :  { %v5815_v25 = vadd.f32 %v14626_v15, %v5677_v21  ;;  %12835 = vrot.lane.b32.xlu0 %v14638_v58, %s13383_s0  ;;  %12840 = vrot.lane.b32.xlu1 %v14660_v5, %s13381_s20  ;;  %v5679_v26 = vpop.f32.mrb[19].mxu1  ;;  %v14688_v30 = vsel %vm14014_vm3, %v16022_v17, 0.0 }
 0x441   :  { %v5816_v1 = vadd.f32 %v14626_v15, %v5679_v26  ;;  %v14674_v28 = vsel %vm14024_vm2, %v16023_v10, 0.0 }
 0x442   :  { %v5833_v63 = vmax.f32 %v5815_v25, 0.0 }
 0x443   :  { %v5683_v2 = vpop.f32.mrb[20].mxu1  ;;  %v5834_v29 = vmax.f32 %v5816_v1, 0.0 }
 0x444   :  { %v5851_v40 = vsel %vm14101_vm10, %v5833_v63, 0.0  ;;  %v5821_v19 = vadd.f32 %v14630_v24, %v5683_v2  ;;  %12845 = vrot.lane.b32.xlu1 %v14660_v5, %s13383_s0  ;;  %5964 = vrot.lane.b32.xlu0 %v14674_v28, %s13381_s20  ;;  %v5685_v16 = vpop.f32.mrb[21].mxu1 }
 0x445   :  { %v5822_v14 = vadd.f32 %v14630_v24, %v5685_v16  ;;  %v14690_v33 = vpack.i.bf16 %v5851_v40, %v5850_v46  ;;  %v5852_v35 = vsel %vm14112_vm0, %v5834_v29, 0.0  ;;  %v14722_v56 = vpack.i.bf16 %v5851_v40, %v13379_v0 }
 0x446   :  { %v5839_v31 = vmax.f32 %v5821_v19, 0.0 }
 0x447   :  { %v5840_v7 = vmax.f32 %v5822_v14, 0.0  ;;  %v5689_v13 = vpop.f32.mrb[22].mxu1 }
 0x448   :  { %v5857_v36 = vsel %vm14101_vm10, %v5839_v31, 0.0  ;;  %v14696_v37 = vpack.c.bf16 %v5839_v31, %v5833_v63  ;;  %v14699_v4 = vadd.f32 %v14640_v52, %v5689_v13  ;;  %5962 = vrot.lane.b32.xlu1 %v14688_v30, %s13381_s20  ;;  %6280 = vrot.lane.b32.xlu0 %v14674_v28, %s13383_s0  ;;  %v5691_v22 = vpop.f32.mrb[23].mxu1 }
 0x449   :  { %v14705_v41 = vpack.c.bf16 %v5840_v7, %v5834_v29  ;;  %v14707_v32 = vpack.i.bf16 %v5857_v36, %v5852_v35  ;;  %v14710_v20 = vadd.f32 %v14640_v52, %v5691_v22  ;;  %v14713_v34 = vpack.i.bf16 %v5857_v36, %v5856_v57 }
 0x44a   :  { %v16019_v42 = vmax.f32 %v14699_v4, 0.0  ;;  %v5858_v57 = vsel %vm14112_vm0, %v5840_v7, 0.0 }
 0x44b   :  { %v5760_v43 = vpop.f32.mrb[24].mxu1  ;;  %v16021_v51 = vmax.f32 %v14710_v20, 0.0 }
 0x44c   :  { %v5817_v44 = vadd.f32 %v14626_v15, %v5760_v43  ;;  %6278 = vrot.lane.b32.xlu1 %v14688_v30, %s13383_s0  ;;  %12855 = vrot.lane.b32.xlu0 %v14707_v32, %s13381_s20  ;;  %v5762_v39 = vpop.f32.mrb[25].mxu1  ;;  %v14728_v50 = vsel %vm14101_vm10, %v16019_v42, 0.0 }
 0x44d   :  { %v5818_v46 = vadd.f32 %v14626_v15, %v5762_v39  ;;  %v14747_v40 = vsel %vm14112_vm0, %v16021_v51, 0.0 }
 0x44e   :  { %v5835_v47 = vmax.f32 %v5817_v44, 0.0 }
 0x44f   :  { %v5836_v54 = vmax.f32 %v5818_v46, 0.0  ;;  %v5766_v61 = vpop.f32.mrb[26].mxu1 }
 0x450   :  { %v5853_v15 = vsel %vm14057_vm8, %v5835_v47, 0.0  ;;  %v5823_v21 = vadd.f32 %v14630_v24, %v5766_v61  ;;  %12850 = vrot.lane.b32.xlu1 %v14722_v56, %s13381_s20  ;;  %5966 = vrot.lane.b32.xlu0 %v14728_v50, %s13381_s20  ;;  %v5768_v25 = vpop.f32.mrb[27].mxu1 }
 0x451   :  { %v5824_v26 = vadd.f32 %v14630_v24, %v5768_v25  ;;  %v12859_v1 = vpack.i.bf16 %v5853_v15, %v5858_v57  ;;  %v14741_v2 = vpack.i.bf16 %v5853_v15, %v5852_v35  ;;  %v14751_v29 = vsel %vm14066_vm1, %v5836_v54, 0.0 }
 0x452   :  { %v5841_v63 = vmax.f32 %v5823_v21, 0.0 }
 0x453   :  { %v5842_v19 = vmax.f32 %v5824_v26, 0.0  ;;  %v5772_v16 = vpop.f32.mrb[28].mxu1 }
 0x454   :  { %v5859_v14 = vsel %vm14057_vm8, %v5841_v63, 0.0  ;;  %v14755_v24 = vpack.c.bf16 %v5841_v63, %v5835_v47  ;;  %v14758_v31 = vadd.f32 %v14640_v52, %v5772_v16  ;;  %5968 = vrot.lane.b32.xlu1 %v14747_v40, %s13381_s20  ;;  %v5774_v7 = vpop.f32.mrb[29].mxu1 }
 0x455   :  { %v14762_v13 = vpack.c.bf16 %v5842_v19, %v5836_v54  ;;  %v12869_v35 = vpack.i.bf16 %v5859_v14, %v14751_v29  ;;  %v14767_v22 = vpack.i.bf16 %v5859_v14, %v5858_v57  ;;  %v14777_v44 = vadd.f32 %v14640_v52, %v5774_v7 }
 0x456   :  { %16148 = vst [vmem:[#allocation4_spill] sm:$0xff] %v14758_v31  ;;  %v16017_v36 = vmax.f32 %v14758_v31, 0.0  ;;  %v14785_v39 = vsel %vm14066_vm1, %v5842_v19, 0.0 }
 0x457   :  { %12870 = vrot.lane.b32.xlu0 %v12869_v35, %s13381_s20  ;;  %v16018_v46 = vmax.f32 %v14777_v44, 0.0 }
 0x458   :  { %12860 = vrot.lane.b32.xlu1 %v12859_v1, %s13381_s20  ;;  %v14774_v43 = vsel %vm14057_vm8, %v16017_v36, 0.0 }
 0x459   :  { %v14796_v52 = vsel %vm14066_vm1, %v16018_v46, 0.0 }
 0x45b   :  { %5970 = vrot.lane.b32.xlu0 %v14774_v43, %s13381_s20 }
 0x45c   :  { %12865 = vrot.lane.b32.xlu1 %v14722_v56, %s13383_s0 }
 0x45f   :  { %12875 = vrot.lane.b32.xlu0 %v14707_v32, %s13383_s0 }
 0x460   :  { %5958 = vrot.lane.b32.xlu1 %v14785_v39, %s13381_s20 }
 0x463   :  { %6282 = vrot.lane.b32.xlu0 %v14728_v50, %s13383_s0 }
 0x464   :  { %5972 = vrot.lane.b32.xlu1 %v14796_v52, %s13381_s20 }
 0x467   :  { %12885 = vrot.lane.b32.xlu0 %v12869_v35, %s13383_s0 }
 0x468   :  { %12880 = vrot.lane.b32.xlu1 %v12859_v1, %s13383_s0 }
 0x46b   :  { %6286 = vrot.lane.b32.xlu0 %v14774_v43, %s13383_s0 }
 0x46c   :  { %6284 = vrot.lane.b32.xlu1 %v14747_v40, %s13383_s0 }
 0x46f   :  { %12890 = vrot.lane.b32.xlu0 %v14638_v58, %s13380_s30 }
 0x470   :  { %6274 = vrot.lane.b32.xlu1 %v14785_v39, %s13383_s0 }
 0x473   :  { %12900 = vrot.lane.b32.xlu0 %v13379_v0, %s13380_s30 }
 0x474   :  { %12895 = vrot.lane.b32.xlu1 %v14660_v5, %s13380_s30 }
 0x477   :  { %6598 = vrot.lane.b32.xlu0 %v14674_v28, %s13380_s30 }
 0x478   :  { %6596 = vrot.lane.b32.xlu1 %v14688_v30, %s13380_s30 }
 0x47b   :  { %12910 = vrot.lane.b32.xlu0 %v14707_v32, %s13380_s30 }
 0x47c   :  { %6288 = vrot.lane.b32.xlu1 %v14796_v52, %s13383_s0 }
 0x47f   :  { %6600 = vrot.lane.b32.xlu0 %v14728_v50, %s13380_s30 }
 0x480   :  { %12905 = vrot.lane.b32.xlu1 %v14722_v56, %s13380_s30 }
 0x483   :  { %12920 = vrot.lane.b32.xlu0 %v12869_v35, %s13380_s30 }
 0x484   :  { %12915 = vrot.lane.b32.xlu1 %v12859_v1, %s13380_s30 }
 0x487   :  { %6604 = vrot.lane.b32.xlu0 %v14774_v43, %s13380_s30 }
 0x488   :  { %6602 = vrot.lane.b32.xlu1 %v14747_v40, %s13380_s30 }
 0x48b   :  { %12925 = vrot.lane.b32.xlu0 %v14638_v58, %s13382_s21  ;;  %v12821_v58 = vpop.permute.xlu0 %12820 }
 0x48c   :  { %6592 = vrot.lane.b32.xlu1 %v14785_v39, %s13380_s30  ;;  %v12823_v47 = vunpack.i.h.bf16 %v12821_v58 }
 0x48f   :  { %12935 = vrot.lane.b32.xlu0 %v13379_v0, %s13382_s21 }
 0x490   :  { %12930 = vrot.lane.b32.xlu1 %v14660_v5, %s13382_s21  ;;  %v14864_v5 = vpop.permute.xlu0 %12825 }
 0x493   :  { %6928 = vrot.lane.b32.xlu0 %v14674_v28, %s13382_s21 }
 0x494   :  { %6606 = vrot.lane.b32.xlu1 %v14796_v52, %s13380_s30 }
 0x497   :  { %12945 = vrot.lane.b32.xlu0 %v14707_v32, %s13382_s21 }
 0x498   :  { %6926 = vrot.lane.b32.xlu1 %v14688_v30, %s13382_s21 }
 0x49b   :  { %6930 = vrot.lane.b32.xlu0 %v14728_v50, %s13382_s21 }
 0x49c   :  { %12940 = vrot.lane.b32.xlu1 %v14722_v56, %s13382_s21  ;;  %v12822_v56 = vunpack.i.l.bf16 %v12821_v58  ;;  %v14898_v58 = vpack.i.bf16 %v13379_v0, %v14751_v29 }
 0x49f   :  { %12955 = vrot.lane.b32.xlu0 %v12869_v35, %s13382_s21 }
 0x4a0   :  { %12950 = vrot.lane.b32.xlu1 %v12859_v1, %s13382_s21 }
 0x4a3   :  { %6934 = vrot.lane.b32.xlu0 %v14774_v43, %s13382_s21 }
 0x4a4   :  { %6932 = vrot.lane.b32.xlu1 %v14747_v40, %s13382_s21 }
 0x4a7   :  { %12960 = vrot.lane.b32.xlu0 %v14690_v33, %s13384_s24 }
 0x4a8   :  { %6922 = vrot.lane.b32.xlu1 %v14785_v39, %s13382_s21 }
 0x4ab   :  { %12970 = vrot.lane.b32.xlu0 %v14655_v62, %s13384_s24 }
 0x4ac   :  { %6936 = vrot.lane.b32.xlu1 %v14796_v52, %s13382_s21 }
 0x4ae   :  { %v14870_v32 = vpop.permute.xlu0 %12830 }
 0x4af   :  { %7552 = vrot.lane.b32.xlu0 %v14728_v50, %s13384_s24  ;;  %v12833_v54 = vunpack.i.h.bf16 %v14870_v32  ;;  %v12832_v61 = vunpack.i.l.bf16 %v14870_v32 }
 0x4b0   :  { %12965 = vrot.lane.b32.xlu1 %v14713_v34, %s13384_s24 }
 0x4b1   :  { %v5974_v26 = vsel %vm16149_vm9, %v12822_v56, %v12832_v61  ;;  %v5975_v63 = vsel %vm16151_vm13, %v12832_v61, %v12833_v54  ;;  %vm16153_vm13 = vmmov %vm16149_vm9 }
 0x4b2   :  { %v14878_v57 = vpop.permute.xlu0 %12835  ;;  %v12841_v15 = vpop.permute.xlu1 %12840 }
 0x4b3   :  { %v12843_v21 = vunpack.i.h.bf16 %v12841_v15  ;;  %v12842_v25 = vunpack.i.l.bf16 %v12841_v15  ;;  %12975 = vrot.lane.b32.xlu0 %v14741_v2, %s13384_s24 }
 0x4b4   :  { %7550 = vrot.lane.b32.xlu1 %v14674_v28, %s13384_s24 }
 0x4b5   :  { %v5980_v1 = vsel %vm16150_vm11, %v12823_v47, %v12842_v25  ;;  %v5981_v19 = vsel %vm16152_vm12, %v12842_v25, %v12843_v21  ;;  %v14916_v25 = vpack.i.bf16 %v13379_v0, %v14785_v39  ;;  %vm16027_vm11 = vcmask 195584   ;;  %vm16154_vm12 = vmmov %vm16149_vm9 }
 0x4b6   :  { %v14888_v16 = vpop.permute.xlu1 %12845  ;;  %v14890_v14 = vpop.permute.xlu0 %5964  ;;  %v11888_v7 = vpack.c.bf16 %v5981_v19, %v5975_v63  ;;  %v11890_v35 = vpack.c.bf16 %v5980_v1, %v5974_v26  ;;  %v14925_v1 = vld [vmem:[%s16000_s5 + $0x10] sm:$0xff] }
 0x4b7   :  { %7554 = vrot.lane.b32.xlu0 %v14747_v40, %s13384_s24 }
 0x4b8   :  { %11889 = vmatprep.subr.bf16.mxu0 %v11888_v7  ;;  %7548 = vrot.lane.b32.xlu1 %v14688_v30, %s13384_s24 }
 0x4b9   :  { %11891 = vmatpush1.bf16.msra.mxu0 %v11890_v35  ;;  %v14940_v35 = vld [vmem:[%s16000_s5 + $0x18] sm:$0xff] }
 0x4ba   :  { %v5963_v32 = vpop.permute.xlu1 %5962  ;;  %v14900_v47 = vpop.permute.xlu0 %6280 }
 0x4bb   :  { %12985 = vrot.lane.b32.xlu0 %v14898_v58, %s13384_s24  ;;  %v5987_v56 = vsel %vm16149_vm9, %v5963_v32, %v14890_v14 }
 0x4bc   :  { %6021 = vmatprep.subr.mxu0 %v5987_v56  ;;  %12980 = vrot.lane.b32.xlu1 %v14767_v22, %s13384_s24 }
 0x4be   :  { %v14908_v61 = vpop.permute.xlu1 %6278  ;;  %v12856_v15 = vpop.permute.xlu0 %12855 }
 0x4bf   :  { %12995 = vrot.lane.b32.xlu0 %v14690_v33, %s13385_s25  ;;  %v12858_v56 = vunpack.i.h.bf16 %v12856_v15 }
 0x4c0   :  { %7556 = vrot.lane.b32.xlu1 %v14774_v43, %s13384_s24 }
 0x4c2   :  { %v12851_v29 = vpop.permute.xlu1 %12850  ;;  %v5967_v63 = vpop.permute.xlu0 %5966 }
 0x4c3   :  { %v12852_v26 = vunpack.i.l.bf16 %v12851_v29  ;;  %13005 = vrot.lane.b32.xlu0 %v14655_v62, %s13385_s25  ;;  %v12853_v39 = vunpack.i.h.bf16 %v12851_v29 }
 0x4c4   :  { %12990 = vrot.lane.b32.xlu1 %v14916_v25, %s13384_s24 }
 0x4c5   :  { %v5986_v19 = vsel %vm16153_vm13, %v12852_v26, %v5963_v32  ;;  %v5976_v29 = vsel %vm16154_vm12, %v12833_v54, %v12853_v39  ;;  %vm16155_vm13 = vmmov %vm16149_vm9 }
 0x4c6   :  { %6022 = vmatpush1.msra.mxu0 %v5986_v19  ;;  %v14928_v7 = vpop.permute.xlu1 %5968  ;;  %v12857_v19 = vunpack.i.l.bf16 %v12856_v15  ;;  %v5982_v15 = vsel %vm16156_vm5, %v12843_v21, %v12858_v56  ;;  %vm16157_vm12 = vmmov %vm16156_vm5 }
 0x4c7   :  { %7882 = vrot.lane.b32.xlu0 %v14728_v50, %s13385_s25  ;;  %11629 = vmatmul.mubr.msk.f32.vlgmr.msra.gmra.mrb[8].mxu0 %vm16027_vm11, %v14925_v1  ;;  %v11894_v54 = vpack.c.bf16 %v5982_v15, %v5976_v29  ;;  %v5989_v21 = vsel %vm16157_vm12, %v5967_v63, %v14928_v7  ;;  %vm16161_vm12 = vmmov %vm16156_vm5 }
 0x4c8   :  { %7560 = vrot.lane.b32.xlu1 %v13379_v0, %s13384_s24  ;;  %6087 = vmatprep.mubr.f32.mxu0 %v13379_v0  ;;  %v5977_v46 = vsel %vm16149_vm9, %v12853_v39, %v12857_v19  ;;  %vm16158_vm9 = vmmov %vm16156_vm5 }
 0x4c9   :  { %v12871_v32 = vpop.permute.xlu0 %12870 }
 0x4ca   :  { %v12861_v26 = vpop.permute.xlu1 %12860  ;;  %v12873_v51 = vunpack.i.h.bf16 %v12871_v32  ;;  %v12872_v31 = vunpack.i.l.bf16 %v12871_v32  ;;  %v12847_v32 = vunpack.i.l.bf16 %v14888_v16 }
 0x4cb   :  { %v12862_v8 = vunpack.i.l.bf16 %v12861_v26  ;;  %7558 = vrot.lane.b32.xlu0 %v14796_v52, %s13384_s24  ;;  %11630 = vmatmul.mubr.msk.f32.gmra.mrb[10].mxu0 %vm16027_vm11, %v14940_v35  ;;  %v12863_v17 = vunpack.i.h.bf16 %v12861_v26  ;;  %vm16160_vm11 = vmmov %vm16156_vm5 }
 0x4cc   :  { %13000 = vrot.lane.b32.xlu1 %v14713_v34, %s13385_s25  ;;  %6158 = vmatprep.mubr.f32.mxu0 %v13379_v0 }
 0x4cd   :  { %v5971_v36 = vpop.permute.xlu0 %5970  ;;  %v5983_v42 = vsel %vm16155_vm13, %v12858_v56, %v12862_v8  ;;  %v5978_v56 = vsel %vm16156_vm5, %v12857_v19, %v12863_v17  ;;  %v5984_v26 = vsel %vm16158_vm9, %v12862_v8, %v12873_v51  ;;  %vm16159_vm13 = vmmov %vm16156_vm5  ;;  %v5988_v8 = vsel %vm16161_vm12, %v14890_v14, %v5967_v63 }
 0x4ce   :  { %v14953_v10 = vpop.permute.xlu1 %12865  ;;  %v11892_v49 = vpack.c.bf16 %v5983_v42, %v5977_v46  ;;  %v12848_v46 = vunpack.i.h.bf16 %v14888_v16  ;;  %v12838_v19 = vunpack.i.h.bf16 %v14878_v57  ;;  %vm16163_vm9 = vcmask 154624  }
 0x4cf   :  { %13010 = vrot.lane.b32.xlu0 %v14741_v2, %s13385_s25  ;;  %vm16165_vm12 = vmmov %vm16163_vm9 }
 0x4d0   :  { %11893 = vmatprep.subr.bf16.mxu0 %v11892_v49  ;;  %7880 = vrot.lane.b32.xlu1 %v14674_v28, %s13385_s25  ;;  %v5979_v49 = vsel %vm16159_vm13, %v12863_v17, %v12872_v31  ;;  %v11898_v17 = vpack.c.bf16 %v5984_v26, %v5978_v56  ;;  %v6297_v63 = vsel %vm16163_vm9, %v12847_v32, %v12848_v46  ;;  %vm16164_vm13 = vmmov %vm16163_vm9 }
 0x4d1   :  { %11895 = vmatpush1.bf16.msra.mxu0 %v11894_v54  ;;  %v14959_v39 = vpop.permute.xlu0 %12875  ;;  %v12837_v54 = vunpack.i.l.bf16 %v14878_v57  ;;  %v12827_v57 = vunpack.i.l.bf16 %v14864_v5 }
 0x4d2   :  { %6098 = vmatprep.subr.mxu0 %v5989_v21  ;;  %v5959_v42 = vpop.permute.xlu1 %5958 }
 0x4d3   :  { %v5985_v29 = vsel %vm16160_vm11, %v12873_v51, %v5959_v42  ;;  %7884 = vrot.lane.b32.xlu0 %v14747_v40, %s13385_s25  ;;  %v12828_v51 = vunpack.i.h.bf16 %v14864_v5  ;;  %vm16162_vm11 = vcmask 195584   ;;  %v6291_v56 = vsel %vm16164_vm13, %v12837_v54, %v12838_v19 }
 0x4d4   :  { %v11896_v15 = vpack.c.bf16 %v5985_v29, %v5979_v49  ;;  %7878 = vrot.lane.b32.xlu1 %v14688_v30, %s13385_s25  ;;  %v5990_v49 = vsel %vm16156_vm5, %v14928_v7, %v5971_v36  ;;  %v11900_v5 = vpack.c.bf16 %v6297_v63, %v6291_v56  ;;  %v12867_v7 = vunpack.i.l.bf16 %v14953_v10  ;;  %vm16166_vm13 = vmmov %vm16162_vm11 }
 0x4d5   :  { %6099 = vmatpush1.msra.mxu0 %v5988_v8  ;;  %v14977_v16 = vpop.permute.xlu0 %6282  ;;  %v6296_v26 = vsel %vm16165_vm12, %v12828_v51, %v12847_v32  ;;  %v12878_v32 = vunpack.i.h.bf16 %v14959_v39  ;;  %v12877_v8 = vunpack.i.l.bf16 %v14959_v39  ;;  %vm16167_vm12 = vmmov %vm16163_vm9 }
 0x4d6   :  { %11631 = vmatmul.mubr.msk.f32.vlgmr.msra.gmra.mrb[12].mxu0 %vm16162_vm11, %v14925_v1  ;;  %11897 = vmatprep.subr.bf16.mxu0 %v11896_v15  ;;  %v5973_v31 = vpop.permute.xlu1 %5972  ;;  %v6290_v15 = vsel %vm16163_vm9, %v12827_v57, %v12837_v54  ;;  %v12868_v54 = vunpack.i.h.bf16 %v14953_v10  ;;  %v6303_v39 = vsel %vm16167_vm12, %v14908_v61, %v14900_v47 }
 0x4d7   :  { %11899 = vmatpush1.bf16.msra.mxu0 %v11898_v17  ;;  %13020 = vrot.lane.b32.xlu0 %v14898_v58, %s13385_s25  ;;  %v5991_v14 = vsel %vm16156_vm5, %v5971_v36, %v5973_v31  ;;  %v11902_v36 = vpack.c.bf16 %v6296_v26, %v6290_v15  ;;  %vm16169_vm5 = vmmov %vm16163_vm9  ;;  %v15036_v26 = vld [vmem:[%s16000_s5] sm:$0xff] }
 0x4d8   :  { %13015 = vrot.lane.b32.xlu1 %v14767_v22, %s13385_s25  ;;  %6175 = vmatprep.subr.mxu0 %v5991_v14  ;;  %v6293_v10 = vsel %vm16169_vm5, %v12868_v54, %v12877_v8  ;;  %vm16171_vm8 = vmmov %vm16169_vm5 }
 0x4d9   :  { %6164 = vmatprep.mubr.f32.mxu0 %v13379_v0  ;;  %v14990_v21 = vpop.permute.xlu0 %12885  ;;  %v6302_v63 = vsel %vm16171_vm8, %v12867_v7, %v14908_v61  ;;  %vm16172_vm12 = vmmov %vm16169_vm5 }
 0x4da   :  { %11632 = vmatmul.mubr.msk.f32.gmra.mrb[14].mxu0 %vm16162_vm11, %v14940_v35  ;;  %v12881_v42 = vpop.permute.xlu1 %12880  ;;  %vm16168_vm11 = vmmov %vm16163_vm9  ;;  %v12887_v61 = vunpack.i.l.bf16 %v14990_v21 }
 0x4db   :  { %v12882_v29 = vunpack.i.l.bf16 %v12881_v42  ;;  %13030 = vrot.lane.b32.xlu0 %v14690_v33, %s13386_s26  ;;  %6176 = vmatpush1.msra.mxu0 %v5990_v49  ;;  %vm16170_vm9 = vmmov %vm16169_vm5  ;;  %v6292_v49 = vsel %vm16172_vm12, %v12838_v19, %v12868_v54 }
 0x4dc   :  { %7886 = vrot.lane.b32.xlu1 %v14774_v43, %s13385_s25  ;;  %11901 = vmatprep.subr.bf16.mxu0 %v11900_v5  ;;  %vm16173_vm8 = vmmov %vm16166_vm13 }
 0x4dd   :  { %6235 = vmatprep.mubr.f32.mxu0 %v13379_v0  ;;  %v15006_v17 = vpop.permute.xlu0 %6286  ;;  %v6299_v31 = vsel %vm16168_vm11, %v12878_v32, %v12882_v29  ;;  %vm16174_vm11 = vmmov %vm16169_vm5 }
 0x4de   :  { %11633 = vmatmul.mubr.msk.f32.vlgmr.msra.gmra.mrb[16].mxu0 %vm16166_vm13, %v14925_v1  ;;  %v15011_v51 = vpop.permute.xlu1 %6284  ;;  %v6298_v1 = vsel %vm16170_vm9, %v12848_v46, %v12878_v32  ;;  %v11904_v56 = vpack.c.bf16 %v6299_v31, %v6293_v10  ;;  %v12883_v46 = vunpack.i.h.bf16 %v12881_v42  ;;  %v15057_v42 = vld [vmem:[%s16000_s5 + $0x8] sm:$0xff]  ;;  %vm16175_vm9 = vmmov %vm16169_vm5 }
 0x4df   :  { %11903 = vmatpush1.bf16.msra.mxu0 %v11902_v36  ;;  %13040 = vrot.lane.b32.xlu0 %v14655_v62, %s13386_s26  ;;  %v11906_v15 = vpack.c.bf16 %v6298_v1, %v6292_v49  ;;  %vm16177_vm12 = vmmov %vm16169_vm5 }
 0x4e0   :  { %6336 = vmatprep.subr.mxu0 %v6303_v39  ;;  %13025 = vrot.lane.b32.xlu1 %v14916_v25, %s13385_s25  ;;  %v6295_v36 = vsel %vm16175_vm9, %v12883_v46, %v12887_v61 }
 0x4e1   :  { %v15022_v14 = vpop.permute.xlu0 %12890  ;;  %6241 = vmatprep.mubr.f32.mxu0 %v13379_v0 }
 0x4e2   :  { %11634 = vmatmul.mubr.msk.f32.gmra.mrb[18].mxu0 %vm16166_vm13, %v14940_v35  ;;  %v6275_v57 = vpop.permute.xlu1 %6274  ;;  %v12888_v35 = vunpack.i.h.bf16 %v14990_v21  ;;  %v6305_v21 = vsel %vm16169_vm5, %v14977_v16, %v15011_v51  ;;  %vm16176_vm13 = vmmov %vm16169_vm5 }
 0x4e3   :  { %6337 = vmatpush1.msra.mxu0 %v6302_v63  ;;  %7888 = vrot.lane.b32.xlu0 %v14796_v52, %s13385_s25  ;;  %v6294_v54 = vsel %vm16176_vm13, %v12877_v8, %v12883_v46  ;;  %v12892_v8 = vunpack.i.l.bf16 %v15022_v14  ;;  %vm16180_vm13 = vcmask 138240  }
 0x4e4   :  { %11905 = vmatprep.subr.bf16.mxu0 %v11904_v56  ;;  %7890 = vrot.lane.b32.xlu1 %v13379_v0, %s13385_s25  ;;  %v6301_v19 = vsel %vm16174_vm11, %v12888_v35, %v6275_v57  ;;  %v6300_v39 = vsel %vm16177_vm12, %v12882_v29, %v12888_v35  ;;  %vm16178_vm11 = vmmov %vm16169_vm5  ;;  %v12893_v29 = vunpack.i.h.bf16 %v15022_v14 }
 0x4e5   :  { %v12901_v5 = vpop.permute.xlu0 %12900  ;;  %6396 = vmatprep.mubr.f32.mxu0 %v13379_v0  ;;  %v11908_v31 = vpack.c.bf16 %v6301_v19, %v6295_v36  ;;  %v6304_v1 = vsel %vm16178_vm11, %v14900_v47, %v14977_v16  ;;  %v11910_v47 = vpack.c.bf16 %v6300_v39, %v6294_v54  ;;  %vm16179_vm5 = vmmov %vm16173_vm8  ;;  %v6306_v36 = vsel %vm16175_vm9, %v15011_v51, %v15006_v17 }
 0x4e6   :  { %11635 = vmatmul.mubr.msk.f32.vlgmr.msra.gmra.mrb[8].mxu0 %vm16173_vm8, %v15036_v26  ;;  %v15046_v32 = vpop.permute.xlu1 %12895  ;;  %v12903_v16 = vunpack.i.h.bf16 %v12901_v5  ;;  %v12902_v49 = vunpack.i.l.bf16 %v12901_v5  ;;  %vm16181_vm12 = vmmov %vm16180_vm13 }
 0x4e7   :  { %11907 = vmatpush1.bf16.msra.mxu0 %v11906_v15  ;;  %8212 = vrot.lane.b32.xlu0 %v14728_v50, %s13386_s26  ;;  %v12898_v63 = vunpack.i.h.bf16 %v15046_v32  ;;  %v12897_v57 = vunpack.i.l.bf16 %v15046_v32  ;;  %v6609_v5 = vsel %vm16181_vm12, %v12892_v8, %v12893_v29 }
 0x4e8   :  { %6413 = vmatprep.subr.mxu0 %v6305_v21  ;;  %13035 = vrot.lane.b32.xlu1 %v14713_v34, %s13386_s26 }
 0x4e9   :  { %v15062_v7 = vpop.permute.xlu0 %6598  ;;  %6402 = vmatprep.mubr.f32.mxu0 %v13379_v0  ;;  %v6615_v14 = vsel %vm16180_vm13, %v12897_v57, %v12898_v63  ;;  %vm16184_vm13 = vmmov %vm16179_vm5 }
 0x4ea   :  { %11636 = vmatmul.mubr.msk.f32.gmra.mrb[10].mxu0 %vm16173_vm8, %v15057_v42  ;;  %v6597_v10 = vpop.permute.xlu1 %6596  ;;  %vm16182_vm8 = vmmov %vm16181_vm12  ;;  %v11912_v54 = vpack.c.bf16 %v6615_v14, %v6609_v5 }
 0x4eb   :  { %6414 = vmatpush1.msra.mxu0 %v6304_v1  ;;  %13045 = vrot.lane.b32.xlu0 %v14741_v2, %s13386_s26  ;;  %v6608_v15 = vsel %vm16182_vm8, %v12902_v49, %v12892_v8  ;;  %vm16183_vm11 = vmmov %vm16182_vm8 }
 0x4ec   :  { %11909 = vmatprep.subr.bf16.mxu0 %v11908_v31  ;;  %8210 = vrot.lane.b32.xlu1 %v14674_v28, %s13386_s26  ;;  %v6614_v19 = vsel %vm16183_vm11, %v12903_v16, %v12897_v57  ;;  %vm16185_vm12 = vmmov %vm16182_vm8 }
 0x4ed   :  { %v15080_v56 = vpop.permute.xlu0 %12910  ;;  %6473 = vmatprep.mubr.f32.mxu0 %v13379_v0  ;;  %v11914_v1 = vpack.c.bf16 %v6614_v19, %v6608_v15  ;;  %v6621_v16 = vsel %vm16185_vm12, %v6597_v10, %v15062_v7  ;;  %vm16186_vm11 = vmmov %vm16182_vm8  ;;  %v15136_v19 = vld [vmem:[%s16000_s5 + $0x20] sm:$0xff] }
 0x4ee   :  { %v6289_v35 = vpop.permute.xlu1 %6288  ;;  %11637 = vmatmul.mubr.msk.f32.vlgmr.msra.gmra.mrb[12].mxu0 %vm16179_vm5, %v15036_v26  ;;  %v12912_v51 = vunpack.i.l.bf16 %v15080_v56 }
 0x4ef   :  { %11911 = vmatpush1.bf16.msra.mxu0 %v11910_v47  ;;  %8214 = vrot.lane.b32.xlu0 %v14747_v40, %s13386_s26  ;;  %v6307_v61 = vsel %vm16175_vm9, %v15006_v17, %v6289_v35  ;;  %v12913_v17 = vunpack.i.h.bf16 %v15080_v56  ;;  %vm16188_vm9 = vmmov %vm16184_vm13 }
 0x4f0   :  { %8208 = vrot.lane.b32.xlu1 %v14688_v30, %s13386_s26  ;;  %6490 = vmatprep.subr.mxu0 %v6307_v61 }
 0x4f1   :  { %v15094_v46 = vpop.permute.xlu0 %6600  ;;  %6479 = vmatprep.mubr.f32.mxu0 %v13379_v0 }
 0x4f2   :  { %v12906_v21 = vpop.permute.xlu1 %12905  ;;  %11638 = vmatmul.mubr.msk.f32.gmra.mrb[14].mxu0 %vm16179_vm5, %v15057_v42  ;;  %vm16187_vm5 = vmmov %vm16182_vm8 }
 0x4f3   :  { %6491 = vmatpush1.msra.mxu0 %v6306_v36  ;;  %13055 = vrot.lane.b32.xlu0 %v14898_v58, %s13386_s26  ;;  %v12908_v39 = vunpack.i.h.bf16 %v12906_v21  ;;  %v12907_v57 = vunpack.i.l.bf16 %v12906_v21  ;;  %vm16190_vm12 = vmmov %vm16187_vm5 }
 0x4f4   :  { %11913 = vmatprep.subr.bf16.mxu0 %v11912_v54  ;;  %13050 = vrot.lane.b32.xlu1 %v14767_v22, %s13386_s26 }
 0x4f5   :  { %v12921_v31 = vpop.permute.xlu0 %12920  ;;  %6550 = vmatprep.mubr.f32.mxu0 %v13379_v0  ;;  %v6610_v35 = vsel %vm16187_vm5, %v12893_v29, %v12908_v39  ;;  %v6616_v29 = vsel %vm16190_vm12, %v12898_v63, %v12913_v17  ;;  %vm16195_vm12 = vmmov %vm16187_vm5 }
 0x4f6   :  { %v12916_v8 = vpop.permute.xlu1 %12915  ;;  %11639 = vmatmul.mubr.msk.f32.vlgmr.msra.gmra.mrb[16].mxu0 %vm16184_vm13, %v15036_v26  ;;  %v6611_v26 = vsel %vm16182_vm8, %v12908_v39, %v12912_v51  ;;  %vm16189_vm13 = vmmov %vm16187_vm5  ;;  %v12922_v5 = vunpack.i.l.bf16 %v12921_v31  ;;  %v11918_v21 = vpack.c.bf16 %v6616_v29, %v6610_v35  ;;  %v15158_v39 = vld [vmem:[%s16000_s5 + $0x28] sm:$0xff] }
 0x4f7   :  { %v12917_v47 = vunpack.i.l.bf16 %v12916_v8  ;;  %11915 = vmatpush1.bf16.msra.mxu0 %v11914_v1  ;;  %13065 = vrot.lane.b32.xlu0 %v14690_v33, %s13387_s27  ;;  %v6620_v33 = vsel %vm16189_vm13, %v12907_v57, %v6597_v10  ;;  %v12918_v15 = vunpack.i.h.bf16 %v12916_v8  ;;  %vm16191_vm8 = vmmov %vm16188_vm9 }
 0x4f8   :  { %6654 = vmatprep.subr.mxu0 %v6621_v16  ;;  %8216 = vrot.lane.b32.xlu1 %v14774_v43, %s13386_s26  ;;  %vm16194_vm13 = vmmov %vm16187_vm5 }
 0x4f9   :  { %v15120_v49 = vpop.permute.xlu0 %6604  ;;  %6556 = vmatprep.mubr.f32.mxu0 %v13379_v0  ;;  %v6617_v56 = vsel %vm16186_vm11, %v12913_v17, %v12917_v47  ;;  %vm16192_vm11 = vmmov %vm16187_vm5  ;;  %v6612_v57 = vsel %vm16194_vm13, %v12912_v51, %v12918_v15  ;;  %vm16198_vm13 = vcmask 7168  }
 0x4fa   :  { %v15126_v61 = vpop.permute.xlu1 %6602  ;;  %11640 = vmatmul.mubr.msk.f32.gmra.mrb[18].mxu0 %vm16188_vm9, %v15057_v42  ;;  %v11916_v14 = vpack.c.bf16 %v6617_v56, %v6611_v26  ;;  %v12923_v42 = vunpack.i.h.bf16 %v12921_v31  ;;  %v6613_v54 = vsel %vm16192_vm11, %v12918_v15, %v12922_v5  ;;  %vm16193_vm9 = vmmov %vm16187_vm5 }
 0x4fb   :  { %6655 = vmatpush1.msra.mxu0 %v6620_v33  ;;  %8218 = vrot.lane.b32.xlu0 %v14796_v52, %s13386_s26  ;;  %v6623_v63 = vsel %vm16193_vm9, %v15094_v46, %v15126_v61  ;;  %vm16196_vm11 = vmmov %vm16187_vm5 }
 0x4fc   :  { %13060 = vrot.lane.b32.xlu1 %v14916_v25, %s13386_s26  ;;  %11917 = vmatprep.subr.bf16.mxu0 %v11916_v14  ;;  %v6622_v17 = vsel %vm16196_vm11, %v15062_v7, %v15094_v46 }
 0x4fd   :  { %v15143_v10 = vpop.permute.xlu0 %12925  ;;  %6714 = vmatprep.mubr.f32.mxu0 %v13379_v0 }
 0x4fe   :  { %v6593_v36 = vpop.permute.xlu1 %6592  ;;  %11643 = vmatmul.mubr.msk.f32.vlgmr.msra.gmra.mrb[8].mxu0 %vm16191_vm8, %v15136_v19  ;;  %v12928_v51 = vunpack.i.h.bf16 %v15143_v10 }
 0x4ff   :  { %v6619_v32 = vsel %vm16187_vm5, %v12923_v42, %v6593_v36  ;;  %11919 = vmatpush1.bf16.msra.mxu0 %v11918_v21  ;;  %13075 = vrot.lane.b32.xlu0 %v14655_v62, %s13387_s27  ;;  %v6618_v62 = vsel %vm16195_vm12, %v12917_v47, %v12923_v42  ;;  %v12927_v47 = vunpack.i.l.bf16 %v15143_v10  ;;  %vm16197_vm5 = vmmov %vm16191_vm8  ;;  %v6624_v42 = vsel %vm16193_vm9, %v15126_v61, %v15120_v49 }
 0x500   :  { %v11920_v31 = vpack.c.bf16 %v6619_v32, %v6613_v54  ;;  %6731 = vmatprep.subr.mxu0 %v6623_v63  ;;  %8220 = vrot.lane.b32.xlu1 %v13379_v0, %s13386_s26  ;;  %v11922_v7 = vpack.c.bf16 %v6618_v62, %v6612_v57  ;;  %vm16199_vm12 = vmmov %vm16198_vm13 }
 0x501   :  { %v12936_v1 = vpop.permute.xlu0 %12935  ;;  %6720 = vmatprep.mubr.f32.mxu0 %v13379_v0  ;;  %v6939_v5 = vsel %vm16199_vm12, %v12927_v47, %v12928_v51 }
 0x502   :  { %v15165_v8 = vpop.permute.xlu1 %12930  ;;  %11644 = vmatmul.mubr.msk.f32.gmra.mrb[10].mxu0 %vm16191_vm8, %v15158_v39  ;;  %v12938_v46 = vunpack.i.h.bf16 %v12936_v1  ;;  %v12937_v35 = vunpack.i.l.bf16 %v12936_v1  ;;  %vm16200_vm8 = vmmov %vm16199_vm12 }
 0x503   :  { %v12933_v16 = vunpack.i.h.bf16 %v15165_v8  ;;  %v12932_v26 = vunpack.i.l.bf16 %v15165_v8  ;;  %6732 = vmatpush1.msra.mxu0 %v6622_v17  ;;  %8542 = vrot.lane.b32.xlu0 %v14728_v50, %s13387_s27  ;;  %vm16201_vm11 = vmmov %vm16200_vm8 }
 0x504   :  { %11921 = vmatprep.subr.bf16.mxu0 %v11920_v31  ;;  %13070 = vrot.lane.b32.xlu1 %v14713_v34, %s13387_s27  ;;  %v6938_v15 = vsel %vm16200_vm8, %v12937_v35, %v12927_v47  ;;  %vm16203_vm12 = vmmov %vm16200_vm8 }
 0x505   :  { %v15180_v56 = vpop.permute.xlu0 %6928  ;;  %6791 = vmatprep.mubr.f32.mxu0 %v13379_v0  ;;  %v6945_v50 = vsel %vm16198_vm13, %v12932_v26, %v12933_v16  ;;  %vm16202_vm13 = vmmov %vm16197_vm5 }
 0x506   :  { %v6607_v33 = vpop.permute.xlu1 %6606  ;;  %11645 = vmatmul.mubr.msk.f32.vlgmr.msra.gmra.mrb[12].mxu0 %vm16197_vm5, %v15136_v19  ;;  %v11924_v10 = vpack.c.bf16 %v6945_v50, %v6939_v5 }
 0x507   :  { %11923 = vmatpush1.bf16.msra.mxu0 %v11922_v7  ;;  %13080 = vrot.lane.b32.xlu0 %v14741_v2, %s13387_s27  ;;  %v6625_v34 = vsel %vm16193_vm9, %v15120_v49, %v6607_v33  ;;  %v6944_v2 = vsel %vm16201_vm11, %v12938_v46, %v12932_v26  ;;  %vm16204_vm11 = vmmov %vm16197_vm5  ;;  %v11650_v46 = vld [vmem:[%s16000_s5 + $0x38] sm:$0xff] }
 0x508   :  { %8540 = vrot.lane.b32.xlu1 %v14674_v28, %s13387_s27  ;;  %6808 = vmatprep.subr.mxu0 %v6625_v34  ;;  %v11926_v21 = vpack.c.bf16 %v6944_v2, %v6938_v15 }
 0x509   :  { %v12946_v14 = vpop.permute.xlu0 %12945  ;;  %6797 = vmatprep.mubr.f32.mxu0 %v13379_v0 }
 0x50a   :  { %v6927_v29 = vpop.permute.xlu1 %6926  ;;  %11646 = vmatmul.mubr.msk.f32.gmra.mrb[14].mxu0 %vm16197_vm5, %v15158_v39  ;;  %v12948_v32 = vunpack.i.h.bf16 %v12946_v14  ;;  %v12947_v63 = vunpack.i.l.bf16 %v12946_v14  ;;  %vm16205_vm5 = vmmov %vm16200_vm8 }
 0x50b   :  { %6809 = vmatpush1.msra.mxu0 %v6624_v42  ;;  %8544 = vrot.lane.b32.xlu0 %v14747_v40, %s13387_s27  ;;  %v6951_v40 = vsel %vm16203_vm12, %v6927_v29, %v15180_v56  ;;  %vm16206_vm9 = vmmov %vm16205_vm5 }
 0x50c   :  { %11925 = vmatprep.subr.bf16.mxu0 %v11924_v10  ;;  %8538 = vrot.lane.b32.xlu1 %v14688_v30, %s13387_s27  ;;  %vm16208_vm12 = vmmov %vm16205_vm5 }
 0x50d   :  { %v6931_v28 = vpop.permute.xlu0 %6930  ;;  %6868 = vmatprep.mubr.f32.mxu0 %v13379_v0  ;;  %v6946_v62 = vsel %vm16208_vm12, %v12933_v16, %v12948_v32  ;;  %vm16213_vm12 = vmmov %vm16205_vm5 }
 0x50e   :  { %v12941_v36 = vpop.permute.xlu1 %12940  ;;  %11647 = vmatmul.mubr.msk.f32.vlgmr.msra.gmra.mrb[16].mxu0 %vm16202_vm13, %v15136_v19  ;;  %vm16207_vm13 = vmmov %vm16205_vm5 }
 0x50f   :  { %v12942_v54 = vunpack.i.l.bf16 %v12941_v36  ;;  %11927 = vmatpush1.bf16.msra.mxu0 %v11926_v21  ;;  %13090 = vrot.lane.b32.xlu0 %v14898_v58, %s13387_s27  ;;  %v12943_v49 = vunpack.i.h.bf16 %v12941_v36 }
 0x510   :  { %6984 = vmatprep.subr.mxu0 %v6951_v40  ;;  %13085 = vrot.lane.b32.xlu1 %v14767_v22, %s13387_s27  ;;  %v11649_v22 = vld [vmem:[%s16000_s5 + $0x30] sm:$0xff]  ;;  %v16221_v40 = vmax.f32 %v14653_v60, 0.0 }
 0x511   :  { %v12956_v30 = vpop.permute.xlu0 %12955  ;;  %6874 = vmatprep.mubr.f32.mxu0 %v13379_v0  ;;  %v6950_v61 = vsel %vm16200_vm8, %v12942_v54, %v6927_v29  ;;  %v6940_v31 = vsel %vm16205_vm5, %v12928_v51, %v12943_v49  ;;  %v6941_v57 = vsel %vm16206_vm9, %v12943_v49, %v12947_v63  ;;  %vm16209_vm8 = vmmov %vm16204_vm11  ;;  %v8838_v29 = vld [vmem:[%s16001_s6 + $0x8] sm:$0xff] }
 0x512   :  { %v12951_v19 = vpop.permute.xlu1 %12950  ;;  %11648 = vmatmul.mubr.msk.f32.gmra.mrb[18].mxu0 %vm16204_vm11, %v15158_v39  ;;  %v8837_v39 = vld [vmem:[%s16001_s6] sm:$0xff]  ;;  %v12958_v17 = vunpack.i.h.bf16 %v12956_v30  ;;  %v12957_v47 = vunpack.i.l.bf16 %v12956_v30  ;;  %v11930_v7 = vpack.c.bf16 %v6946_v62, %v6940_v31  ;;  %vm16210_vm11 = vmmov %vm16205_vm5  ;;  %v16223_v30 = vmax.f32 %v14658_v3, 0.0  ;;  %v11658_v3 = vld [vmem:[%s16000_s5 + $0x48] sm:$0xff] }
 0x513   :  { %v12952_v58 = vunpack.i.l.bf16 %v12951_v19  ;;  %6985 = vmatpush1.msra.mxu0 %v6950_v61  ;;  %8548 = vrot.lane.b32.xlu0 %v14796_v52, %s13387_s27  ;;  %v12953_v26 = vunpack.i.h.bf16 %v12951_v19  ;;  %vm16211_vm9 = vmmov %vm16205_vm5 }
 0x514   :  { %8546 = vrot.lane.b32.xlu1 %v14774_v43, %s13387_s27  ;;  %7044 = vmatprep.mubr.f32.mxu0 %v13379_v0 }
 0x515   :  { %v6935_v1 = vpop.permute.xlu0 %6934  ;;  %v6947_v52 = vsel %vm16207_vm13, %v12948_v32, %v12952_v58  ;;  %v6942_v35 = vsel %vm16205_vm5, %v12947_v63, %v12953_v26  ;;  %v6948_v33 = vsel %vm16211_vm9, %v12952_v58, %v12958_v17  ;;  %vm16212_vm13 = vmmov %vm16209_vm8  ;;  %v6943_v50 = vsel %vm16213_vm12, %v12953_v26, %v12957_v47  ;;  %v16233_v47 = vld [vmem:[#allocation4_spill] sm:$0xff] }
 0x516   :  { %v6933_v51 = vpop.permute.xlu1 %6932  ;;  %11651 = vmatmul.mubr.msk.f32.vlgmr.msra.gmra.mrb[8].mxu0 %vm16209_vm8, %v11649_v22  ;;  %v11928_v43 = vpack.c.bf16 %v6947_v52, %v6941_v57  ;;  %vm16214_vm8 = vmmov %vm16205_vm5  ;;  %v11934_v2 = vpack.c.bf16 %v6948_v33, %v6942_v35  ;;  %v16224_v32 = vmax.f32 %v14710_v20, 0.0  ;;  %v16226_v58 = vmax.f32 %v14699_v4, 0.0 }
 0x517   :  { %8841 = vperm.xlu0 %12537, %v8837_v39   ;;  %7050 = vmatprep.mubr.f32.mxu0 %v13379_v0  ;;  %v6953_v16 = vsel %vm16210_vm11, %v6931_v28, %v6933_v51  ;;  %vm16215_vm11 = vmmov %vm16205_vm5  ;;  %v16230_v57 = vmax.f32 %v14777_v44, 0.0  ;;  %v16234_v44 = vmax.f32 %v16233_v47, 0.0 }
 0x518   :  { %13095 = vrot.lane.b32.xlu1 %v14916_v25, %s13387_s27  ;;  %11929 = vmatprep.subr.bf16.mxu0 %v11928_v43  ;;  %v6952_v5 = vsel %vm16215_vm11, %v15180_v56, %v6931_v28  ;;  %vm16216_vm5 = vmmov %vm16212_vm13 }
 0x519   :  { %v15244_v8 = vpop.permute.xlu0 %12960  ;;  %11931 = vmatpush1.bf16.msra.mxu0 %v11930_v7  ;;  %vm16217_vm9 = vmmov %vm16214_vm8  ;;  %v16235_v7 = vld [vmem:[#allocation3_spill] sm:$0xff] }
 0x51a   :  { %v6923_v34 = vpop.permute.xlu1 %6922  ;;  %11652 = vmatmul.mubr.msk.f32.gmra.mrb[10].mxu0 %vm16212_vm13, %v11650_v46  ;;  %7061 = vmatprep.subr.mxu0 %v6953_v16  ;;  %vm16218_vm13 = vmmov %vm16216_vm5  ;;  %v12963_v20 = vunpack.i.h.bf16 %v15244_v8 }
 0x51b   :  { %v6949_v14 = vsel %vm16214_vm8, %v12958_v17, %v6923_v34  ;;  %7121 = vmatprep.mubr.f32.mxu0 %v13379_v0  ;;  %vm16219_vm12 = vmmov %vm16214_vm8  ;;  %13100 = vrot.lane.b32.xlu0 %v13379_v0, %s13381_s20 }
 0x51c   :  { %v11932_v25 = vpack.c.bf16 %v6949_v14, %v6943_v50  ;;  %8550 = vrot.lane.b32.xlu1 %v13379_v0, %s13387_s27  ;;  %v6954_v21 = vsel %vm16219_vm12, %v6933_v51, %v6935_v1  ;;  %vm16220_vm8 = vmmov %vm16216_vm5  ;;  %vm16228_vm12 = vnez %v16109_v6 }
 0x51d   :  { %v15257_v15 = vpop.permute.xlu0 %12970  ;;  %7062 = vmatpush1.msra.mxu0 %v6952_v5  ;;  %vm16222_vm11 = vmmov %vm16216_vm5 }
 0x51e   :  { %v6937_v42 = vpop.permute.xlu1 %6936  ;;  %11653 = vmatmul.mubr.msk.f32.vlgmr.msra.gmra.mrb[12].mxu0 %vm16216_vm5, %v11649_v22  ;;  %11933 = vmatprep.subr.bf16.mxu0 %v11932_v25 }
 0x51f   :  { %11935 = vmatpush1.bf16.msra.mxu0 %v11934_v2  ;;  %v6955_v10 = vsel %vm16217_vm9, %v6935_v1, %v6937_v42  ;;  %7127 = vmatprep.mubr.f32.mxu0 %v13379_v0  ;;  %vm16225_vm9 = vmmov %vm16216_vm5  ;;  %v12973_v1 = vunpack.i.h.bf16 %v15257_v15 }
 0x520   :  { %8846 = vperm.xlu1 %12538, %v8838_v29   ;;  %7138 = vmatprep.subr.mxu0 %v6955_v10 }
 0x521   :  { %v15265_v56 = vpop.permute.xlu0 %7552 }
 0x522   :  { %v15267_v28 = vpop.permute.xlu1 %12965  ;;  %11654 = vmatmul.mubr.msk.f32.gmra.mrb[14].mxu0 %vm16218_vm13, %v11650_v46  ;;  %vm16227_vm13 = vmmov %vm16216_vm5 }
 0x523   :  { %7139 = vmatpush1.msra.mxu0 %v6954_v21  ;;  %7198 = vmatprep.mubr.f32.mxu0 %v13379_v0  ;;  %v12968_v63 = vunpack.i.h.bf16 %v15267_v28  ;;  %v11665_v21 = vld [vmem:[%s16000_s5 + $0x50] sm:$0xff] }
 0x524   :  { %11938 = vmatprep.subr.msk.bf16.mxu0 %vm14371_vm14, %v14650_v59  ;;  %13105 = vrot.lane.b32.xlu1 %v13379_v0, %s13383_s0 }
 0x525   :  { %v15275_v36 = vpop.permute.xlu0 %12975 }
 0x526   :  { %v15277_v54 = vpop.permute.xlu1 %7550  ;;  %11655 = vmatmul.mubr.msk.f32.vlgmr.msra.gmra.mrb[16].mxu0 %vm16220_vm8, %v11649_v22  ;;  %v12962_v22 = vunpack.i.l.bf16 %v15244_v8  ;;  %vm16229_vm8 = vcmask 1039360   ;;  %v12978_v8 = vunpack.i.h.bf16 %v15275_v36  ;;  %v12977_v16 = vunpack.i.l.bf16 %v15275_v36 }
 0x527   :  { %11941 = vmatpush1.bf16.msk.msra.mxu0 %vm14387_vm6, %v14644_v55  ;;  %7204 = vmatprep.mubr.f32.mxu0 %v13379_v0  ;;  %v11657_v55 = vld [vmem:[%s16000_s5 + $0x40] sm:$0xff] }
 0x528   :  { %11748 = vmatprep.subr.msk.mxu0 %vm14024_vm2, %v16221_v40 }
 0x529   :  { %v15288_v49 = vpop.permute.xlu0 %7554 }
 0x52a   :  { %v7549_v59 = vpop.permute.xlu1 %7548  ;;  %11656 = vmatmul.mubr.msk.f32.gmra.mrb[18].mxu0 %vm16222_vm11, %v11650_v46  ;;  %vm16231_vm11 = vmmov %vm16229_vm8 }
 0x52b   :  { %11749 = vmatpush1.msk.msra.mxu0 %vm14014_vm3, %v16223_v30  ;;  %7296 = vmatprep.mubr.f32.mxu0 %v13379_v0  ;;  %v7563_v62 = vsel %vm16231_vm11, %v12962_v22, %v12963_v20  ;;  %vm16238_vm11 = vmmov %vm16225_vm9 }
 0x52c   :  { %11944 = vmatprep.subr.msk.bf16.mxu0 %vm14394_vm7, %v14705_v41 }
 0x52d   :  { %v15302_v60 = vpop.permute.xlu0 %12985 }
 0x52e   :  { %v15304_v61 = vpop.permute.xlu1 %12980  ;;  %11659 = vmatmul.mubr.msk.f32.vlgmr.msra.gmra.mrb[8].mxu0 %vm16216_vm5, %v11657_v55  ;;  %vm16232_vm5 = vmmov %vm16229_vm8  ;;  %v12987_v40 = vunpack.i.l.bf16 %v15302_v60 }
 0x52f   :  { %11947 = vmatpush1.bf16.msk.msra.mxu0 %vm14416_vm15, %v14696_v37  ;;  %7302 = vmatprep.mubr.f32.mxu0 %v13379_v0  ;;  %v12967_v37 = vunpack.i.l.bf16 %v15267_v28  ;;  %v12983_v51 = vunpack.i.h.bf16 %v15304_v61  ;;  %v12982_v43 = vunpack.i.l.bf16 %v15304_v61  ;;  %v7575_v50 = vsel %vm16232_vm5, %v15277_v54, %v15265_v56 }
 0x530   :  { %11754 = vmatprep.subr.msk.mxu0 %vm14112_vm0, %v16224_v32 }
 0x531   :  { %v15318_v41 = vpop.permute.xlu0 %12995  ;;  %v7569_v4 = vsel %vm16229_vm8, %v12967_v37, %v12968_v63  ;;  %v7568_v17 = vsel %vm16232_vm5, %v12973_v1, %v12967_v37  ;;  %vm16237_vm8 = vmmov %vm16232_vm5 }
 0x532   :  { %v15320_v19 = vpop.permute.xlu1 %7556  ;;  %11660 = vmatmul.mubr.msk.f32.gmra.mrb[10].mxu0 %vm16225_vm9, %v11658_v3  ;;  %v11954_v26 = vpack.c.bf16 %v7569_v4, %v7563_v62 }
 0x533   :  { %11755 = vmatpush1.msk.msra.mxu0 %vm14101_vm10, %v16226_v58  ;;  %7373 = vmatprep.mubr.f32.mxu0 %v13379_v0 }
 0x534   :  { %11950 = vmatprep.subr.msk.bf16.mxu0 %vm14423_vm4, %v14762_v13  ;;  %v12972_v13 = vunpack.i.l.bf16 %v15257_v15  ;;  %vm16242_vm4 = vmmov %vm16232_vm5 }
 0x535   :  { %v15335_v31 = vpop.permute.xlu0 %13005  ;;  %v7570_v2 = vsel %vm16242_vm4, %v12968_v63, %v12982_v43 }
 0x536   :  { %v12991_v39 = vpop.permute.xlu1 %12990  ;;  %11661 = vmatmul.mubr.msk.f32.vlgmr.msra.gmra.mrb[12].mxu0 %vm16227_vm13, %v11657_v55  ;;  %vm16236_vm13 = vnez %v16235_v7  ;;  %v7562_v46 = vsel %vm16237_vm8, %v12972_v13, %v12962_v22  ;;  %vm16240_vm8 = vmmov %vm16232_vm5  ;;  %v12998_v13 = vunpack.i.h.bf16 %v15318_v41 }
 0x537   :  { %11953 = vmatpush1.bf16.msk.msra.mxu0 %vm16228_vm12, %v14755_v24  ;;  %7379 = vmatprep.mubr.f32.mxu0 %v13379_v0  ;;  %v11956_v33 = vpack.c.bf16 %v7568_v17, %v7562_v46  ;;  %v7565_v5 = vsel %vm16240_vm8, %v12977_v16, %v12978_v8  ;;  %vm16241_vm12 = vmmov %vm16232_vm5  ;;  %v12993_v10 = vunpack.i.h.bf16 %v12991_v39  ;;  %v12992_v28 = vunpack.i.l.bf16 %v12991_v39 }
 0x538   :  { %11760 = vmatprep.subr.msk.mxu0 %vm14066_vm1, %v16230_v57  ;;  %v7574_v15 = vsel %vm16241_vm12, %v7549_v59, %v15277_v54  ;;  %v12988_v54 = vunpack.i.h.bf16 %v15302_v60  ;;  %v12997_v57 = vunpack.i.l.bf16 %v15318_v41  ;;  %v13007_v41 = vunpack.i.l.bf16 %v15335_v31 }
 0x539   :  { %v15349_v52 = vpop.permute.xlu0 %7882 }
 0x53a   :  { %v15353_v24 = vpop.permute.xlu1 %7560  ;;  %11662 = vmatmul.mubr.msk.f32.gmra.mrb[14].mxu0 %vm16225_vm9, %v11658_v3  ;;  %vm16239_vm9 = vmmov %vm16232_vm5 }
 0x53b   :  { %11761 = vmatpush1.msk.msra.mxu0 %vm16236_vm13, %v16234_v44  ;;  %7450 = vmatprep.mubr.f32.mxu0 %v13379_v0  ;;  %v7571_v14 = vsel %vm16239_vm9, %v12982_v43, %v12983_v51  ;;  %vm16243_vm5 = vmmov %vm16242_vm4 }
 0x53c   :  { %11955 = vmatprep.subr.bf16.mxu0 %v11954_v26  ;;  %v11958_v42 = vpack.c.bf16 %v7571_v14, %v7565_v5  ;;  %v7564_v36 = vsel %vm16243_vm5, %v12963_v20, %v12977_v16  ;;  %vm16244_vm4 = vmmov %vm16238_vm11 }
 0x53d   :  { %v15366_v35 = vpop.permute.xlu0 %7558  ;;  %v11960_v30 = vpack.c.bf16 %v7570_v2, %v7564_v36  ;;  %vm16245_vm12 = vmmov %vm16243_vm5 }
 0x53e   :  { %v15368_v34 = vpop.permute.xlu1 %13000  ;;  %11663 = vmatmul.mubr.msk.f32.vlgmr.msra.gmra.mrb[16].mxu0 %vm16238_vm11, %v11657_v55  ;;  %v7577_v61 = vsel %vm16245_vm12, %v15288_v49, %v15320_v19  ;;  %vm16246_vm9 = vmmov %vm16243_vm5 }
 0x53f   :  { %11957 = vmatpush1.bf16.msra.mxu0 %v11956_v33  ;;  %7456 = vmatprep.mubr.f32.mxu0 %v13379_v0  ;;  %v7573_v32 = vsel %vm16246_vm9, %v12992_v28, %v12993_v10  ;;  %vm16247_vm8 = vmmov %vm16243_vm5  ;;  %v13003_v39 = vunpack.i.h.bf16 %v15368_v34  ;;  %v13002_v4 = vunpack.i.l.bf16 %v15368_v34 }
 0x540   :  { %7608 = vmatprep.subr.mxu0 %v7575_v50  ;;  %v7567_v63 = vsel %vm16247_vm8, %v12987_v40, %v12988_v54 }
 0x541   :  { %v15376_v25 = vpop.permute.xlu0 %13010  ;;  %v11962_v22 = vpack.c.bf16 %v7573_v32, %v7567_v63 }
 0x542   :  { %v15382_v29 = vpop.permute.xlu1 %7880  ;;  %11664 = vmatmul.mubr.msk.f32.gmra.mrb[18].mxu0 %vm16238_vm11, %v11658_v3  ;;  %v11666_v3 = vld [vmem:[%s16000_s5 + $0x58] sm:$0xff]  ;;  %vm16248_vm11 = vmmov %vm16243_vm5  ;;  %v13013_v34 = vunpack.i.h.bf16 %v15376_v25 }
 0x543   :  { %7609 = vmatpush1.msra.mxu0 %v7574_v15  ;;  %7668 = vmatprep.mubr.f32.mxu0 %v13379_v0  ;;  %v7572_v37 = vsel %vm16248_vm11, %v12983_v51, %v12992_v28  ;;  %vm16249_vm5 = vmmov %vm16244_vm4  ;;  %vm16254_vm11 = vcmask 908288   ;;  %v13008_v51 = vunpack.i.h.bf16 %v15335_v31 }
 0x544   :  { %11959 = vmatprep.subr.bf16.mxu0 %v11958_v42  ;;  %vm16252_vm9 = vmmov %vm16249_vm5 }
 0x545   :  { %v15392_v59 = vpop.permute.xlu0 %7884 }
 0x546   :  { %v7879_v55 = vpop.permute.xlu1 %7878  ;;  %11667 = vmatmul.mubr.msk.f32.vlgmr.msra.gmra.mrb[8].mxu0 %vm16244_vm4, %v11665_v21  ;;  %vm16250_vm4 = vmmov %vm16247_vm8 }
 0x547   :  { %11961 = vmatpush1.bf16.msra.mxu0 %v11960_v30  ;;  %7674 = vmatprep.mubr.f32.mxu0 %v13379_v0  ;;  %v7576_v20 = vsel %vm16250_vm4, %v15265_v56, %v15288_v49  ;;  %vm16251_vm12 = vmmov %vm16250_vm4  ;;  %v7899_v49 = vsel %vm16254_vm11, %v13002_v4, %v13003_v39  ;;  %v7578_v44 = vsel %vm16250_vm4, %v15320_v19, %v15366_v35  ;;  %v13012_v19 = vunpack.i.l.bf16 %v15376_v25 }
 0x548   :  { %7685 = vmatprep.subr.mxu0 %v7577_v61  ;;  %v7566_v1 = vsel %vm16251_vm12, %v12978_v8, %v12987_v40  ;;  %vm16253_vm8 = vmmov %vm16250_vm4  ;;  %v11673_v40 = vld [vmem:[%s16000_s5 + $0x60] sm:$0xff] }
 0x549   :  { %v15403_v60 = vpop.permute.xlu0 %13020  ;;  %v11964_v17 = vpack.c.bf16 %v7572_v37, %v7566_v1  ;;  %v7579_v56 = vsel %vm16253_vm8, %v15366_v35, %v15353_v24  ;;  %v11674_v37 = vld [vmem:[%s16000_s5 + $0x68] sm:$0xff] }
 0x54a   :  { %v15407_v58 = vpop.permute.xlu1 %13015  ;;  %11668 = vmatmul.mubr.msk.f32.gmra.mrb[10].mxu0 %vm16249_vm5, %v11666_v3  ;;  %vm16255_vm5 = vmmov %vm16254_vm11 }
 0x54b   :  { %7686 = vmatpush1.msra.mxu0 %v7576_v20  ;;  %7745 = vmatprep.mubr.f32.mxu0 %v13379_v0  ;;  %v7893_v47 = vsel %vm16255_vm5, %v12997_v57, %v12998_v13  ;;  %vm16256_vm12 = vmmov %vm16255_vm5  ;;  %v13018_v16 = vunpack.i.h.bf16 %v15407_v58  ;;  %v13017_v33 = vunpack.i.l.bf16 %v15407_v58  ;;  %v7905_v5 = vsel %vm16255_vm5, %v15382_v29, %v15349_v52 }
 0x54c   :  { %11963 = vmatprep.subr.bf16.mxu0 %v11962_v22  ;;  %v7898_v46 = vsel %vm16256_vm12, %v13008_v51, %v13002_v4  ;;  %v11966_v8 = vpack.c.bf16 %v7899_v49, %v7893_v47  ;;  %vm16257_vm8 = vmmov %vm16255_vm5 }
 0x54d   :  { %v15419_v62 = vpop.permute.xlu0 %13030  ;;  %v7892_v31 = vsel %vm16257_vm8, %v13007_v41, %v12997_v57  ;;  %vm16258_vm11 = vmmov %vm16252_vm9 }
 0x54e   :  { %v15421_v26 = vpop.permute.xlu1 %7886  ;;  %11669 = vmatmul.mubr.msk.f32.vlgmr.msra.gmra.mrb[12].mxu0 %vm16252_vm9, %v11665_v21  ;;  %v11968_v50 = vpack.c.bf16 %v7898_v46, %v7892_v31  ;;  %vm16259_vm4 = vmmov %vm16255_vm5 }
 0x54f   :  { %11965 = vmatpush1.bf16.msra.mxu0 %v11964_v17  ;;  %7751 = vmatprep.mubr.f32.mxu0 %v13379_v0  ;;  %v7901_v15 = vsel %vm16259_vm4, %v13017_v33, %v13018_v16  ;;  %vm16260_vm12 = vmmov %vm16259_vm4 }
 0x550   :  { %7762 = vmatprep.subr.mxu0 %v7579_v56  ;;  %v7895_v25 = vsel %vm16260_vm12, %v13012_v19, %v13013_v34  ;;  %vm16262_vm8 = vmmov %vm16259_vm4  ;;  %v13033_v56 = vunpack.i.h.bf16 %v15419_v62 }
 0x551   :  { %v15431_v43 = vpop.permute.xlu0 %13040  ;;  %v7900_v10 = vsel %vm16262_vm8, %v13003_v39, %v13017_v33  ;;  %vm16263_vm5 = vmmov %vm16259_vm4 }
 0x552   :  { %v13026_v24 = vpop.permute.xlu1 %13025  ;;  %11670 = vmatmul.mubr.msk.f32.gmra.mrb[14].mxu0 %vm16252_vm9, %v11666_v3  ;;  %vm16261_vm9 = vmmov %vm16259_vm4  ;;  %v7894_v30 = vsel %vm16263_vm5, %v12998_v13, %v13012_v19  ;;  %v13042_v46 = vunpack.i.l.bf16 %v15431_v43 }
 0x553   :  { %7763 = vmatpush1.msra.mxu0 %v7578_v44  ;;  %7822 = vmatprep.mubr.f32.mxu0 %v13379_v0  ;;  %v7904_v42 = vsel %vm16261_vm9, %v7879_v55, %v15382_v29  ;;  %v13028_v36 = vunpack.i.h.bf16 %v13026_v24  ;;  %v13027_v54 = vunpack.i.l.bf16 %v13026_v24  ;;  %v13023_v29 = vunpack.i.h.bf16 %v15403_v60  ;;  %vm16264_vm4 = vmmov %vm16258_vm11 }
 0x554   :  { %11967 = vmatprep.subr.bf16.mxu0 %v11966_v8  ;;  %v13022_v55 = vunpack.i.l.bf16 %v15403_v60  ;;  %v11972_v61 = vpack.c.bf16 %v7900_v10, %v7894_v30  ;;  %vm16265_vm12 = vmmov %vm16263_vm5  ;;  %v13043_v44 = vunpack.i.h.bf16 %v15431_v43 }
 0x555   :  { %v15445_v35 = vpop.permute.xlu0 %7888  ;;  %v7907_v63 = vsel %vm16265_vm12, %v15392_v59, %v15421_v26  ;;  %vm16266_vm9 = vmmov %vm16263_vm5  ;;  %v7902_v39 = vsel %vm16263_vm5, %v13018_v16, %v13027_v54 }
 0x556   :  { %v7891_v14 = vpop.permute.xlu1 %7890  ;;  %11671 = vmatmul.mubr.msk.f32.vlgmr.msra.gmra.mrb[16].mxu0 %vm16258_vm11, %v11665_v21  ;;  %v11970_v21 = vpack.c.bf16 %v7901_v15, %v7895_v25  ;;  %v7903_v58 = vsel %vm16266_vm9, %v13027_v54, %v13028_v36  ;;  %vm16267_vm8 = vmmov %vm16263_vm5 }
 0x557   :  { %11969 = vmatpush1.bf16.msra.mxu0 %v11968_v50  ;;  %7828 = vmatprep.mubr.f32.mxu0 %v13379_v0  ;;  %v7897_v20 = vsel %vm16267_vm8, %v13022_v55, %v13023_v29  ;;  %vm16269_vm12 = vmmov %vm16263_vm5  ;;  %v11681_v29 = vld [vmem:[%s16000_s5 + $0x70] sm:$0xff] }
 0x558   :  { %7938 = vmatprep.subr.mxu0 %v7905_v5  ;;  %v11974_v1 = vpack.c.bf16 %v7903_v58, %v7897_v20  ;;  %v7896_v17 = vsel %vm16269_vm12, %v13013_v34, %v13022_v55  ;;  %vm16270_vm9 = vmmov %vm16264_vm4  ;;  %v11682_v58 = vld [vmem:[%s16000_s5 + $0x78] sm:$0xff] }
 0x559   :  { %v15453_v2 = vpop.permute.xlu0 %8212  ;;  %vm16271_vm8 = vmmov %vm16263_vm5 }
 0x55a   :  { %v15459_v28 = vpop.permute.xlu1 %13035  ;;  %11672 = vmatmul.mubr.msk.f32.gmra.mrb[18].mxu0 %vm16258_vm11, %v11666_v3  ;;  %vm16268_vm11 = vmmov %vm16263_vm5  ;;  %v7909_v41 = vsel %vm16271_vm8, %v15445_v35, %v7891_v14 }
 0x55b   :  { %7939 = vmatpush1.msra.mxu0 %v7904_v42  ;;  %7998 = vmatprep.mubr.f32.mxu0 %v13379_v0  ;;  %v7906_v22 = vsel %vm16268_vm11, %v15349_v52, %v15392_v59  ;;  %v13038_v13 = vunpack.i.h.bf16 %v15459_v28  ;;  %v13037_v57 = vunpack.i.l.bf16 %v15459_v28  ;;  %v13032_v52 = vunpack.i.l.bf16 %v15419_v62 }
 0x55c   :  { %11971 = vmatprep.subr.bf16.mxu0 %v11970_v21  ;;  %v11976_v59 = vpack.c.bf16 %v7902_v39, %v7896_v17  ;;  %vm16272_vm11 = vcmask 900096  }
 0x55d   :  { %v15469_v32 = vpop.permute.xlu0 %13045  ;;  %v8229_v47 = vsel %vm16272_vm11, %v13037_v57, %v13038_v13  ;;  %vm16273_vm5 = vmmov %vm16272_vm11 }
 0x55e   :  { %v8211_v3 = vpop.permute.xlu1 %8210  ;;  %11675 = vmatmul.mubr.msk.f32.vlgmr.msra.gmra.mrb[8].mxu0 %vm16264_vm4, %v11673_v40  ;;  %v8223_v24 = vsel %vm16273_vm5, %v13032_v52, %v13033_v56  ;;  %vm16275_vm12 = vmmov %vm16273_vm5 }
 0x55f   :  { %11973 = vmatpush1.bf16.msra.mxu0 %v11972_v61  ;;  %8004 = vmatprep.mubr.f32.mxu0 %v13379_v0  ;;  %v8228_v16 = vsel %vm16275_vm12, %v13043_v44, %v13037_v57  ;;  %v11978_v31 = vpack.c.bf16 %v8229_v47, %v8223_v24  ;;  %vm16277_vm11 = vmmov %vm16270_vm9  ;;  %v8235_v15 = vsel %vm16273_vm5, %v8211_v3, %v15453_v2 }
 0x560   :  { %8015 = vmatprep.subr.mxu0 %v7907_v63  ;;  %vm16282_vm15 = vmmov %vm16277_vm11 }
 0x561   :  { %v15480_v60 = vpop.permute.xlu0 %8214 }
 0x562   :  { %v8209_v4 = vpop.permute.xlu1 %8208  ;;  %11676 = vmatmul.mubr.msk.f32.gmra.mrb[10].mxu0 %vm16264_vm4, %v11674_v37  ;;  %vm16274_vm4 = vmmov %vm16271_vm8 }
 0x563   :  { %8016 = vmatpush1.msra.mxu0 %v7906_v22  ;;  %8075 = vmatprep.mubr.f32.mxu0 %v13379_v0  ;;  %v7908_v8 = vsel %vm16274_vm4, %v15421_v26, %v15445_v35  ;;  %vm16276_vm8 = vmmov %vm16273_vm5  ;;  %v13048_v26 = vunpack.i.h.bf16 %v15469_v32  ;;  %v13047_v35 = vunpack.i.l.bf16 %v15469_v32 }
 0x564   :  { %11975 = vmatprep.subr.bf16.mxu0 %v11974_v1  ;;  %v8222_v19 = vsel %vm16276_vm8, %v13042_v46, %v13032_v52  ;;  %vm16278_vm4 = vmmov %vm16273_vm5 }
 0x565   :  { %v15494_v49 = vpop.permute.xlu0 %13055  ;;  %v11980_v50 = vpack.c.bf16 %v8228_v16, %v8222_v19  ;;  %vm16279_vm12 = vmmov %vm16278_vm4 }
 0x566   :  { %v15496_v51 = vpop.permute.xlu1 %13050  ;;  %11677 = vmatmul.mubr.msk.f32.vlgmr.msra.gmra.mrb[12].mxu0 %vm16270_vm9, %v11673_v40  ;;  %v8225_v42 = vsel %vm16279_vm12, %v13047_v35, %v13048_v26  ;;  %vm16281_vm8 = vmmov %vm16278_vm4  ;;  %v13058_v61 = vunpack.i.h.bf16 %v15494_v49  ;;  %v13057_v32 = vunpack.i.l.bf16 %v15494_v49 }
 0x567   :  { %11977 = vmatpush1.bf16.msra.mxu0 %v11976_v59  ;;  %8081 = vmatprep.mubr.f32.mxu0 %v13379_v0  ;;  %v13053_v34 = vunpack.i.h.bf16 %v15496_v51  ;;  %v13052_v43 = vunpack.i.l.bf16 %v15496_v51  ;;  %vm16284_vm5 = vmmov %vm16278_vm4 }
 0x568   :  { %8092 = vmatprep.subr.mxu0 %v7909_v41  ;;  %vm16285_vm12 = vmmov %vm16278_vm4 }
 0x569   :  { %v15505_v62 = vpop.permute.xlu0 %13065  ;;  %v8231_v25 = vsel %vm16278_vm4, %v13052_v43, %v13053_v34  ;;  %v8230_v28 = vsel %vm16281_vm8, %v13038_v13, %v13052_v43  ;;  %v8227_v39 = vsel %vm16285_vm12, %v13057_v32, %v13058_v61  ;;  %vm16287_vm8 = vmmov %vm16278_vm4  ;;  %vm16291_vm12 = vcmask 891904  }
 0x56a   :  { %v15512_v33 = vpop.permute.xlu1 %8216  ;;  %11678 = vmatmul.mubr.msk.f32.gmra.mrb[14].mxu0 %vm16270_vm9, %v11674_v37  ;;  %vm16280_vm9 = vmmov %vm16278_vm4  ;;  %v11982_v54 = vpack.c.bf16 %v8231_v25, %v8225_v42  ;;  %v13068_v59 = vunpack.i.h.bf16 %v15505_v62  ;;  %v13067_v49 = vunpack.i.l.bf16 %v15505_v62 }
 0x56b   :  { %8093 = vmatpush1.msra.mxu0 %v7908_v8  ;;  %8152 = vmatprep.mubr.f32.mxu0 %v13379_v0  ;;  %v8234_v10 = vsel %vm16280_vm9, %v8209_v4, %v8211_v3  ;;  %vm16286_vm9 = vmmov %vm16278_vm4 }
 0x56c   :  { %11979 = vmatprep.subr.bf16.mxu0 %v11978_v31  ;;  %v8236_v4 = vsel %vm16286_vm9, %v15453_v2, %v15480_v60  ;;  %vm16292_vm9 = vmmov %vm16291_vm12 }
 0x56d   :  { %v8219_v14 = vpop.permute.xlu0 %8218  ;;  %v8553_v24 = vsel %vm16292_vm9, %v13067_v49, %v13068_v59 }
 0x56e   :  { %v13061_v5 = vpop.permute.xlu1 %13060  ;;  %11679 = vmatmul.mubr.msk.f32.vlgmr.msra.gmra.mrb[16].mxu0 %vm16277_vm11, %v11673_v40  ;;  %vm16283_vm11 = vmmov %vm16278_vm4 }
 0x56f   :  { %11981 = vmatpush1.bf16.msra.mxu0 %v11980_v50  ;;  %8158 = vmatprep.mubr.f32.mxu0 %v13379_v0  ;;  %v13063_v40 = vunpack.i.h.bf16 %v13061_v5  ;;  %v13062_v30 = vunpack.i.l.bf16 %v13061_v5  ;;  %v8224_v55 = vsel %vm16283_vm11, %v13033_v56, %v13047_v35  ;;  %vm16288_vm11 = vmmov %vm16282_vm15 }
 0x570   :  { %8268 = vmatprep.subr.mxu0 %v8235_v15  ;;  %v11984_v3 = vpack.c.bf16 %v8230_v28, %v8224_v55 }
 0x571   :  { %v13076_v21 = vpop.permute.xlu0 %13075  ;;  %v8233_v20 = vsel %vm16278_vm4, %v13062_v30, %v13063_v40  ;;  %v8232_v1 = vsel %vm16287_vm8, %v13053_v34, %v13062_v30  ;;  %vm16293_vm8 = vmmov %vm16278_vm4  ;;  %v11689_v30 = vld [vmem:[%s16000_s5 + $0x80] sm:$0xff] }
 0x572   :  { %v8221_v36 = vpop.permute.xlu1 %8220  ;;  %11680 = vmatmul.mubr.msk.f32.gmra.mrb[18].mxu0 %vm16282_vm15, %v11674_v37  ;;  %v8237_v37 = vsel %vm16284_vm5, %v15480_v60, %v15512_v33  ;;  %v11986_v57 = vpack.c.bf16 %v8233_v20, %v8227_v39  ;;  %vm16290_vm5 = vmmov %vm16288_vm11  ;;  %v13078_v44 = vunpack.i.h.bf16 %v13076_v21  ;;  %v13077_v46 = vunpack.i.l.bf16 %v13076_v21 }
 0x573   :  { %8269 = vmatpush1.msra.mxu0 %v8234_v10  ;;  %8328 = vmatprep.mubr.f32.mxu0 %v13379_v0  ;;  %v8239_v41 = vsel %vm16278_vm4, %v8219_v14, %v8221_v36  ;;  %v8238_v62 = vsel %vm16293_vm8, %v15512_v33, %v8219_v14 }
 0x574   :  { %11983 = vmatprep.subr.bf16.mxu0 %v11982_v54 }
 0x575   :  { %v15546_v22 = vpop.permute.xlu0 %8542 }
 0x576   :  { %v13071_v63 = vpop.permute.xlu1 %13070  ;;  %11683 = vmatmul.mubr.msk.f32.vlgmr.msra.gmra.mrb[8].mxu0 %vm16282_vm15, %v11681_v29  ;;  %vm16289_vm15 = vmmov %vm16278_vm4 }
 0x577   :  { %11985 = vmatpush1.bf16.msra.mxu0 %v11984_v3  ;;  %8334 = vmatprep.mubr.f32.mxu0 %v13379_v0  ;;  %v13073_v17 = vunpack.i.h.bf16 %v13071_v63  ;;  %v13072_v56 = vunpack.i.l.bf16 %v13071_v63  ;;  %v8226_v52 = vsel %vm16289_vm15, %v13048_v26, %v13057_v32  ;;  %vm16295_vm15 = vmmov %vm16290_vm5  ;;  %v11690_v63 = vld [vmem:[%s16000_s5 + $0x88] sm:$0xff] }
 0x578   :  { %8345 = vmatprep.subr.mxu0 %v8237_v37  ;;  %v11988_v51 = vpack.c.bf16 %v8232_v1, %v8226_v52  ;;  %vm16297_vm4 = vmmov %vm16295_vm15 }
 0x579   :  { %v15558_v2 = vpop.permute.xlu0 %13080  ;;  %v8559_v47 = vsel %vm16291_vm12, %v13072_v56, %v13073_v17 }
 0x57a   :  { %v8541_v13 = vpop.permute.xlu1 %8540  ;;  %11684 = vmatmul.mubr.msk.f32.gmra.mrb[10].mxu0 %vm16288_vm11, %v11682_v58  ;;  %vm16294_vm11 = vmmov %vm16292_vm9  ;;  %v11990_v31 = vpack.c.bf16 %v8559_v47, %v8553_v24  ;;  %v13083_v35 = vunpack.i.h.bf16 %v15558_v2  ;;  %v13082_v33 = vunpack.i.l.bf16 %v15558_v2 }
 0x57b   :  { %8346 = vmatpush1.msra.mxu0 %v8236_v4  ;;  %8405 = vmatprep.mubr.f32.mxu0 %v13379_v0  ;;  %v8558_v8 = vsel %vm16294_vm11, %v13078_v44, %v13072_v56 }
 0x57c   :  { %11987 = vmatprep.subr.bf16.mxu0 %v11986_v57 }
 0x57d   :  { %v8545_v50 = vpop.permute.xlu0 %8544 }
 0x57e   :  { %v8539_v60 = vpop.permute.xlu1 %8538  ;;  %11685 = vmatmul.mubr.msk.f32.vlgmr.msra.gmra.mrb[12].mxu0 %vm16290_vm5, %v11681_v29  ;;  %vm16296_vm5 = vmmov %vm16292_vm9 }
 0x57f   :  { %11989 = vmatpush1.bf16.msra.mxu0 %v11988_v51  ;;  %8411 = vmatprep.mubr.f32.mxu0 %v13379_v0  ;;  %v8552_v19 = vsel %vm16296_vm5, %v13077_v46, %v13067_v49  ;;  %vm16298_vm12 = vmmov %vm16296_vm5 }
 0x580   :  { %8422 = vmatprep.subr.mxu0 %v8239_v41  ;;  %v11992_v26 = vpack.c.bf16 %v8558_v8, %v8552_v19  ;;  %v8565_v5 = vsel %vm16298_vm12, %v8541_v13, %v15546_v22  ;;  %vm16299_vm9 = vmmov %vm16296_vm5 }
 0x581   :  { %vm16300_vm8 = vmmov %vm16296_vm5  ;;  %v13091_v10 = vpop.permute.xlu0 %13090 }
 0x582   :  { %v13086_v16 = vpop.permute.xlu1 %13085  ;;  %11686 = vmatmul.mubr.msk.f32.gmra.mrb[14].mxu0 %vm16295_vm15, %v11682_v58  ;;  %v8555_v25 = vsel %vm16300_vm8, %v13082_v33, %v13083_v35  ;;  %vm16301_vm11 = vmmov %vm16296_vm5  ;;  %v13093_v55 = vunpack.i.h.bf16 %v13091_v10  ;;  %v13092_v61 = vunpack.i.l.bf16 %v13091_v10 }
 0x583   :  { %v13088_v34 = vunpack.i.h.bf16 %v13086_v16  ;;  %v13087_v43 = vunpack.i.l.bf16 %v13086_v16  ;;  %8423 = vmatpush1.msra.mxu0 %v8238_v62  ;;  %8482 = vmatprep.mubr.f32.mxu0 %v13379_v0  ;;  %v8564_v42 = vsel %vm16301_vm11, %v8539_v60, %v8541_v13  ;;  %vm16302_vm15 = vmmov %vm16296_vm5 }
 0x584   :  { %11991 = vmatprep.subr.bf16.mxu0 %v11990_v31  ;;  %vm16303_vm5 = vmmov %vm16297_vm4 }
 0x585   :  { %v8561_v15 = vsel %vm16299_vm9, %v13087_v43, %v13088_v34  ;;  %v8560_v28 = vsel %vm16302_vm15, %v13073_v17, %v13087_v43  ;;  %vm16305_vm12 = vmmov %vm16303_vm5  ;;  %v8549_v17 = vpop.permute.xlu0 %8548 }
 0x586   :  { %v8547_v14 = vpop.permute.xlu1 %8546  ;;  %11687 = vmatmul.mubr.msk.f32.vlgmr.msra.gmra.mrb[16].mxu0 %vm16297_vm4, %v11681_v29  ;;  %v11994_v36 = vpack.c.bf16 %v8561_v15, %v8555_v25  ;;  %vm16304_vm4 = vmmov %vm16300_vm8 }
 0x587   :  { %11993 = vmatpush1.bf16.msra.mxu0 %v11992_v26  ;;  %8488 = vmatprep.mubr.f32.mxu0 %v13379_v0  ;;  %v8554_v29 = vsel %vm16304_vm4, %v13068_v59, %v13082_v33  ;;  %vm16306_vm9 = vmmov %vm16304_vm4 }
 0x588   :  { %8598 = vmatprep.subr.mxu0 %v8565_v5  ;;  %v11996_v32 = vpack.c.bf16 %v8560_v28, %v8554_v29  ;;  %v8567_v3 = vsel %vm16306_vm9, %v8545_v50, %v8547_v14  ;;  %vm16307_vm8 = vmmov %vm16304_vm4 }
 0x589   :  { %vm16308_vm11 = vmmov %vm16304_vm4 }
 0x58a   :  { %v13096_v21 = vpop.permute.xlu1 %13095  ;;  %11688 = vmatmul.mubr.msk.f32.gmra.mrb[18].mxu0 %vm16303_vm5, %v11682_v58  ;;  %v8557_v58 = vsel %vm16308_vm11, %v13092_v61, %v13093_v55  ;;  %vm16309_vm15 = vmmov %vm16304_vm4 }
 0x58b   :  { %v13098_v54 = vunpack.i.h.bf16 %v13096_v21  ;;  %v13097_v40 = vunpack.i.l.bf16 %v13096_v21  ;;  %8599 = vmatpush1.msra.mxu0 %v8564_v42  ;;  %8658 = vmatprep.mubr.f32.mxu0 %v13379_v0  ;;  %v8566_v20 = vsel %vm16309_vm15, %v15546_v22, %v8545_v50  ;;  %vm16310_vm5 = vmmov %vm16304_vm4 }
 0x58c   :  { %11995 = vmatprep.subr.bf16.mxu0 %v11994_v36  ;;  %vm16311_vm4 = vmmov %vm16305_vm12 }
 0x58d   :  { %v8563_v37 = vsel %vm16307_vm8, %v13097_v40, %v13098_v54  ;;  %v8562_v39 = vsel %vm16310_vm5, %v13088_v34, %v13097_v40  ;;  %vm16313_vm9 = vmmov %vm16311_vm4 }
 0x58e   :  { %11691 = vmatmul.mubr.msk.f32.vlgmr.msra.gmra.mrb[8].mxu0 %vm16305_vm12, %v11689_v30  ;;  %v11998_v4 = vpack.c.bf16 %v8563_v37, %v8557_v58  ;;  %vm16312_vm12 = vmmov %vm16310_vm5  ;;  %v8551_v13 = vpop.permute.xlu1 %8550 }
 0x58f   :  { %11997 = vmatpush1.bf16.msra.mxu0 %v11996_v32  ;;  %8664 = vmatprep.mubr.f32.mxu0 %v13379_v0  ;;  %v8556_v1 = vsel %vm16312_vm12, %v13083_v35, %v13092_v61  ;;  %vm16314_vm8 = vmmov %vm16310_vm5 }
 0x590   :  { %8675 = vmatprep.subr.mxu0 %v8567_v3  ;;  %v12000_v57 = vpack.c.bf16 %v8562_v39, %v8556_v1  ;;  %v8569_v56 = vsel %vm16314_vm8, %v8549_v17, %v8551_v13  ;;  %vm16315_vm11 = vmmov %vm16310_vm5 }
 0x591   :  { %v8568_v22 = vsel %vm16315_vm11, %v8547_v14, %v8549_v17  ;;  %vm16316_vm15 = vmmov %vm16311_vm4 }
 0x592   :  { %11692 = vmatmul.mubr.msk.f32.gmra.mrb[10].mxu0 %vm16311_vm4, %v11690_v63  ;;  %vm16317_vm5 = vmmov %vm16311_vm4 }
 0x593   :  { %8676 = vmatpush1.msra.mxu0 %v8566_v20  ;;  %8735 = vmatprep.mubr.f32.mxu0 %v13379_v0 }
 0x594   :  { %11999 = vmatprep.subr.bf16.mxu0 %v11998_v4 }
 0x596   :  { %11693 = vmatmul.mubr.msk.f32.vlgmr.msra.gmra.mrb[12].mxu0 %vm16313_vm9, %v11689_v30  ;;  %v8842_v52 = vpop.permute.xlu0 %8841 }
 0x597   :  { %12001 = vmatpush1.bf16.msra.mxu0 %v12000_v57  ;;  %8741 = vmatprep.mubr.f32.mxu0 %v13379_v0 }
 0x598   :  { %8752 = vmatprep.subr.mxu0 %v8569_v56 }
 0x59a   :  { %11694 = vmatmul.mubr.msk.f32.gmra.mrb[14].mxu0 %vm16316_vm15, %v11690_v63  ;;  %vm16328_vm15 = vcmask 154624  }
 0x59b   :  { %8753 = vmatpush1.msra.mxu0 %v8568_v22  ;;  %8812 = vmatprep.mubr.f32.mxu0 %v13379_v0 }
 0x59e   :  { %11695 = vmatmul.mubr.msk.f32.vlgmr.msra.gmra.mrb[16].mxu0 %vm16317_vm5, %v11689_v30 }
 0x59f   :  { %8818 = vmatprep.mubr.f32.mxu0 %v13379_v0  ;;  %v8847_v41 = vpop.permute.xlu1 %8846 }
 0x5a2   :  { %11696 = vmatmul.mubr.msk.f32.gmra.mrb[18].mxu0 %vm16311_vm4, %v11690_v63 }
 0x5a3   :  { %9047 = vmatprep.mubr.f32.mxu0 %v13379_v0 }
 0x661   :  { %v8660_v59 = vpop.f32.mrb[8].mxu0 }
 0x662   :  { %v8849_v49 = vadd.f32 %v8842_v52, %v8660_v59  ;;  %v8662_v51 = vpop.f32.mrb[9].mxu0 }
 0x663   :  { %v8850_v2 = vadd.f32 %v8842_v52, %v8662_v51 }
 0x664   :  { %v8861_v60 = vmax.f32 %v8849_v49, 0.0 }
 0x665   :  { %v8862_v47 = vmax.f32 %v8850_v2, 0.0  ;;  %v8666_v44 = vpop.f32.mrb[10].mxu0 }
 0x666   :  { %v8873_v46 = vsel %vm14014_vm3, %v8861_v60, 0.0  ;;  %v8855_v24 = vadd.f32 %v8847_v41, %v8666_v44  ;;  %v8668_v62 = vpop.f32.mrb[11].mxu0 }
 0x667   :  { %v8874_v8 = vsel %vm14024_vm2, %v8862_v47, 0.0  ;;  %v8856_v16 = vadd.f32 %v8847_v41, %v8668_v62 }
 0x668   :  { %v8867_v31 = vmax.f32 %v8855_v24, 0.0  ;;  %v15619_v34 = vpack.i.bf16 %v8874_v8, %v8873_v46 }
 0x669   :  { %v8868_v43 = vmax.f32 %v8856_v16, 0.0  ;;  %v8737_v19 = vpop.f32.mrb[12].mxu0  ;;  %v15732_v16 = vpop.permute.xlu1 %13105 }
 0x66a   :  { %v8879_v50 = vsel %vm14014_vm3, %v8867_v31, 0.0  ;;  %v15623_v26 = vpack.c.bf16 %v8867_v31, %v8861_v60  ;;  %v8851_v35 = vadd.f32 %v8842_v52, %v8737_v19  ;;  %13115 = vrot.lane.b32.xlu1 %v15619_v34, %s13383_s0  ;;  %13110 = vrot.lane.b32.xlu0 %v15619_v34, %s13381_s20  ;;  %v8739_v33 = vpop.f32.mrb[13].mxu0  ;;  %v11372_v31 = vld [vmem:[%s16002_s8] sm:$0xff]  ;;  %vm16318_vm3 = vcmask 146432  }
 0x66b   :  { %v8880_v14 = vsel %vm14024_vm2, %v8868_v43, 0.0  ;;  %v15631_v5 = vpack.c.bf16 %v8868_v43, %v8862_v47  ;;  %v8852_v15 = vadd.f32 %v8842_v52, %v8739_v33  ;;  %v15633_v25 = vpack.i.bf16 %v8879_v50, %v8873_v46  ;;  %vm16319_vm2 = vmmov %vm16318_vm3 }
 0x66c   :  { %v8863_v38 = vmax.f32 %v8851_v35, 0.0  ;;  %v13124_v42 = vpack.i.bf16 %v8880_v14, %v8879_v50 }
 0x66d   :  { %v8864_v10 = vmax.f32 %v8852_v15, 0.0  ;;  %v8743_v28 = vpop.f32.mrb[14].mxu0 }
 0x66e   :  { %v8875_v21 = vsel %vm14101_vm10, %v8863_v38, 0.0  ;;  %v8857_v36 = vadd.f32 %v8847_v41, %v8743_v28  ;;  %13125 = vrot.lane.b32.xlu0 %v13124_v42, %s13383_s0  ;;  %13120 = vrot.lane.b32.xlu1 %v13124_v42, %s13381_s20  ;;  %v8745_v54 = vpop.f32.mrb[15].mxu0 }
 0x66f   :  { %v8876_v45 = vsel %vm14112_vm0, %v8864_v10, 0.0  ;;  %v8858_v40 = vadd.f32 %v8847_v41, %v8745_v54  ;;  %v15641_v30 = vpack.i.bf16 %v8875_v21, %v8874_v8 }
 0x670   :  { %v8869_v29 = vmax.f32 %v8857_v36, 0.0  ;;  %v13129_v55 = vpack.i.bf16 %v8876_v45, %v8875_v21 }
 0x671   :  { %v8870_v61 = vmax.f32 %v8858_v40, 0.0  ;;  %v8814_v32 = vpop.f32.mrb[16].mxu0 }
 0x672   :  { %v8881_v3 = vsel %vm14101_vm10, %v8869_v29, 0.0  ;;  %v15645_v63 = vpack.c.bf16 %v8869_v29, %v8863_v38  ;;  %v8853_v37 = vadd.f32 %v8842_v52, %v8814_v32  ;;  %13130 = vrot.lane.b32.xlu1 %v13129_v55, %s13381_s20  ;;  %v8816_v58 = vpop.f32.mrb[17].mxu0  ;;  %v11697_v29 = vld [vmem:[%s16003_s7 + $0x8] sm:$0xff] }
 0x673   :  { %v8882_v20 = vsel %vm14112_vm0, %v8870_v61, 0.0  ;;  %v15650_v39 = vpack.c.bf16 %v8870_v61, %v8864_v10  ;;  %v8854_v4 = vadd.f32 %v8842_v52, %v8816_v58  ;;  %v15652_v1 = vpack.i.bf16 %v8881_v3, %v8880_v14 }
 0x674   :  { %v8865_v13 = vmax.f32 %v8853_v37, 0.0  ;;  %v13134_v57 = vpack.i.bf16 %v8882_v20, %v8881_v3  ;;  %vm16322_vm0 = vcmask 130048  }
 0x675   :  { %v8866_v17 = vmax.f32 %v8854_v4, 0.0  ;;  %v8820_v56 = vpop.f32.mrb[18].mxu0  ;;  %vm16327_vm11 = vmmov %vm16322_vm0 }
 0x676   :  { %v8877_v23 = vsel %vm16236_vm13, %v8865_v13, 0.0  ;;  %v8859_v22 = vadd.f32 %v8847_v41, %v8820_v56  ;;  %13135 = vrot.lane.b32.xlu0 %v13134_v57, %s13381_s20  ;;  %v8822_v59 = vpop.f32.mrb[19].mxu0 }
 0x677   :  { %v8878_v27 = vsel %vm14066_vm1, %v8866_v17, 0.0  ;;  %v8860_v49 = vadd.f32 %v8847_v41, %v8822_v59  ;;  %v13254_v51 = vpack.i.bf16 %v8877_v23, %v8876_v45  ;;  %v13101_v41 = vpop.permute.xlu0 %13100 }
 0x678   :  { %v8871_v2 = vmax.f32 %v8859_v22, 0.0  ;;  %v13139_v52 = vpack.i.bf16 %v8878_v27, %v8877_v23  ;;  %v13264_v53 = vpack.i.bf16 %v13379_v0, %v8878_v27  ;;  %v13103_v19 = vunpack.i.h.bf16 %v13101_v41 }
 0x679   :  { %v8872_v60 = vmax.f32 %v8860_v49, 0.0  ;;  %v13102_v50 = vunpack.i.l.bf16 %v13101_v41  ;;  %v13108_v22 = vunpack.i.h.bf16 %v15732_v16 }
 0x67a   :  { %v8883_v47 = vsel %vm16236_vm13, %v8871_v2, 0.0  ;;  %v15661_v44 = vpack.c.bf16 %v8871_v2, %v8865_v13  ;;  %13140 = vrot.lane.b32.xlu1 %v13139_v52, %s13381_s20 }
 0x67b   :  { %v8884_v46 = vsel %vm14066_vm1, %v8872_v60, 0.0  ;;  %v15666_v24 = vpack.c.bf16 %v8872_v60, %v8866_v17  ;;  %v13259_v62 = vpack.i.bf16 %v8883_v47, %v8882_v20  ;;  %vm16320_vm1 = vmmov %vm16319_vm2  ;;  %v13107_v60 = vunpack.i.l.bf16 %v15732_v16 }
 0x67c   :  { %v13144_v8 = vpack.i.bf16 %v8884_v46, %v8883_v47  ;;  %v13284_v7 = vpack.i.bf16 %v13379_v0, %v8884_v46  ;;  %vm16321_vm10 = vmmov %vm16320_vm1 }
 0x67d   :  { %vm16323_vm13 = vmmov %vm16320_vm1 }
 0x67e   :  { %13155 = vrot.lane.b32.xlu1 %v13134_v57, %s13383_s0  ;;  %13145 = vrot.lane.b32.xlu0 %v13144_v8, %s13381_s20  ;;  %vm16324_vm12 = vmmov %vm16320_vm1 }
 0x67f   :  { %vm16325_vm9 = vmmov %vm16320_vm1 }
 0x680   :  { %vm16326_vm8 = vmmov %vm16320_vm1 }
 0x681   :  { %vm16329_vm5 = vmmov %vm16320_vm1 }
 0x682   :  { %13170 = vrot.lane.b32.xlu1 %v13124_v42, %s13380_s30  ;;  %13150 = vrot.lane.b32.xlu0 %v13129_v55, %s13383_s0  ;;  %vm16330_vm4 = vmmov %vm16320_vm1 }
 0x686   :  { %13180 = vrot.lane.b32.xlu1 %v13144_v8, %s13383_s0  ;;  %13160 = vrot.lane.b32.xlu0 %v13139_v52, %s13383_s0 }
 0x68a   :  { %13185 = vrot.lane.b32.xlu1 %v13129_v55, %s13380_s30  ;;  %13165 = vrot.lane.b32.xlu0 %v15619_v34, %s13380_s30 }
 0x68e   :  { %13195 = vrot.lane.b32.xlu1 %v13139_v52, %s13380_s30  ;;  %13175 = vrot.lane.b32.xlu0 %v13379_v0, %s13380_s30 }
 0x692   :  { %13200 = vrot.lane.b32.xlu1 %v15619_v34, %s13382_s21  ;;  %13190 = vrot.lane.b32.xlu0 %v13134_v57, %s13380_s30 }
 0x696   :  { %13215 = vrot.lane.b32.xlu1 %v13379_v0, %s13382_s21  ;;  %13205 = vrot.lane.b32.xlu0 %v13144_v8, %s13380_s30 }
 0x69a   :  { %13225 = vrot.lane.b32.xlu1 %v13134_v57, %s13382_s21  ;;  %13210 = vrot.lane.b32.xlu0 %v13124_v42, %s13382_s21 }
 0x69e   :  { %13235 = vrot.lane.b32.xlu1 %v13144_v8, %s13382_s21  ;;  %13220 = vrot.lane.b32.xlu0 %v13129_v55, %s13382_s21 }
 0x6a2   :  { %13245 = vrot.lane.b32.xlu1 %v15652_v1, %s13384_s24  ;;  %13230 = vrot.lane.b32.xlu0 %v13139_v52, %s13382_s21 }
 0x6a6   :  { %13255 = vrot.lane.b32.xlu1 %v13254_v51, %s13384_s24  ;;  %13240 = vrot.lane.b32.xlu0 %v15641_v30, %s13384_s24 }
 0x6aa   :  { %13265 = vrot.lane.b32.xlu1 %v13264_v53, %s13384_s24  ;;  %13250 = vrot.lane.b32.xlu0 %v15633_v25, %s13384_s24 }
 0x6ae   :  { %13270 = vrot.lane.b32.xlu1 %v15641_v30, %s13385_s25  ;;  %13260 = vrot.lane.b32.xlu0 %v13259_v62, %s13384_s24 }
 0x6b2   :  { %13280 = vrot.lane.b32.xlu1 %v15633_v25, %s13385_s25  ;;  %13275 = vrot.lane.b32.xlu0 %v15652_v1, %s13385_s25 }
 0x6b6   :  { %13295 = vrot.lane.b32.xlu1 %v13259_v62, %s13385_s25  ;;  %13285 = vrot.lane.b32.xlu0 %v13284_v7, %s13384_s24 }
 0x6ba   :  { %13310 = vrot.lane.b32.xlu1 %v15652_v1, %s13386_s26  ;;  %13290 = vrot.lane.b32.xlu0 %v13254_v51, %s13385_s25 }
 0x6be   :  { %13320 = vrot.lane.b32.xlu1 %v13284_v7, %s13385_s25  ;;  %13300 = vrot.lane.b32.xlu0 %v13264_v53, %s13385_s25 }
 0x6c2   :  { %13325 = vrot.lane.b32.xlu1 %v13254_v51, %s13386_s26  ;;  %13305 = vrot.lane.b32.xlu0 %v15641_v30, %s13386_s26 }
 0x6c6   :  { %13335 = vrot.lane.b32.xlu1 %v13264_v53, %s13386_s26  ;;  %13315 = vrot.lane.b32.xlu0 %v15633_v25, %s13386_s26 }
 0x6ca   :  { %13340 = vrot.lane.b32.xlu1 %v15641_v30, %s13387_s27  ;;  %13330 = vrot.lane.b32.xlu0 %v13259_v62, %s13386_s26 }
 0x6ce   :  { %13355 = vrot.lane.b32.xlu1 %v15633_v25, %s13387_s27  ;;  %13345 = vrot.lane.b32.xlu0 %v13284_v7, %s13386_s26 }
 0x6d2   :  { %13365 = vrot.lane.b32.xlu1 %v13259_v62, %s13387_s27  ;;  %13350 = vrot.lane.b32.xlu0 %v15652_v1, %s13387_s27 }
 0x6d6   :  { %13375 = vrot.lane.b32.xlu1 %v13284_v7, %s13387_s27  ;;  %13360 = vrot.lane.b32.xlu0 %v13254_v51, %s13387_s27 }
 0x6da   :  { %13370 = vrot.lane.b32.xlu0 %v13264_v53, %s13387_s27 }
 0x6dc   :  { %v15738_v34 = vpop.permute.xlu1 %13115  ;;  %v13111_v43 = vpop.permute.xlu0 %13110 }
 0x6dd   :  { %v13113_v35 = vunpack.i.h.bf16 %v13111_v43  ;;  %v13112_v33 = vunpack.i.l.bf16 %v13111_v43  ;;  %v13118_v49 = vunpack.i.h.bf16 %v15738_v34  ;;  %v13117_v51 = vunpack.i.l.bf16 %v15738_v34 }
 0x6de   :  { %11375 = vperm.xlu0 %12537, %v11372_v31  }
 0x6df   :  { %v8956_v38 = vsel %vm16318_vm3, %v13102_v50, %v13112_v33  ;;  %v8957_v10 = vsel %vm16320_vm1, %v13112_v33, %v13113_v35  ;;  %vm16331_vm3 = vmmov %vm16320_vm1 }
 0x6e0   :  { %v13121_v14 = vpop.permute.xlu1 %13120  ;;  %v15744_v21 = vpop.permute.xlu0 %13125 }
 0x6e1   :  { %v13123_v15 = vunpack.i.h.bf16 %v13121_v14  ;;  %v13122_v25 = vunpack.i.l.bf16 %v13121_v14  ;;  %v13128_v57 = vunpack.i.h.bf16 %v15744_v21  ;;  %v13127_v17 = vunpack.i.l.bf16 %v15744_v21 }
 0x6e3   :  { %v8962_v42 = vsel %vm16319_vm2, %v13103_v19, %v13122_v25  ;;  %v8963_v28 = vsel %vm16321_vm10, %v13122_v25, %v13123_v15  ;;  %v9231_v47 = vsel %vm16328_vm15, %v13127_v17, %v13128_v57  ;;  %vm16332_vm2 = vmmov %vm16320_vm1 }
 0x6e4   :  { %v12004_v36 = vpack.c.bf16 %v8962_v42, %v8956_v38  ;;  %v13131_v54 = vpop.permute.xlu1 %13130  ;;  %v12002_v45 = vpack.c.bf16 %v8963_v28, %v8957_v10  ;;  %vm16333_vm1 = vmmov %vm16328_vm15 }
 0x6e5   :  { %v13133_v40 = vunpack.i.h.bf16 %v13131_v54  ;;  %v13132_v30 = vunpack.i.l.bf16 %v13131_v54  ;;  %v9230_v19 = vsel %vm16333_vm1, %v13108_v22, %v13127_v17  ;;  %vm16334_vm10 = vmmov %vm16333_vm1 }
 0x6e6   :  { %12003 = vmatprep.subr.bf16.mxu0 %v12002_v45  ;;  %v9225_v33 = vsel %vm16334_vm10, %v13117_v51, %v13118_v49 }
 0x6e7   :  { %12005 = vmatpush1.bf16.msra.mxu0 %v12004_v36  ;;  %v8958_v3 = vsel %vm16323_vm13, %v13113_v35, %v13132_v30  ;;  %v8959_v58 = vsel %vm16325_vm9, %v13132_v30, %v13133_v40  ;;  %v12014_v14 = vpack.c.bf16 %v9231_v47, %v9225_v33 }
 0x6e8   :  { %v13136_v55 = vpop.permute.xlu0 %13135 }
 0x6e9   :  { %v13138_v61 = vunpack.i.h.bf16 %v13136_v55  ;;  %v13137_v32 = vunpack.i.l.bf16 %v13136_v55  ;;  %v8911_v55 = vld [vmem:[%s16003_s7] sm:$0xff] }
 0x6ea   :  { %11698 = vmatmul.mubr.msk.f32.vlgmr.msra.gmra.mrb[20].mxu0 %vm16322_vm0, %v11697_v29  ;;  %vm16335_vm0 = vmmov %vm16333_vm1  ;;  %vm16346_vm1 = vcmask 138240  }
 0x6eb   :  { %v8964_v37 = vsel %vm16324_vm12, %v13123_v15, %v13137_v32  ;;  %v8965_v20 = vsel %vm16326_vm8, %v13137_v32, %v13138_v61  ;;  %9118 = vmatprep.mubr.f32.mxu0 %v13379_v0  ;;  %v9224_v15 = vsel %vm16335_vm0, %v13107_v60, %v13117_v51  ;;  %vm16336_vm13 = vmmov %vm16335_vm0 }
 0x6ec   :  { %v12008_v4 = vpack.c.bf16 %v8964_v37, %v8958_v3  ;;  %v13141_v1 = vpop.permute.xlu1 %13140  ;;  %v12006_v13 = vpack.c.bf16 %v8965_v20, %v8959_v58  ;;  %v12016_v38 = vpack.c.bf16 %v9230_v19, %v9224_v15  ;;  %vm16337_vm12 = vmmov %vm16335_vm0 }
 0x6ed   :  { %v13143_v56 = vunpack.i.h.bf16 %v13141_v1  ;;  %v13142_v23 = vunpack.i.l.bf16 %v13141_v1  ;;  %vm16338_vm9 = vmmov %vm16335_vm0 }
 0x6ee   :  { %12007 = vmatprep.subr.bf16.mxu0 %v12006_v13  ;;  %vm16339_vm8 = vmmov %vm16327_vm11 }
 0x6ef   :  { %12009 = vmatpush1.bf16.msra.mxu0 %v12008_v4  ;;  %v8960_v46 = vsel %vm16329_vm5, %v13133_v40, %v13142_v23  ;;  %v8961_v8 = vsel %vm16331_vm3, %v13142_v23, %v13143_v56  ;;  %vm16341_vm15 = vmmov %vm16335_vm0 }
 0x6f0   :  { %v13156_v59 = vpop.permute.xlu1 %13155  ;;  %v13146_v27 = vpop.permute.xlu0 %13145  ;;  %vm16342_vm5 = vmmov %vm16335_vm0 }
 0x6f1   :  { %v13148_v2 = vunpack.i.h.bf16 %v13146_v27  ;;  %v13147_v52 = vunpack.i.l.bf16 %v13146_v27  ;;  %v13158_v7 = vunpack.i.h.bf16 %v13156_v59  ;;  %v13157_v41 = vunpack.i.l.bf16 %v13156_v59  ;;  %vm16344_vm3 = vmmov %vm16335_vm0 }
 0x6f2   :  { %11699 = vmatmul.mubr.msk.f32.vlgmr.msra.gmra.mrb[22].mxu0 %vm16327_vm11, %v11697_v29  ;;  %vm16340_vm11 = vmmov %vm16335_vm0 }
 0x6f3   :  { %v8966_v62 = vsel %vm16330_vm4, %v13138_v61, %v13147_v52  ;;  %v8967_v53 = vsel %vm16332_vm2, %v13147_v52, %v13148_v2  ;;  %9189 = vmatprep.mubr.f32.mxu0 %v13379_v0  ;;  %v9233_v28 = vsel %vm16337_vm12, %v13157_v41, %v13158_v7  ;;  %v9232_v32 = vsel %vm16341_vm15, %v13128_v57, %v13157_v41  ;;  %vm16343_vm4 = vmmov %vm16335_vm0 }
 0x6f4   :  { %v12012_v31 = vpack.c.bf16 %v8966_v62, %v8960_v46  ;;  %v15768_v34 = vpop.permute.xlu1 %13170  ;;  %v13151_v16 = vpop.permute.xlu0 %13150  ;;  %v12010_v43 = vpack.c.bf16 %v8967_v53, %v8961_v8  ;;  %vm16345_vm2 = vmmov %vm16339_vm8 }
 0x6f5   :  { %v13153_v50 = vunpack.i.h.bf16 %v13151_v16  ;;  %v13152_v35 = vunpack.i.l.bf16 %v13151_v16  ;;  %v13173_v3 = vunpack.i.h.bf16 %v15768_v34  ;;  %vm16347_vm10 = vmmov %vm16346_vm1 }
 0x6f6   :  { %12011 = vmatprep.subr.bf16.mxu0 %v12010_v43  ;;  %vm16348_vm0 = vmmov %vm16345_vm2 }
 0x6f7   :  { %12013 = vmatpush1.bf16.msra.mxu0 %v12012_v31  ;;  %v9227_v25 = vsel %vm16336_vm13, %v13152_v35, %v13153_v50  ;;  %v9226_v40 = vsel %vm16338_vm9, %v13118_v49, %v13152_v35  ;;  %vm16349_vm13 = vmmov %vm16346_vm1 }
 0x6f8   :  { %v13181_v42 = vpop.permute.xlu1 %13180  ;;  %v13161_v10 = vpop.permute.xlu0 %13160  ;;  %12015 = vmatprep.subr.bf16.mxu0 %v12014_v14  ;;  %v12018_v30 = vpack.c.bf16 %v9233_v28, %v9227_v25  ;;  %v12020_v4 = vpack.c.bf16 %v9232_v32, %v9226_v40  ;;  %vm16350_vm12 = vmmov %vm16346_vm1 }
 0x6f9   :  { %v13183_v21 = vunpack.i.h.bf16 %v13181_v42  ;;  %v13182_v36 = vunpack.i.l.bf16 %v13181_v42  ;;  %v13163_v54 = vunpack.i.h.bf16 %v13161_v10  ;;  %v13162_v45 = vunpack.i.l.bf16 %v13161_v10  ;;  %vm16351_vm9 = vmmov %vm16346_vm1 }
 0x6fa   :  { %11700 = vmatmul.mubr.msk.f32.vlgmr.msra.gmra.mrb[24].mxu0 %vm16339_vm8, %v11697_v29  ;;  %v13172_v29 = vunpack.i.l.bf16 %v15768_v34  ;;  %vm16352_vm8 = vmmov %vm16348_vm0 }
 0x6fb   :  { %12017 = vmatpush1.bf16.msra.mxu0 %v12016_v38  ;;  %9315 = vmatprep.mubr.f32.mxu0 %v13379_v0  ;;  %v9229_v61 = vsel %vm16340_vm11, %v13162_v45, %v13163_v54  ;;  %v9235_v20 = vsel %vm16342_vm5, %v13182_v36, %v13183_v21  ;;  %v9234_v17 = vsel %vm16343_vm4, %v13158_v7, %v13182_v36  ;;  %vm16353_vm11 = vmmov %vm16346_vm1 }
 0x6fc   :  { %v13186_v37 = vpop.permute.xlu1 %13185  ;;  %v13166_v58 = vpop.permute.xlu0 %13165  ;;  %12019 = vmatprep.subr.bf16.mxu0 %v12018_v30  ;;  %v9228_v56 = vsel %vm16344_vm3, %v13153_v50, %v13162_v45  ;;  %v12022_v23 = vpack.c.bf16 %v9235_v20, %v9229_v61  ;;  %v9501_v2 = vsel %vm16347_vm10, %v13172_v29, %v13173_v3  ;;  %v11704_v50 = vld [vmem:[%s16003_s7 + $0x10] sm:$0xff]  ;;  %vm16354_vm15 = vmmov %vm16346_vm1 }
 0x6fd   :  { %v13168_v1 = vunpack.i.h.bf16 %v13166_v58  ;;  %v13167_v13 = vunpack.i.l.bf16 %v13166_v58  ;;  %v12024_v27 = vpack.c.bf16 %v9234_v17, %v9228_v56  ;;  %v13187_v52 = vunpack.i.l.bf16 %v13186_v37  ;;  %vm16355_vm5 = vmmov %vm16346_vm1 }
 0x6fe   :  { %11701 = vmatmul.mubr.msk.f32.vlgmr.msra.gmra.mrb[20].mxu0 %vm16345_vm2, %v8911_v55  ;;  %v13188_v47 = vunpack.i.h.bf16 %v13186_v37  ;;  %vm16356_vm4 = vmmov %vm16346_vm1 }
 0x6ff   :  { %12021 = vmatpush1.bf16.msra.mxu0 %v12020_v4  ;;  %9386 = vmatprep.mubr.f32.mxu0 %v13379_v0  ;;  %v9495_v57 = vsel %vm16346_vm1, %v13167_v13, %v13168_v1  ;;  %v9496_v34 = vsel %vm16351_vm9, %v13168_v1, %v13187_v52  ;;  %vm16357_vm3 = vmmov %vm16348_vm0 }
 0x700   :  { %v13196_v22 = vpop.permute.xlu1 %13195  ;;  %v13176_v59 = vpop.permute.xlu0 %13175  ;;  %12023 = vmatprep.subr.bf16.mxu0 %v12022_v23  ;;  %v12026_v60 = vpack.c.bf16 %v9501_v2, %v9495_v57  ;;  %v9497_v35 = vsel %vm16354_vm15, %v13187_v52, %v13188_v47  ;;  %vm16358_vm2 = vmmov %vm16346_vm1 }
 0x701   :  { %v13178_v49 = vunpack.i.h.bf16 %v13176_v59  ;;  %v13177_v51 = vunpack.i.l.bf16 %v13176_v59  ;;  %v13198_v16 = vunpack.i.h.bf16 %v13196_v22  ;;  %v13197_v43 = vunpack.i.l.bf16 %v13196_v22  ;;  %vm16359_vm10 = vmmov %vm16346_vm1 }
 0x702   :  { %11702 = vmatmul.mubr.msk.f32.vlgmr.msra.gmra.mrb[22].mxu0 %vm16348_vm0, %v8911_v55  ;;  %vm16365_vm15 = vmmov %vm16348_vm0 }
 0x703   :  { %v9500_v46 = vsel %vm16349_vm13, %v13178_v49, %v13172_v29  ;;  %v9494_v62 = vsel %vm16350_vm12, %v13177_v51, %v13167_v13  ;;  %12025 = vmatpush1.bf16.msra.mxu0 %v12024_v27  ;;  %9457 = vmatprep.mubr.f32.mxu0 %v13379_v0  ;;  %v9498_v28 = vsel %vm16356_vm4, %v13188_v47, %v13197_v43  ;;  %vm16360_vm13 = vcmask 7168   ;;  %v11708_v47 = vld [vmem:[%s16003_s7 + $0x18] sm:$0xff] }
 0x704   :  { %v12028_v8 = vpack.c.bf16 %v9500_v46, %v9494_v62  ;;  %v13201_v53 = vpop.permute.xlu1 %13200  ;;  %v13191_v7 = vpop.permute.xlu0 %13190  ;;  %12027 = vmatprep.subr.bf16.mxu0 %v12026_v60  ;;  %v9499_v54 = vsel %vm16358_vm2, %v13197_v43, %v13198_v16  ;;  %vm16361_vm12 = vmmov %vm16360_vm13 }
 0x705   :  { %v13193_v41 = vunpack.i.h.bf16 %v13191_v7  ;;  %v13192_v31 = vunpack.i.l.bf16 %v13191_v7  ;;  %v13203_v21 = vunpack.i.h.bf16 %v13201_v53  ;;  %v13202_v36 = vunpack.i.l.bf16 %v13201_v53  ;;  %vm16362_vm9 = vmmov %vm16361_vm12 }
 0x706   :  { %11703 = vmatmul.mubr.msk.f32.vlgmr.msra.gmra.mrb[24].mxu0 %vm16352_vm8, %v8911_v55  ;;  %vm16363_vm8 = vmmov %vm16362_vm9 }
 0x707   :  { %v9502_v19 = vsel %vm16353_vm11, %v13173_v3, %v13192_v31  ;;  %12029 = vmatpush1.bf16.msra.mxu0 %v12028_v8  ;;  %9585 = vmatprep.mubr.f32.mxu0 %v13379_v0  ;;  %v9503_v33 = vsel %vm16355_vm5, %v13192_v31, %v13193_v41  ;;  %v9771_v4 = vsel %vm16360_vm13, %v13202_v36, %v13203_v21  ;;  %vm16364_vm11 = vmmov %vm16363_vm8 }
 0x708   :  { %v12032_v14 = vpack.c.bf16 %v9502_v19, %v9496_v34  ;;  %v13216_v15 = vpop.permute.xlu1 %13215  ;;  %v13206_v25 = vpop.permute.xlu0 %13205  ;;  %v12030_v38 = vpack.c.bf16 %v9503_v33, %v9497_v35  ;;  %vm16366_vm5 = vmmov %vm16363_vm8 }
 0x709   :  { %v13208_v42 = vunpack.i.h.bf16 %v13206_v25  ;;  %v13207_v10 = vunpack.i.l.bf16 %v13206_v25  ;;  %v13218_v45 = vunpack.i.h.bf16 %v13216_v15  ;;  %v13217_v40 = vunpack.i.l.bf16 %v13216_v15  ;;  %vm16367_vm4 = vmmov %vm16366_vm5 }
 0x70a   :  { %11705 = vmatmul.mubr.msk.f32.vlgmr.msra.gmra.mrb[20].mxu0 %vm16357_vm3, %v11704_v50  ;;  %12031 = vmatprep.subr.bf16.mxu0 %v12030_v38  ;;  %vm16368_vm3 = vmmov %vm16367_vm4 }
 0x70b   :  { %v9504_v30 = vsel %vm16346_vm1, %v13193_v41, %v13207_v10  ;;  %12033 = vmatpush1.bf16.msra.mxu0 %v12032_v14  ;;  %9656 = vmatprep.mubr.f32.mxu0 %v13379_v0  ;;  %v9505_v55 = vsel %vm16359_vm10, %v13207_v10, %v13208_v42  ;;  %v9770_v1 = vsel %vm16361_vm12, %v13217_v40, %v13202_v36  ;;  %vm16369_vm2 = vmmov %vm16368_vm3 }
 0x70c   :  { %v12036_v61 = vpack.c.bf16 %v9504_v30, %v9498_v28  ;;  %v13226_v32 = vpop.permute.xlu1 %13225  ;;  %v13211_v3 = vpop.permute.xlu0 %13210  ;;  %v12034_v37 = vpack.c.bf16 %v9505_v55, %v9499_v54  ;;  %vm16370_vm1 = vmmov %vm16348_vm0  ;;  %v11712_v28 = vld [vmem:[%s16003_s7 + $0x20] sm:$0xff] }
 0x70d   :  { %v13213_v58 = vunpack.i.h.bf16 %v13211_v3  ;;  %v13212_v20 = vunpack.i.l.bf16 %v13211_v3  ;;  %v13227_v29 = vunpack.i.l.bf16 %v13226_v32  ;;  %v13228_v13 = vunpack.i.h.bf16 %v13226_v32  ;;  %vm16371_vm10 = vmmov %vm16369_vm2 }
 0x70e   :  { %11706 = vmatmul.mubr.msk.f32.vlgmr.msra.gmra.mrb[22].mxu0 %vm16348_vm0, %v11704_v50  ;;  %12035 = vmatprep.subr.bf16.mxu0 %v12034_v37  ;;  %vm16372_vm0 = vmmov %vm16369_vm2 }
 0x70f   :  { %v9776_v17 = vsel %vm16362_vm9, %v13218_v45, %v13212_v20  ;;  %12037 = vmatpush1.bf16.msra.mxu0 %v12036_v61  ;;  %9727 = vmatprep.mubr.f32.mxu0 %v13379_v0  ;;  %v9777_v56 = vsel %vm16363_vm8, %v13212_v20, %v13213_v58  ;;  %v9778_v51 = vsel %vm16364_vm11, %v13213_v58, %v13227_v29  ;;  %vm16373_vm13 = vmmov %vm16372_vm0  ;;  %vm16378_vm8 = vcmask 1039360  }
 0x710   :  { %v12040_v23 = vpack.c.bf16 %v9776_v17, %v9770_v1  ;;  %v13236_v57 = vpop.permute.xlu1 %13235  ;;  %v13221_v22 = vpop.permute.xlu0 %13220  ;;  %v12038_v59 = vpack.c.bf16 %v9777_v56, %v9771_v4  ;;  %v9779_v62 = vsel %vm16368_vm3, %v13227_v29, %v13228_v13  ;;  %vm16374_vm12 = vmmov %vm16370_vm1  ;;  %vm16384_vm3 = vnez %v16109_v6  ;;  %v11716_v56 = vld [vmem:[%s16003_s7 + $0x28] sm:$0xff] }
 0x711   :  { %v13223_v27 = vunpack.i.h.bf16 %v13221_v22  ;;  %v13222_v49 = vunpack.i.l.bf16 %v13221_v22  ;;  %v13237_v2 = vunpack.i.l.bf16 %v13236_v57  ;;  %v13238_v52 = vunpack.i.h.bf16 %v13236_v57  ;;  %vm16375_vm9 = vmmov %vm16370_vm1 }
 0x712   :  { %11707 = vmatmul.mubr.msk.f32.vlgmr.msra.gmra.mrb[24].mxu0 %vm16365_vm15, %v11704_v50  ;;  %12039 = vmatprep.subr.bf16.mxu0 %v12038_v59  ;;  %vm16380_vm11 = vmmov %vm16378_vm8 }
 0x713   :  { %v9772_v60 = vsel %vm16366_vm5, %v13203_v21, %v13222_v49  ;;  %12041 = vmatpush1.bf16.msra.mxu0 %v12040_v23  ;;  %9861 = vmatprep.mubr.f32.mxu0 %v13379_v0  ;;  %v9773_v46 = vsel %vm16367_vm4, %v13222_v49, %v13223_v27  ;;  %v9780_v16 = vsel %vm16369_vm2, %v13228_v13, %v13237_v2  ;;  %vm16381_vm15 = vmmov %vm16378_vm8 }
 0x714   :  { %v12044_v8 = vpack.c.bf16 %v9778_v51, %v9772_v60  ;;  %v15826_v53 = vpop.permute.xlu1 %13245  ;;  %v13231_v7 = vpop.permute.xlu0 %13230  ;;  %v12042_v41 = vpack.c.bf16 %v9779_v62, %v9773_v46  ;;  %v9781_v50 = vsel %vm16373_vm13, %v13237_v2, %v13238_v52  ;;  %vm16382_vm5 = vmmov %vm16378_vm8 }
 0x715   :  { %v13233_v31 = vunpack.i.h.bf16 %v13231_v7  ;;  %v13232_v34 = vunpack.i.l.bf16 %v13231_v7  ;;  %v13248_v11 = vunpack.i.h.bf16 %v15826_v53  ;;  %vm16383_vm4 = vmmov %vm16370_vm1 }
 0x716   :  { %11709 = vmatmul.mubr.msk.f32.vlgmr.msra.gmra.mrb[20].mxu0 %vm16370_vm1, %v11708_v47  ;;  %12043 = vmatprep.subr.bf16.mxu0 %v12042_v41  ;;  %vm16385_vm2 = vmmov %vm16382_vm5 }
 0x717   :  { %v9774_v43 = vsel %vm16371_vm10, %v13223_v27, %v13232_v34  ;;  %12045 = vmatpush1.bf16.msra.mxu0 %v12044_v8  ;;  %9932 = vmatprep.mubr.f32.mxu0 %v13379_v0  ;;  %v9775_v19 = vsel %vm16372_vm0, %v13232_v34, %v13233_v31  ;;  %vm16388_vm0 = vmmov %vm16383_vm4 }
 0x718   :  { %v12048_v35 = vpack.c.bf16 %v9780_v16, %v9774_v43  ;;  %v15834_v33 = vpop.permute.xlu1 %13255  ;;  %v13241_v14 = vpop.permute.xlu0 %13240  ;;  %v12046_v15 = vpack.c.bf16 %v9781_v50, %v9775_v19 }
 0x719   :  { %v13243_v42 = vunpack.i.h.bf16 %v13241_v14  ;;  %v13242_v10 = vunpack.i.l.bf16 %v13241_v14  ;;  %v13258_v30 = vunpack.i.h.bf16 %v15834_v33  ;;  %v13257_v55 = vunpack.i.l.bf16 %v15834_v33 }
 0x71a   :  { %11710 = vmatmul.mubr.msk.f32.vlgmr.msra.gmra.mrb[22].mxu0 %vm16374_vm12, %v11708_v47  ;;  %12047 = vmatprep.subr.bf16.mxu0 %v12046_v15 }
 0x71b   :  { %12049 = vmatpush1.bf16.msra.mxu0 %v12048_v35  ;;  %10003 = vmatprep.mubr.f32.mxu0 %v13379_v0  ;;  %v10299_v40 = vsel %vm16378_vm8, %v13242_v10, %v13243_v42  ;;  %vm16394_vm8 = vcmask 908288  }
 0x71c   :  { %v15838_v25 = vpop.permute.xlu1 %13265  ;;  %v13251_v38 = vpop.permute.xlu0 %13250  ;;  %12052 = vmatprep.subr.msk.bf16.mxu0 %vm14371_vm14, %v15631_v5  ;;  %v13247_v5 = vunpack.i.l.bf16 %v15826_v53  ;;  %vm16376_vm14 = vmmov %vm16370_vm1 }
 0x71d   :  { %v13253_v54 = vunpack.i.h.bf16 %v13251_v38  ;;  %v13252_v12 = vunpack.i.l.bf16 %v13251_v38  ;;  %v13267_v3 = vunpack.i.l.bf16 %v15838_v25  ;;  %vm16386_vm1 = vmmov %vm16385_vm2 }
 0x71e   :  { %11711 = vmatmul.mubr.msk.f32.vlgmr.msra.gmra.mrb[24].mxu0 %vm16375_vm9, %v11708_v47  ;;  %v10305_v61 = vsel %vm16380_vm11, %v13247_v5, %v13248_v11  ;;  %v10301_v1 = vsel %vm16386_vm1, %v13257_v55, %v13258_v30  ;;  %vm16387_vm10 = vmmov %vm16386_vm1 }
 0x71f   :  { %12055 = vmatpush1.bf16.msk.msra.mxu0 %vm14387_vm6, %v15623_v26  ;;  %10085 = vmatprep.mubr.f32.mxu0 %v13379_v0  ;;  %vm16377_vm6 = vnez %v16103_v48  ;;  %v10304_v48 = vsel %vm16381_vm15, %v13253_v54, %v13247_v5  ;;  %v12068_v32 = vpack.c.bf16 %v10305_v61, %v10299_v40  ;;  %vm16389_vm13 = vmmov %vm16386_vm1 }
 0x720   :  { %v15851_v21 = vpop.permute.xlu1 %13270  ;;  %v13261_v36 = vpop.permute.xlu0 %13260  ;;  %12058 = vmatprep.subr.msk.bf16.mxu0 %vm14394_vm7, %v15650_v39  ;;  %vm16379_vm7 = vnez %v16105_v18  ;;  %vm16390_vm12 = vmmov %vm16386_vm1 }
 0x721   :  { %v13263_v26 = vunpack.i.h.bf16 %v13261_v36  ;;  %v13262_v45 = vunpack.i.l.bf16 %v13261_v36  ;;  %v10300_v57 = vsel %vm16390_vm12, %v13243_v42, %v13257_v55  ;;  %v13273_v22 = vunpack.i.h.bf16 %v15851_v21  ;;  %vm16391_vm9 = vmmov %vm16386_vm1 }
 0x722   :  { %11713 = vmatmul.mubr.msk.f32.vlgmr.msra.gmra.mrb[20].mxu0 %vm16376_vm14, %v11712_v28  ;;  %v13272_v51 = vunpack.i.l.bf16 %v15851_v21  ;;  %vm16392_vm14 = vmmov %vm16386_vm1 }
 0x723   :  { %12061 = vmatpush1.bf16.msk.msra.mxu0 %vm16377_vm6, %v15645_v63  ;;  %10156 = vmatprep.mubr.f32.mxu0 %v13379_v0  ;;  %v10298_v63 = vsel %vm16382_vm5, %v13252_v12, %v13242_v10  ;;  %v10307_v18 = vsel %vm16385_vm2, %v13262_v45, %v13263_v26  ;;  %v10306_v6 = vsel %vm16387_vm10, %v13248_v11, %v13262_v45  ;;  %vm16393_vm6 = vmmov %vm16388_vm0 }
 0x724   :  { %v13281_v9 = vpop.permute.xlu1 %13280  ;;  %v15864_v39 = vpop.permute.xlu0 %13275  ;;  %12064 = vmatprep.subr.msk.bf16.mxu0 %vm16379_vm7, %v15666_v24  ;;  %v13268_v24 = vunpack.i.h.bf16 %v15838_v25  ;;  %v12070_v20 = vpack.c.bf16 %v10304_v48, %v10298_v63  ;;  %v12074_v2 = vpack.c.bf16 %v10306_v6, %v10300_v57  ;;  %vm16395_vm7 = vmmov %vm16386_vm1 }
 0x725   :  { %v13278_v13 = vunpack.i.h.bf16 %v15864_v39  ;;  %v13277_v17 = vunpack.i.l.bf16 %v15864_v39  ;;  %v13283_v52 = vunpack.i.h.bf16 %v13281_v9  ;;  %v13282_v60 = vunpack.i.l.bf16 %v13281_v9  ;;  %vm16396_vm11 = vmmov %vm16394_vm8 }
 0x726   :  { %11714 = vmatmul.mubr.msk.f32.vlgmr.msra.gmra.mrb[22].mxu0 %vm16383_vm4, %v11712_v28  ;;  %v10303_v49 = vsel %vm16391_vm9, %v13267_v3, %v13268_v24  ;;  %v10302_v7 = vsel %vm16395_vm7, %v13258_v30, %v13267_v3  ;;  %v10575_v19 = vsel %vm16396_vm11, %v13272_v51, %v13273_v22  ;;  %vm16397_vm15 = vmmov %vm16394_vm8 }
 0x727   :  { %12067 = vmatpush1.bf16.msk.msra.mxu0 %vm16384_vm3, %v15661_v44  ;;  %10227 = vmatprep.mubr.f32.mxu0 %v13379_v0  ;;  %v12072_v44 = vpack.c.bf16 %v10307_v18, %v10301_v1  ;;  %v10581_v53 = vsel %vm16394_vm8, %v13277_v17, %v13278_v13  ;;  %v10574_v50 = vsel %vm16397_vm15, %v13282_v60, %v13272_v51  ;;  %vm16398_vm5 = vmmov %vm16394_vm8  ;;  %vm16410_vm8 = vcmask 900096  }
 0x728   :  { %v15882_v37 = vpop.permute.xlu1 %13295  ;;  %v13286_v58 = vpop.permute.xlu0 %13285  ;;  %12069 = vmatprep.subr.bf16.mxu0 %v12068_v32  ;;  %v10580_v35 = vsel %vm16398_vm5, %v13283_v52, %v13277_v17  ;;  %vm16399_vm4 = vmmov %vm16388_vm0  ;;  %v12080_v33 = vpack.c.bf16 %v10581_v53, %v10575_v19 }
 0x729   :  { %v13288_v29 = vunpack.i.h.bf16 %v13286_v58  ;;  %v13287_v4 = vunpack.i.l.bf16 %v13286_v58  ;;  %v13298_v34 = vunpack.i.h.bf16 %v15882_v37  ;;  %v13297_v16 = vunpack.i.l.bf16 %v15882_v37  ;;  %vm16400_vm3 = vmmov %vm16398_vm5 }
 0x72a   :  { %11715 = vmatmul.mubr.msk.f32.vlgmr.msra.gmra.mrb[24].mxu0 %vm16388_vm0, %v11712_v28  ;;  %v12082_v21 = vpack.c.bf16 %v10580_v35, %v10574_v50  ;;  %vm16401_vm2 = vmmov %vm16400_vm3 }
 0x72b   :  { %12071 = vmatpush1.bf16.msra.mxu0 %v12070_v20  ;;  %10389 = vmatprep.mubr.f32.mxu0 %v13379_v0  ;;  %v10309_v23 = vsel %vm16389_vm13, %v13287_v4, %v13288_v29  ;;  %v10308_v47 = vsel %vm16392_vm14, %v13263_v26, %v13287_v4  ;;  %v10583_v36 = vsel %vm16401_vm2, %v13297_v16, %v13298_v34  ;;  %vm16402_vm1 = vmmov %vm16401_vm2  ;;  %v11720_v26 = vld [vmem:[%s16003_s7 + $0x30] sm:$0xff] }
 0x72c   :  { %v15896_v59 = vpop.permute.xlu1 %13310  ;;  %v13291_v27 = vpop.permute.xlu0 %13290  ;;  %12073 = vmatprep.subr.bf16.mxu0 %v12072_v44  ;;  %v12076_v8 = vpack.c.bf16 %v10309_v23, %v10303_v49  ;;  %v12078_v43 = vpack.c.bf16 %v10308_v47, %v10302_v7  ;;  %vm16403_vm10 = vmmov %vm16388_vm0 }
 0x72d   :  { %v13293_v46 = vunpack.i.h.bf16 %v13291_v27  ;;  %v13292_v62 = vunpack.i.l.bf16 %v13291_v27  ;;  %vm16404_vm0 = vmmov %vm16402_vm1  ;;  %v13313_v55 = vunpack.i.h.bf16 %v15896_v59  ;;  %v13312_v61 = vunpack.i.l.bf16 %v15896_v59 }
 0x72e   :  { %11717 = vmatmul.mubr.msk.f32.vlgmr.msra.gmra.mrb[20].mxu0 %vm16393_vm6, %v11716_v56  ;;  %vm16405_vm13 = vmmov %vm16404_vm0 }
 0x72f   :  { %12075 = vmatpush1.bf16.msra.mxu0 %v12074_v2  ;;  %10460 = vmatprep.mubr.f32.mxu0 %v13379_v0  ;;  %v10577_v14 = vsel %vm16400_vm3, %v13292_v62, %v13293_v46  ;;  %v10576_v11 = vsel %vm16402_vm1, %v13273_v22, %v13292_v62  ;;  %vm16406_vm12 = vmmov %vm16404_vm0  ;;  %v11724_v62 = vld [vmem:[%s16003_s7 + $0x38] sm:$0xff] }
 0x730   :  { %v13321_v41 = vpop.permute.xlu1 %13320  ;;  %v13301_v31 = vpop.permute.xlu0 %13300  ;;  %12077 = vmatprep.subr.bf16.mxu0 %v12076_v8  ;;  %v12084_v5 = vpack.c.bf16 %v10583_v36, %v10577_v14  ;;  %v10582_v9 = vsel %vm16406_vm12, %v13278_v13, %v13297_v16  ;;  %vm16407_vm9 = vmmov %vm16404_vm0 }
 0x731   :  { %v13323_v15 = vunpack.i.h.bf16 %v13321_v41  ;;  %v13322_v25 = vunpack.i.l.bf16 %v13321_v41  ;;  %v13303_v38 = vunpack.i.h.bf16 %v13301_v31  ;;  %v13302_v42 = vunpack.i.l.bf16 %v13301_v31  ;;  %vm16408_vm14 = vmmov %vm16404_vm0 }
 0x732   :  { %11718 = vmatmul.mubr.msk.f32.vlgmr.msra.gmra.mrb[22].mxu0 %vm16399_vm4, %v11716_v56  ;;  %v12086_v48 = vpack.c.bf16 %v10582_v9, %v10576_v11  ;;  %vm16409_vm6 = vmmov %vm16399_vm4 }
 0x733   :  { %12079 = vmatpush1.bf16.msra.mxu0 %v12078_v43  ;;  %10531 = vmatprep.mubr.f32.mxu0 %v13379_v0  ;;  %v10579_v45 = vsel %vm16404_vm0, %v13302_v42, %v13303_v38  ;;  %v10585_v40 = vsel %vm16405_vm13, %v13322_v25, %v13323_v15  ;;  %v10584_v63 = vsel %vm16407_vm9, %v13298_v34, %v13322_v25  ;;  %vm16411_vm7 = vmmov %vm16410_vm8 }
 0x734   :  { %v15913_v10 = vpop.permute.xlu1 %13325  ;;  %v15915_v28 = vpop.permute.xlu0 %13305  ;;  %12081 = vmatprep.subr.bf16.mxu0 %v12080_v33  ;;  %v10578_v32 = vsel %vm16408_vm14, %v13293_v46, %v13302_v42  ;;  %v12088_v3 = vpack.c.bf16 %v10585_v40, %v10579_v45  ;;  %v10857_v13 = vsel %vm16411_vm7, %v13312_v61, %v13313_v55  ;;  %vm16412_vm11 = vmmov %vm16411_vm7  ;;  %vm16424_vm14 = vcmask 891904  }
 0x735   :  { %v13308_v54 = vunpack.i.h.bf16 %v15915_v28  ;;  %v13307_v12 = vunpack.i.l.bf16 %v15915_v28  ;;  %v13328_v58 = vunpack.i.h.bf16 %v15913_v10  ;;  %v13327_v20 = vunpack.i.l.bf16 %v15913_v10  ;;  %vm16413_vm15 = vmmov %vm16411_vm7 }
 0x736   :  { %11719 = vmatmul.mubr.msk.f32.vlgmr.msra.gmra.mrb[24].mxu0 %vm16403_vm10, %v11716_v56  ;;  %v12090_v1 = vpack.c.bf16 %v10584_v63, %v10578_v32  ;;  %vm16414_vm5 = vmmov %vm16399_vm4 }
 0x737   :  { %12083 = vmatpush1.bf16.msra.mxu0 %v12082_v21  ;;  %10665 = vmatprep.mubr.f32.mxu0 %v13379_v0  ;;  %v10851_v37 = vsel %vm16410_vm8, %v13307_v12, %v13308_v54  ;;  %vm16415_vm4 = vmmov %vm16411_vm7 }
 0x738   :  { %v15929_v39 = vpop.permute.xlu1 %13335  ;;  %v13316_v30 = vpop.permute.xlu0 %13315  ;;  %12085 = vmatprep.subr.bf16.mxu0 %v12084_v5  ;;  %v12092_v23 = vpack.c.bf16 %v10857_v13, %v10851_v37  ;;  %vm16416_vm3 = vmmov %vm16415_vm4 }
 0x739   :  { %v13318_v18 = vunpack.i.h.bf16 %v13316_v30  ;;  %v13317_v24 = vunpack.i.l.bf16 %v13316_v30  ;;  %v13338_v22 = vunpack.i.h.bf16 %v15929_v39  ;;  %v10853_v49 = vsel %vm16416_vm3, %v13327_v20, %v13328_v58  ;;  %vm16417_vm2 = vmmov %vm16416_vm3 }
 0x73a   :  { %11721 = vmatmul.mubr.msk.f32.vlgmr.msra.gmra.mrb[20].mxu0 %vm16409_vm6, %v11720_v26  ;;  %v13337_v51 = vunpack.i.l.bf16 %v15929_v39  ;;  %vm16418_vm1 = vmmov %vm16414_vm5 }
 0x73b   :  { %12087 = vmatpush1.bf16.msra.mxu0 %v12086_v48  ;;  %10736 = vmatprep.mubr.f32.mxu0 %v13379_v0  ;;  %v10856_v17 = vsel %vm16412_vm11, %v13318_v18, %v13312_v61  ;;  %v10850_v56 = vsel %vm16413_vm15, %v13317_v24, %v13307_v12  ;;  %vm16419_vm10 = vmmov %vm16417_vm2  ;;  %v11728_v24 = vld [vmem:[%s16003_s7 + $0x40] sm:$0xff] }
 0x73c   :  { %v15940_v29 = vpop.permute.xlu1 %13340  ;;  %v13331_v4 = vpop.permute.xlu0 %13330  ;;  %12089 = vmatprep.subr.bf16.mxu0 %v12088_v3  ;;  %v12094_v2 = vpack.c.bf16 %v10856_v17, %v10850_v56  ;;  %vm16420_vm0 = vmmov %vm16417_vm2  ;;  %v13389_v17 = vmov 1966171168  }
 0x73d   :  { %v13333_v6 = vunpack.i.h.bf16 %v13331_v4  ;;  %v13332_v44 = vunpack.i.l.bf16 %v13331_v4  ;;  %v10852_v53 = vsel %vm16420_vm0, %v13308_v54, %v13327_v20  ;;  %v13343_v7 = vunpack.i.h.bf16 %v15940_v29  ;;  %vm16421_vm13 = vmmov %vm16420_vm0 }
 0x73e   :  { %11722 = vmatmul.mubr.msk.f32.vlgmr.msra.gmra.mrb[22].mxu0 %vm16414_vm5, %v11720_v26  ;;  %v13342_v41 = vunpack.i.l.bf16 %v15940_v29  ;;  %v10855_v50 = vsel %vm16421_vm13, %v13337_v51, %v13338_v22  ;;  %vm16422_vm12 = vmmov %vm16420_vm0  ;;  %v11400_v56 = vunpack.c.l.s4 %v13389_v17 }
 0x73f   :  { %12091 = vmatpush1.bf16.msra.mxu0 %v12090_v1  ;;  %10807 = vmatprep.mubr.f32.mxu0 %v13379_v0  ;;  %v10859_v57 = vsel %vm16415_vm4, %v13332_v44, %v13333_v6  ;;  %v10858_v47 = vsel %vm16417_vm2, %v13313_v55, %v13332_v44  ;;  %vm16423_vm9 = vmmov %vm16418_vm1 }
 0x740   :  { %v13356_v59 = vpop.permute.xlu1 %13355  ;;  %v13346_v27 = vpop.permute.xlu0 %13345  ;;  %12093 = vmatprep.subr.bf16.mxu0 %v12092_v23  ;;  %v12096_v46 = vpack.c.bf16 %v10859_v57, %v10853_v49  ;;  %v12098_v16 = vpack.c.bf16 %v10858_v47, %v10852_v53  ;;  %vm16425_vm6 = vmmov %vm16420_vm0  ;;  %v11401_v49 = vunpack.c.0.s8 %v11400_v56 }
 0x741   :  { %v13348_v52 = vunpack.i.h.bf16 %v13346_v27  ;;  %v13347_v60 = vunpack.i.l.bf16 %v13346_v27  ;;  %v13358_v14 = vunpack.i.h.bf16 %v13356_v59  ;;  %v13357_v15 = vunpack.i.l.bf16 %v13356_v59  ;;  %vm16426_vm8 = vmmov %vm16424_vm14 }
 0x742   :  { %11723 = vmatmul.mubr.msk.f32.vlgmr.msra.gmra.mrb[24].mxu0 %vm16418_vm1, %v11720_v26  ;;  %v10854_v38 = vsel %vm16425_vm6, %v13328_v58, %v13337_v51  ;;  %v11127_v21 = vsel %vm16426_vm8, %v13342_v41, %v13343_v7  ;;  %vm16427_vm7 = vmmov %vm16426_vm8  ;;  %v16442_v51 = vlaneseq }
 0x743   :  { %12095 = vmatpush1.bf16.msra.mxu0 %v12094_v2  ;;  %10941 = vmatprep.mubr.f32.mxu0 %v13379_v0  ;;  %v10861_v8 = vsel %vm16419_vm10, %v13347_v60, %v13348_v52  ;;  %v10860_v35 = vsel %vm16422_vm12, %v13333_v6, %v13347_v60  ;;  %vm16428_vm11 = vmmov %vm16418_vm1 }
 0x744   :  { %v13366_v31 = vpop.permute.xlu1 %13365  ;;  %v13351_v34 = vpop.permute.xlu0 %13350  ;;  %12097 = vmatprep.subr.bf16.mxu0 %v12096_v46  ;;  %v12100_v33 = vpack.c.bf16 %v10861_v8, %v10855_v50  ;;  %v12102_v36 = vpack.c.bf16 %v10860_v35, %v10854_v38  ;;  %vm16429_vm15 = vmmov %vm16427_vm7  ;;  %v11403_v2 = vshrl.u32 %v16442_v51, 7  ;;  %vm11439_vm8 = vcmp.lt.s32.totalorder %v16442_v51, 768 }
 0x745   :  { %v13353_v43 = vunpack.i.h.bf16 %v13351_v34  ;;  %v13352_v19 = vunpack.i.l.bf16 %v13351_v34  ;;  %v13368_v42 = vunpack.i.h.bf16 %v13366_v31  ;;  %v13367_v10 = vunpack.i.l.bf16 %v13366_v31  ;;  %vm16430_vm5 = vmmov %vm16427_vm7 }
 0x746   :  { %11725 = vmatmul.mubr.msk.f32.vlgmr.msra.gmra.mrb[20].mxu0 %vm16423_vm9, %v11724_v62  ;;  %v11126_v45 = vsel %vm16429_vm15, %v13357_v15, %v13342_v41  ;;  %vm16431_vm4 = vmmov %vm16430_vm5  ;;  %v11404_v8 = vsub.s32 %v11401_v49, %v11403_v2 }
 0x747   :  { %12099 = vmatpush1.bf16.msra.mxu0 %v12098_v16  ;;  %11012 = vmatprep.mubr.f32.mxu0 %v13379_v0  ;;  %v11133_v25 = vsel %vm16424_vm14, %v13352_v19, %v13353_v43  ;;  %v11132_v11 = vsel %vm16427_vm7, %v13358_v14, %v13352_v19  ;;  %v11135_v30 = vsel %vm16431_vm4, %v13367_v10, %v13368_v42  ;;  %vm16432_vm3 = vmmov %vm16431_vm4 }
 0x748   :  { %v13361_v28 = vpop.permute.xlu0 %13360  ;;  %12101 = vmatprep.subr.bf16.mxu0 %v12100_v33  ;;  %v13376_v12 = vpop.permute.xlu1 %13375  ;;  %v12104_v26 = vpack.c.bf16 %v11133_v25, %v11127_v21  ;;  %v12106_v9 = vpack.c.bf16 %v11132_v11, %v11126_v45  ;;  %vm16433_vm2 = vmmov %vm16418_vm1 }
 0x749   :  { %v13363_v5 = vunpack.i.h.bf16 %v13361_v28  ;;  %v13362_v54 = vunpack.i.l.bf16 %v13361_v28  ;;  %v13378_v55 = vunpack.i.h.bf16 %v13376_v12  ;;  %v13377_v61 = vunpack.i.l.bf16 %v13376_v12  ;;  %vm16434_vm1 = vmmov %vm16432_vm3 }
 0x74a   :  { %11726 = vmatmul.mubr.msk.f32.vlgmr.msra.gmra.mrb[22].mxu0 %vm16428_vm11, %v11724_v62  ;;  %vm16435_vm10 = vmmov %vm16434_vm1 }
 0x74b   :  { %12103 = vmatpush1.bf16.msra.mxu0 %v12102_v36  ;;  %11083 = vmatprep.mubr.f32.mxu0 %v13379_v0  ;;  %v11129_v40 = vsel %vm16430_vm5, %v13362_v54, %v13363_v5  ;;  %v11128_v32 = vsel %vm16432_vm3, %v13343_v7, %v13362_v54  ;;  %v11134_v37 = vsel %vm16435_vm10, %v13353_v43, %v13367_v10  ;;  %vm16436_vm0 = vmmov %vm16434_vm1 }
 0x74c   :  { %v13371_v39 = vpop.permute.xlu0 %13370  ;;  %12105 = vmatprep.subr.bf16.mxu0 %v12104_v26  ;;  %v12108_v18 = vpack.c.bf16 %v11135_v30, %v11129_v40  ;;  %v12110_v58 = vpack.c.bf16 %v11134_v37, %v11128_v32  ;;  %v11137_v20 = vsel %vm16436_vm0, %v13377_v61, %v13378_v55  ;;  %vm16437_vm13 = vmmov %vm16436_vm0 }
 0x74d   :  { %v13373_v48 = vunpack.i.h.bf16 %v13371_v39  ;;  %v13372_v63 = vunpack.i.l.bf16 %v13371_v39  ;;  %vm16438_vm12 = vmmov %vm16433_vm2 }
 0x74e   :  { %11727 = vmatmul.mubr.msk.f32.vlgmr.msra.gmra.mrb[24].mxu0 %vm16433_vm2, %v11724_v62  ;;  %vm16439_vm9 = vmmov %vm16436_vm0 }
 0x74f   :  { %12107 = vmatpush1.bf16.msra.mxu0 %v12106_v9  ;;  %11217 = vmatprep.mubr.f32.mxu0 %v13379_v0  ;;  %v11131_v3 = vsel %vm16434_vm1, %v13372_v63, %v13373_v48  ;;  %v11130_v29 = vsel %vm16437_vm13, %v13363_v5, %v13372_v63  ;;  %v11136_v1 = vsel %vm16439_vm9, %v13368_v42, %v13377_v61  ;;  %vm16440_vm14 = vmmov %vm16433_vm2 }
 0x750   :  { %12109 = vmatprep.subr.bf16.mxu0 %v12108_v18  ;;  %v12112_v4 = vpack.c.bf16 %v11137_v20, %v11131_v3  ;;  %v12114_v6 = vpack.c.bf16 %v11136_v1, %v11130_v29  ;;  %vm16441_vm6 = vmmov %vm16433_vm2 }
 0x752   :  { %11729 = vmatmul.mubr.msk.f32.vlgmr.msra.gmra.mrb[20].mxu0 %vm16438_vm12, %v11728_v24 }
 0x753   :  { %12111 = vmatpush1.bf16.msra.mxu0 %v12110_v58  ;;  %11288 = vmatprep.mubr.f32.mxu0 %v13379_v0 }
 0x754   :  { %12113 = vmatprep.subr.bf16.mxu0 %v12112_v4 }
 0x756   :  { %11730 = vmatmul.mubr.msk.f32.vlgmr.msra.gmra.mrb[22].mxu0 %vm16440_vm14, %v11728_v24 }
 0x757   :  { %12115 = vmatpush1.bf16.msra.mxu0 %v12114_v6  ;;  %11359 = vmatprep.mubr.f32.mxu0 %v13379_v0 }
 0x75a   :  { %11731 = vmatmul.mubr.msk.f32.vlgmr.msra.gmra.mrb[24].mxu0 %vm16441_vm6, %v11728_v24 }
 0x75d   :  { %v11376_v44 = vpop.permute.xlu0 %11375 }
 0x825   :  { %v11219_v13 = vpop.f32.mrb[20].mxu0 }
 0x826   :  { %v11378_v23 = vadd.f32 %v11376_v44, %v11219_v13  ;;  %v11221_v57 = vpop.f32.mrb[21].mxu0 }
 0x827   :  { %v11379_v22 = vadd.f32 %v11376_v44, %v11221_v57 }
 0x828   :  { %v11384_v59 = vmax.f32 %v11378_v23, 0.0 }
 0x829   :  { %v11385_v27 = vmax.f32 %v11379_v22, 0.0  ;;  %v11290_v52 = vpop.f32.mrb[22].mxu0 }
 0x82a   :  { %v11380_v60 = vadd.f32 %v11376_v44, %v11290_v52  ;;  %v11292_v47 = vpop.f32.mrb[23].mxu0 }
 0x82b   :  { %v11396_v46 = vcombine.low %v11384_v59, %v11385_v27  ;;  %v11381_v62 = vadd.f32 %v11376_v44, %v11292_v47 }
 0x82c   :  { %v11386_v0 = vmax.f32 %v11380_v60, 0.0 }
 0x82d   :  { %v11387_v53 = vmax.f32 %v11381_v62, 0.0  ;;  %v11361_v7 = vpop.f32.mrb[24].mxu0  ;;  %v11405_v19 = vrot.slane %v11396_v46, %v11404_v8 }
 0x82e   :  { %v11382_v41 = vadd.f32 %v11376_v44, %v11361_v7  ;;  %v11363_v31 = vpop.f32.mrb[25].mxu0 }
 0x82f   :  { %v11397_v34 = vcombine.low %v11386_v0, %v11387_v53  ;;  %v11383_v16 = vadd.f32 %v11376_v44, %v11363_v31 }
 0x830   :  { %v11388_v43 = vmax.f32 %v11382_v41, 0.0 }
 0x831   :  { %v11412_v50 = vrot.slane %v11397_v34, %v11404_v8  ;;  %v11389_v35 = vmax.f32 %v11383_v16, 0.0 }
 0x833   :  { %v11420_v33 = vcombine.low %v11405_v19, %v11412_v50  ;;  %v11398_v14 = vcombine.low %v11388_v43, %v11389_v35 }
 0x835   :  { %v11419_v15 = vrot.slane %v11398_v14, %v11404_v8  ;;  %v11427_v25 = vrot.slane %v11420_v33, %v11404_v8 }
 0x837   :  { %v11434_v38 = vrot.slane %v11419_v15, %v11404_v8 }
 0x839   :  { %v11435_v42 = vcombine.low %v11427_v25, %v11434_v38 }
 0x83b   :  { %11441 = vst.msk [vmem:[%s16004_s9] sm:$0x3f] %vm11439_vm8, %v11435_v42 }

</bundles_post_ra>
